<compile_context>
chip_gen: v5e
topology: v5e:2x2
jax: 0.10.0
libtpu: 0.0.40
codegen_flags: <defaults>
</compile_context>

<pallas_src>
import math
from functools import partial

import jax
import jax.numpy as jnp
from jax.experimental import pallas as pl
from jax.experimental.pallas import tpu as pltpu


def autopad(k, d=1, p=None):
    """Same autopad as the reference repo (k=3, d=1 -> p=1)."""
    if d > 1:
        k = d * (k - 1) + 1
    if p is None:
        p = k // 2
    return p


def _round_up(x, m):
    return ((x + m - 1) // m) * m


def _cdiv(a, b):
    return -(-a // b)


_HALO_ROWS = 8  # fixed halo block: >= K-1 for any K <= 9, sublane aligned


def _vmem_config():
    """Per-generation (tile budget, scoped VMEM limit) in bytes."""
    try:
        cap = int(pltpu.get_tpu_info().vmem_capacity_bytes)
    except Exception:          # fall back to the smallest-VMEM generation (v7x)
        cap = 64 * 1024 * 1024
    if cap >= 96 * 1024 * 1024:                      # v5e / v6e: 128 MiB VMEM
        return 72 * 1024 * 1024, 100 * 1024 * 1024
    return 36 * 1024 * 1024, 52 * 1024 * 1024        # v7x: 64 MiB VMEM


def _pick_tile_h(H, W_al, Wp_al, c1p, c2p, K, fuse_kw, budget_bytes):
    """Largest 8-multiple row tile whose working set fits `budget_bytes`.

    Accounts for the double-buffered input rows, the fixed 8-row halo block,
    the bf16 output block, double-buffered weights/BN, the xw halo-concat
    copy, the per-kh im2col piece, the f32 matmul temporary and the f32
    scratch accumulator.
    """
    depth = K * c1p if fuse_kw else c1p
    per_row = (
        2 * Wp_al * c1p * 2          # input row block (bf16), double buffered
        + Wp_al * c1p * 2            # xw halo-concat copy (bf16)
        + Wp_al * c1p * 2            # shifted `rows` temporary (bf16)
        + 2 * W_al * depth * 2       # im2col piece (+concat headroom), bf16
        + 2 * W_al * c2p * 2         # bf16 output block, double buffered
        + W_al * c2p * 4             # f32 scratch accumulator
        + W_al * c2p * 4             # f32 matmul result temporary
    )
    fixed = (
        2 * 2 * _HALO_ROWS * Wp_al * c1p * 2   # halo block, double buffered
        + 2 * K * K * c1p * c2p * 2            # weights (bf16), double buffered
        + 2 * 2 * c2p * 4                      # folded BN, double buffered
        + (K - 1) * Wp_al * c1p * 2            # halo rows inside the xw copy
    )
    avail = budget_bytes - fixed
    th = avail // per_row if avail > 0 else 0
    th = max(8, (th // 8) * 8)       # need at least one sublane tile of rows
    return int(min(th, _round_up(H, 8)))


def _conv_bn_gelu_kernel(xa_ref, xb_ref, w_ref, bn_ref, o_ref, acc_ref, *,
                         K, fuse_kw):
    """One (batch, row-tile) grid step.

    xa_ref : (TH, Wp_al, C1p)   padded input rows [i*TH, (i+1)*TH)        (bf16)
    xb_ref : (8,  Wp_al, C1p)   padded input rows [(i+1)*TH, (i+1)*TH+8)  (bf16)
    w_ref  : (K, K*C1p, C2p)    conv taps, kw-major along dim 1           (bf16)
    bn_ref : (2, C2p)           rows = (scale, shift), folded BatchNorm   (f32)
    o_ref  : (TH, W_al, C2p)    output rows [i*TH, (i+1)*TH)              (bf16)
    acc_ref: (TH*W_al, C2p)     f32 accumulator scratch
    """
    TH, W_al, C2p = o_ref.shape
    C1p = xa_ref.shape[-1]

    # Halo'd window for this row tile: (TH + K - 1, Wp_al, C1p).
    xw = jnp.concatenate([xa_ref[...], xb_ref[0:K - 1]], axis=0)

    if fuse_kw:
        # K matmuls of contraction depth K*C1p (fills a 256-deep MXU when
        # C1p == 128); only one (TH, W_al, K*C1p) piece is live at a time.
        for kh in range(K):
            rows = xw[kh:kh + TH]                              # (TH, Wp_al, C1p)
            piece = jnp.concatenate(
                [rows[:, kw:kw + W_al, :] for kw in range(K)], axis=-1)
            lhs = piece.reshape(TH * W_al, K * C1p)
            contrib = jnp.dot(lhs, w_ref[kh],
                              preferred_element_type=jnp.float32)
            if kh == 0:
                acc_ref[...] = contrib
            else:
                acc_ref[...] += contrib
    else:
        # Large C1: per-tap contraction depth C1p already fills the MXU and
        # keeps the live im2col piece small.
        for kh in range(K):
            rows = xw[kh:kh + TH]
            for kw in range(K):
                lhs = rows[:, kw:kw + W_al, :].reshape(TH * W_al, C1p)
                contrib = jnp.dot(lhs, w_ref[kh, kw * C1p:(kw + 1) * C1p, :],
                                  preferred_element_type=jnp.float32)
                if kh == 0 and kw == 0:
                    acc_ref[...] = contrib
                else:
                    acc_ref[...] += contrib

    scale = bn_ref[0:1, :]
    shift = bn_ref[1:2, :]
    y = acc_ref[...] * scale + shift
    # Exact erf-based GELU (matches nn.GELU() default).
    y = 0.5 * y * (1.0 + jax.lax.erf(y * (1.0 / math.sqrt(2.0))))
    o_ref[...] = y.reshape(TH, W_al, C2p).astype(o_ref.dtype)


def conv_bn_gelu(x_nchw, weight_oihw, gamma, beta, running_mean, running_var,
                 k=3, s=1, d=1, p=None, *, tile_h=None, fuse_kw=None):
    """Forward pass of `Conv` (conv -> BN(eval) -> GELU). NCHW in, NCHW out (bf16)."""
    assert s == 1 and d == 1, "only stride=1, dilation=1 supported"
    pad = autopad(k, d, p)
    K = k
    assert K % 2 == 1 and pad == K // 2, "kernel assumes odd k with 'same' padding"
    assert K - 1 <= _HALO_ROWS

    N, C1, H, W = x_nchw.shape
    C2 = weight_oihw.shape[0]

    # Lane-dense channel padding; width padded to a sublane multiple so the
    # in-kernel (H,W)->(H*W) reshapes and stores stay tile aligned.
    C1p = _round_up(C1, 128)
    C2p = _round_up(C2, 128)
    W_al = _round_up(W, 8)
    Wp_al = W_al + 8                         # >= W_al + K - 1, multiple of 8

    if fuse_kw is None:
        fuse_kw = C1p <= 128                 # fuse kw taps only while per-tap
                                             # contraction is shallower than the MXU
    budget, vmem_limit = _vmem_config()
    if tile_h is None:
        TH = _pick_tile_h(H, W_al, Wp_al, C1p, C2p, K, fuse_kw, budget)
    else:
        TH = min(_round_up(tile_h, 8), _round_up(H, 8))
    n_ht = _cdiv(H, TH)
    H_rows = n_ht * TH + _HALO_ROWS          # each row tile also reads an 8-row halo

    # bf16 BEFORE the layout transpose (halves the transpose HBM traffic).
    x = jnp.transpose(x_nchw.astype(jnp.bfloat16), (0, 2, 3, 1))
    xp = jnp.pad(x, ((0, 0),
                     (pad, H_rows - H - pad),
                     (pad, Wp_al - W - pad),
                     (0, C1p - C1)))

    # OIHW (c2,c1,kh,kw) -> (kh, kw*C1p + c1, c2): the per-kh slab matches the
    # kw-major channel concat built inside the kernel.
    w = jnp.transpose(weight_oihw, (2, 3, 1, 0))                 # (K, K, C1, C2)
    w = jnp.pad(w, ((0, 0), (0, 0), (0, C1p - C1), (0, C2p - C2)))
    w = w.reshape(K, K * C1p, C2p).astype(jnp.bfloat16)

    # Fold eval-mode BatchNorm into a single scale/shift.
    eps = 1e-5
    scale = gamma * jax.lax.rsqrt(running_var + eps)
    shift = beta - running_mean * scale
    bn = jnp.stack([jnp.pad(scale, (0, C2p - C2)),
                    jnp.pad(shift, (0, C2p - C2))]).astype(jnp.float32)

    hb_per_tile = TH // _HALO_ROWS           # TH is a multiple of 8

    kernel = partial(_conv_bn_gelu_kernel, K=K, fuse_kw=fuse_kw)
    out = pl.pallas_call(
        kernel,
        out_shape=jax.ShapeDtypeStruct((N, n_ht * TH, W_al, C2p), jnp.bfloat16),
        grid=(N, n_ht),
        in_specs=[
            # Row block i of the padded input.
            pl.BlockSpec((None, TH, Wp_al, C1p), lambda n, i: (n, i, 0, 0)),
            # Fixed 8-row halo block: rows [(i+1)*TH, (i+1)*TH + 8) of xp.
            pl.BlockSpec((None, _HALO_ROWS, Wp_al, C1p),
                         lambda n, i: (n, (i + 1) * hb_per_tile, 0, 0)),
            # Grid-invariant weights / folded BN.
            pl.BlockSpec((K, K * C1p, C2p), lambda n, i: (0, 0, 0)),
            pl.BlockSpec((2, C2p), lambda n, i: (0, 0)),
        ],
        out_specs=pl.BlockSpec((None, TH, W_al, C2p), lambda n, i: (n, i, 0, 0)),
        scratch_shapes=[pltpu.VMEM((TH * W_al, C2p), jnp.float32)],
        compiler_params=pltpu.CompilerParams(
            dimension_semantics=("parallel", "parallel"),
            vmem_limit_bytes=vmem_limit),
    )(xp, xp, w, bn)

    # Crop channel / spatial padding, NHWC -> NCHW (stays bf16).
    out = out[:, :H, :W, :C2]
    return jnp.transpose(out, (0, 3, 1, 2))


def _reference(x_nchw, weight_oihw, gamma, beta, mean, var, pad):
    # bf16 inputs + f32 accumulation to mirror the kernel's MXU precision.
    y = jax.lax.conv_general_dilated(
        x_nchw.astype(jnp.bfloat16), weight_oihw.astype(jnp.bfloat16),
        window_strides=(1, 1), padding=[(pad, pad), (pad, pad)],
        dimension_numbers=("NCHW", "OIHW", "NCHW"),
        preferred_element_type=jnp.float32)
    scale = (gamma / jnp.sqrt(var + 1e-5))[None, :, None, None]
    y = (y - mean[None, :, None, None]) * scale + beta[None, :, None, None]
    return 0.5 * y * (1.0 + jax.lax.erf(y / jnp.sqrt(2.0)))


if __name__ == "__main__":
    # Small shapes: batch=2, c1=4, c2=8, 16x16 spatial, 3x3 kernel.
    N, C1, C2, H, W, K = 2, 4, 8, 16, 16, 3

    key = jax.random.PRNGKey(0)
    kx, kwt, kg, kb, km, kv = jax.random.split(key, 6)

    x = jax.random.normal(kx, (N, C1, H, W), dtype=jnp.float32)
    weight = jax.random.normal(kwt, (C2, C1, K, K), dtype=jnp.float32) * 0.1
    gamma = 1.0 + 0.1 * jax.random.normal(kg, (C2,), dtype=jnp.float32)
    beta = 0.1 * jax.random.normal(kb, (C2,), dtype=jnp.float32)
    running_mean = 0.1 * jax.random.normal(km, (C2,), dtype=jnp.float32)
    running_var = 1.0 + 0.1 * jnp.abs(jax.random.normal(kv, (C2,), dtype=jnp.float32))

    ref = _reference(x, weight, gamma, beta, running_mean, running_var,
                     pad=autopad(K))

    def check(out):
        out = jax.block_until_ready(out)
        assert out.shape == (N, C2, H, W), out.shape
        err = float(jnp.max(jnp.abs(out.astype(jnp.float32) - ref)))
        assert err < 3e-2, err   # bf16 output quantization + accumulation order

    # 1) Default config: whole H in one row tile, fused per-kh matmul path.
    check(conv_bn_gelu(x, weight, gamma, beta, running_mean, running_var, k=K))

    # 2) Forced row tiling (tile_h=8 -> 2 row tiles) to exercise the 8-row halo.
    check(conv_bn_gelu(x, weight, gamma, beta, running_mean, running_var,
                       k=K, tile_h=8))

    # 3) Per-tap (large-C1) accumulation path.
    check(conv_bn_gelu(x, weight, gamma, beta, running_mean, running_var,
                       k=K, tile_h=8, fuse_kw=False))

    print("KERNEL_OK")
</pallas_src>

<mosaic_0001>
module attributes {stable_mosaic.version = 11 : i64} {
  func.func @_conv_bn_gelu_kernel(%arg0: i32, %arg1: i32, %arg2: memref<1x16x24x128xbf16, #tpu.memory_space<vmem>>, %arg3: memref<1x8x24x128xbf16, #tpu.memory_space<vmem>>, %arg4: memref<3x384x128xbf16, #tpu.memory_space<vmem>>, %arg5: memref<2x128xf32, #tpu.memory_space<vmem>>, %arg6: memref<1x16x16x128xbf16, #tpu.memory_space<vmem>>, %arg7: memref<256x128xf32, #tpu.memory_space<vmem>>) attributes {dimension_semantics = [#tpu.dimension_semantics<parallel>, #tpu.dimension_semantics<parallel>], iteration_bounds = array<i64: 2, 1>, scalar_prefetch = 0 : i64, scratch_operands = 1 : i64, tpu.core_type = #tpu.core_type<tc>, window_params = [{transform_indices = @transform_0, window_bounds = array<i64: 1, 16, 24, 128>}, {transform_indices = @transform_1, window_bounds = array<i64: 1, 8, 24, 128>}, {pipeline_mode = #tpu.pipeline_mode<synchronous>, transform_indices = @transform_2, window_bounds = array<i64: 3, 384, 128>}, {pipeline_mode = #tpu.pipeline_mode<synchronous>, transform_indices = @transform_3, window_bounds = array<i64: 2, 128>}, {transform_indices = @transform_4, window_bounds = array<i64: 1, 16, 16, 128>}]} {
    %c0 = arith.constant 0 : index
    %c0_0 = arith.constant 0 : index
    %c0_1 = arith.constant 0 : index
    %c0_2 = arith.constant 0 : index
    %0 = vector.load %arg2[%c0, %c0_0, %c0_1, %c0_2] : memref<1x16x24x128xbf16, #tpu.memory_space<vmem>>, vector<1x16x24x128xbf16>
    %1 = vector.shape_cast %0 : vector<1x16x24x128xbf16> to vector<16x24x128xbf16>
    %c0_3 = arith.constant 0 : index
    %c0_4 = arith.constant 0 : index
    %c0_5 = arith.constant 0 : index
    %c0_6 = arith.constant 0 : index
    %2 = vector.load %arg3[%c0_3, %c0_4, %c0_5, %c0_6] : memref<1x8x24x128xbf16, #tpu.memory_space<vmem>>, vector<1x2x24x128xbf16>
    %3 = vector.shape_cast %2 : vector<1x2x24x128xbf16> to vector<2x24x128xbf16>
    %4 = tpu.concatenate %1, %3 in 0 : vector<16x24x128xbf16>, vector<2x24x128xbf16> -> vector<18x24x128xbf16>
    %5 = vector.extract_strided_slice %4 {offsets = [0, 0, 0], sizes = [16, 24, 128], strides = [1, 1, 1]} : vector<18x24x128xbf16> to vector<16x24x128xbf16>
    %6 = vector.extract_strided_slice %5 {offsets = [0, 0, 0], sizes = [16, 16, 128], strides = [1, 1, 1]} : vector<16x24x128xbf16> to vector<16x16x128xbf16>
    %7 = vector.extract_strided_slice %5 {offsets = [0, 1, 0], sizes = [16, 16, 128], strides = [1, 1, 1]} : vector<16x24x128xbf16> to vector<16x16x128xbf16>
    %8 = vector.extract_strided_slice %5 {offsets = [0, 2, 0], sizes = [16, 16, 128], strides = [1, 1, 1]} : vector<16x24x128xbf16> to vector<16x16x128xbf16>
    %9 = tpu.concatenate %6, %7, %8 in 2 : vector<16x16x128xbf16>, vector<16x16x128xbf16>, vector<16x16x128xbf16> -> vector<16x16x384xbf16>
    %10 = vector.shape_cast %9 : vector<16x16x384xbf16> to vector<256x384xbf16>
    %c0_7 = arith.constant 0 : index
    %c0_8 = arith.constant 0 : index
    %c0_9 = arith.constant 0 : index
    %11 = vector.load %arg4[%c0_7, %c0_8, %c0_9] : memref<3x384x128xbf16, #tpu.memory_space<vmem>>, vector<1x384x128xbf16>
    %12 = vector.shape_cast %11 : vector<1x384x128xbf16> to vector<384x128xbf16>
    %cst = arith.constant dense<0.000000e+00> : vector<256x128xf32>
    %13 = tpu.matmul %10, %12, %cst {dimension_numbers = #tpu.dot_dimension_numbers<[1], [0], [0], [1], [0, 0, 1, 1], [], []>} : vector<256x384xbf16>, vector<384x128xbf16>, vector<256x128xf32> -> vector<256x128xf32>
    %c0_10 = arith.constant 0 : index
    %c0_11 = arith.constant 0 : index
    %14 = vector.load %arg7[%c0_10, %c0_11] : memref<256x128xf32, #tpu.memory_space<vmem>>, vector<256x128xf32>
    tpu.vector_store %arg7[%c0_10, %c0_11], %13 {strides = array<i32>} : memref<256x128xf32, #tpu.memory_space<vmem>>, vector<256x128xf32>,
    %15 = vector.extract_strided_slice %4 {offsets = [1, 0, 0], sizes = [16, 24, 128], strides = [1, 1, 1]} : vector<18x24x128xbf16> to vector<16x24x128xbf16>
    %16 = vector.extract_strided_slice %15 {offsets = [0, 0, 0], sizes = [16, 16, 128], strides = [1, 1, 1]} : vector<16x24x128xbf16> to vector<16x16x128xbf16>
    %17 = vector.extract_strided_slice %15 {offsets = [0, 1, 0], sizes = [16, 16, 128], strides = [1, 1, 1]} : vector<16x24x128xbf16> to vector<16x16x128xbf16>
    %18 = vector.extract_strided_slice %15 {offsets = [0, 2, 0], sizes = [16, 16, 128], strides = [1, 1, 1]} : vector<16x24x128xbf16> to vector<16x16x128xbf16>
    %19 = tpu.concatenate %16, %17, %18 in 2 : vector<16x16x128xbf16>, vector<16x16x128xbf16>, vector<16x16x128xbf16> -> vector<16x16x384xbf16>
    %20 = vector.shape_cast %19 : vector<16x16x384xbf16> to vector<256x384xbf16>
    %c1 = arith.constant 1 : index
    %c0_12 = arith.constant 0 : index
    %c0_13 = arith.constant 0 : index
    %21 = vector.load %arg4[%c1, %c0_12, %c0_13] : memref<3x384x128xbf16, #tpu.memory_space<vmem>>, vector<1x384x128xbf16>
    %22 = vector.shape_cast %21 : vector<1x384x128xbf16> to vector<384x128xbf16>
    %cst_14 = arith.constant dense<0.000000e+00> : vector<256x128xf32>
    %23 = tpu.matmul %20, %22, %cst_14 {dimension_numbers = #tpu.dot_dimension_numbers<[1], [0], [0], [1], [0, 0, 1, 1], [], []>} : vector<256x384xbf16>, vector<384x128xbf16>, vector<256x128xf32> -> vector<256x128xf32>
    %c0_15 = arith.constant 0 : index
    %c0_16 = arith.constant 0 : index
    %24 = vector.load %arg7[%c0_15, %c0_16] : memref<256x128xf32, #tpu.memory_space<vmem>>, vector<256x128xf32>
    %25 = arith.addf %24, %23 : vector<256x128xf32>
    %c0_17 = arith.constant 0 : index
    %c0_18 = arith.constant 0 : index
    %26 = vector.load %arg7[%c0_17, %c0_18] : memref<256x128xf32, #tpu.memory_space<vmem>>, vector<256x128xf32>
    tpu.vector_store %arg7[%c0_17, %c0_18], %25 {strides = array<i32>} : memref<256x128xf32, #tpu.memory_space<vmem>>, vector<256x128xf32>,
    %27 = vector.extract_strided_slice %4 {offsets = [2, 0, 0], sizes = [16, 24, 128], strides = [1, 1, 1]} : vector<18x24x128xbf16> to vector<16x24x128xbf16>
    %28 = vector.extract_strided_slice %27 {offsets = [0, 0, 0], sizes = [16, 16, 128], strides = [1, 1, 1]} : vector<16x24x128xbf16> to vector<16x16x128xbf16>
    %29 = vector.extract_strided_slice %27 {offsets = [0, 1, 0], sizes = [16, 16, 128], strides = [1, 1, 1]} : vector<16x24x128xbf16> to vector<16x16x128xbf16>
    %30 = vector.extract_strided_slice %27 {offsets = [0, 2, 0], sizes = [16, 16, 128], strides = [1, 1, 1]} : vector<16x24x128xbf16> to vector<16x16x128xbf16>
    %31 = tpu.concatenate %28, %29, %30 in 2 : vector<16x16x128xbf16>, vector<16x16x128xbf16>, vector<16x16x128xbf16> -> vector<16x16x384xbf16>
    %32 = vector.shape_cast %31 : vector<16x16x384xbf16> to vector<256x384xbf16>
    %c2 = arith.constant 2 : index
    %c0_19 = arith.constant 0 : index
    %c0_20 = arith.constant 0 : index
    %33 = vector.load %arg4[%c2, %c0_19, %c0_20] : memref<3x384x128xbf16, #tpu.memory_space<vmem>>, vector<1x384x128xbf16>
    %34 = vector.shape_cast %33 : vector<1x384x128xbf16> to vector<384x128xbf16>
    %cst_21 = arith.constant dense<0.000000e+00> : vector<256x128xf32>
    %35 = tpu.matmul %32, %34, %cst_21 {dimension_numbers = #tpu.dot_dimension_numbers<[1], [0], [0], [1], [0, 0, 1, 1], [], []>} : vector<256x384xbf16>, vector<384x128xbf16>, vector<256x128xf32> -> vector<256x128xf32>
    %c0_22 = arith.constant 0 : index
    %c0_23 = arith.constant 0 : index
    %36 = vector.load %arg7[%c0_22, %c0_23] : memref<256x128xf32, #tpu.memory_space<vmem>>, vector<256x128xf32>
    %37 = arith.addf %36, %35 : vector<256x128xf32>
    %c0_24 = arith.constant 0 : index
    %c0_25 = arith.constant 0 : index
    %38 = vector.load %arg7[%c0_24, %c0_25] : memref<256x128xf32, #tpu.memory_space<vmem>>, vector<256x128xf32>
    tpu.vector_store %arg7[%c0_24, %c0_25], %37 {strides = array<i32>} : memref<256x128xf32, #tpu.memory_space<vmem>>, vector<256x128xf32>,
    %c0_26 = arith.constant 0 : index
    %c0_27 = arith.constant 0 : index
    %39 = vector.load %arg5[%c0_26, %c0_27] : memref<2x128xf32, #tpu.memory_space<vmem>>, vector<1x128xf32>
    %c1_28 = arith.constant 1 : index
    %c0_29 = arith.constant 0 : index
    %40 = vector.load %arg5[%c1_28, %c0_29] : memref<2x128xf32, #tpu.memory_space<vmem>>, vector<1x128xf32>
    %c0_30 = arith.constant 0 : index
    %c0_31 = arith.constant 0 : index
    %41 = vector.load %arg7[%c0_30, %c0_31] : memref<256x128xf32, #tpu.memory_space<vmem>>, vector<256x128xf32>
    %42 = vector.broadcast %39 : vector<1x128xf32> to vector<256x128xf32>
    %43 = arith.mulf %41, %42 : vector<256x128xf32>
    %44 = vector.broadcast %40 : vector<1x128xf32> to vector<256x128xf32>
    %45 = arith.addf %43, %44 : vector<256x128xf32>
    %cst_32 = arith.constant 5.000000e-01 : f32
    %46 = vector.broadcast %cst_32 : f32 to vector<256x128xf32>
    %47 = arith.mulf %46, %45 : vector<256x128xf32>
    %cst_33 = arith.constant 0.707106769 : f32
    %48 = vector.broadcast %cst_33 : f32 to vector<256x128xf32>
    %49 = arith.mulf %45, %48 : vector<256x128xf32>
    %50 = math.erf %49 : vector<256x128xf32>
    %cst_34 = arith.constant 1.000000e+00 : f32
    %51 = vector.broadcast %cst_34 : f32 to vector<256x128xf32>
    %52 = arith.addf %51, %50 : vector<256x128xf32>
    %53 = arith.mulf %47, %52 : vector<256x128xf32>
    %54 = vector.shape_cast %53 : vector<256x128xf32> to vector<16x16x128xf32>
    %55 = arith.truncf %54 : vector<16x16x128xf32> to vector<16x16x128xbf16>
    %c0_35 = arith.constant 0 : index
    %c0_36 = arith.constant 0 : index
    %c0_37 = arith.constant 0 : index
    %c0_38 = arith.constant 0 : index
    %56 = vector.load %arg6[%c0_35, %c0_36, %c0_37, %c0_38] : memref<1x16x16x128xbf16, #tpu.memory_space<vmem>>, vector<1x16x16x128xbf16>
    %57 = vector.shape_cast %56 : vector<1x16x16x128xbf16> to vector<16x16x128xbf16>
    %58 = vector.shape_cast %55 : vector<16x16x128xbf16> to vector<1x16x16x128xbf16>
    tpu.vector_store %arg6[%c0_35, %c0_36, %c0_37, %c0_38], %58 {strides = array<i32>} : memref<1x16x16x128xbf16, #tpu.memory_space<vmem>>, vector<1x16x16x128xbf16>,
    return
  }
  func.func @transform_0(%arg0: i32, %arg1: i32) -> (i32, i32, i32, i32) {
    %c0_i32 = arith.constant 0 : i32
    %c0_i32_0 = arith.constant 0 : i32
    %c0_i32_1 = arith.constant 0 : i32
    return %arg0, %arg1, %c0_i32, %c0_i32_0 : i32, i32, i32, i32
  }
  func.func @transform_1(%arg0: i32, %arg1: i32) -> (i32, i32, i32, i32) {
    %c1_i32 = arith.constant 1 : i32
    %0 = arith.addi %arg1, %c1_i32 : i32
    %c2_i32 = arith.constant 2 : i32
    %1 = arith.muli %0, %c2_i32 : i32
    %c0_i32 = arith.constant 0 : i32
    %c0_i32_0 = arith.constant 0 : i32
    %c0_i32_1 = arith.constant 0 : i32
    return %arg0, %1, %c0_i32, %c0_i32_0 : i32, i32, i32, i32
  }
  func.func @transform_2(%arg0: i32, %arg1: i32) -> (i32, i32, i32) {
    %c0_i32 = arith.constant 0 : i32
    %c0_i32_0 = arith.constant 0 : i32
    %c0_i32_1 = arith.constant 0 : i32
    %c0_i32_2 = arith.constant 0 : i32
    return %c0_i32, %c0_i32_0, %c0_i32_1 : i32, i32, i32
  }
  func.func @transform_3(%arg0: i32, %arg1: i32) -> (i32, i32) {
    %c0_i32 = arith.constant 0 : i32
    %c0_i32_0 = arith.constant 0 : i32
    %c0_i32_1 = arith.constant 0 : i32
    return %c0_i32, %c0_i32_0 : i32, i32
  }
  func.func @transform_4(%arg0: i32, %arg1: i32) -> (i32, i32, i32, i32) {
    %c0_i32 = arith.constant 0 : i32
    %c0_i32_0 = arith.constant 0 : i32
    %c0_i32_1 = arith.constant 0 : i32
    return %arg0, %arg1, %c0_i32, %c0_i32_0 : i32, i32, i32, i32
  }
}

</mosaic_0001>

<bundles_post_ra>
// kernel: tpu_custom_call.1
= control target key start
LH: loop header
LB: loop body
LE: loop exit
PB: predicated region body
PF: predicated region fallthrough
CT: control target
= control target key end

     0   :  { %s7241_s0 = inlined_call_operand.hbm [shape: bf16[2,24,24,128], index: 0, kind: input, shape index: {}]   ;;  %s7242_s1 = inlined_call_operand.hbm [shape: bf16[2,24,24,128], index: 1, kind: input, shape index: {}]   ;;  %s7243_s2 = inlined_call_operand.hbm [shape: bf16[3,384,128], index: 2, kind: input, shape index: {}]   ;;  %s7244_s3 = inlined_call_operand.vmem [shape: f32[2,128], index: 3, kind: input, shape index: {}]   ;;  %s7245_s4 = inlined_call_operand.hbm [shape: bf16[2,16,16,128], index: 4, kind: output, shape index: {}]  }
   0x1   :  { %7258 = sst [smem:[#allocation62_spill]] %s7241_s0 }
   0x2   :  { %7259 = sst [smem:[#allocation63_spill]] %s7243_s2 }
   0x3   :  { %9 = vsyncpa [#allocation4], 0 }
   0x4   :  { %11 = vsyncpa [#allocation4 + $0x1], 0 }
   0x5   :  { %12 = vsyncpa [#allocation7], 0 }
   0x6   :  { %14 = vsyncpa [#allocation7 + $0x1], 0 }
   0x7   :  { %15 = vsyncpa [#allocation5], 0 }
   0x8   :  { %17 = vsyncpa [#allocation5 + $0x1], 0  ;;  %s5169_s15 = smov 0   ;;  %s5171_s16 = smov 0  }
   0x9   :  { %s5173_s17 = smov 0   ;;  %s5175_s18 = smov 0  }
   0xa   :  { %s5177_s19 = smov 0   ;;  %s5179_s20 = smov 0  }
   0xb LB: > { %7260 = sst [smem:[#allocation14_spill]] %s5133_s19  ;;  %s5200_s21 = sadd.s32 4294967295, %s5137_s20   ;;  %s5137_s20 = sphi %s5179_s20, %s23_s20   ;;  %s5133_s19 = sphi %s5177_s19, %s7426_s19   ;;  %s5129_s18 = sphi %s5175_s18, %s7425_s18   ;;  %s5125_s17 = sphi %s5173_s17, %s7429_s17   ;;  %s5121_s16 = sphi %s5171_s16, %s7428_s16   ;;  %s5117_s15 = sphi %s5169_s15, %s7427_s15  }
   0xc   : > { %s4167_s22 = sadd.s32 4294967294, %s5137_s20   ;;  %p57_p0 = scmp.ne.s32.totalorder %s5121_s16, %s5117_s15 }
   0xd   : > { %p58_p1 = scmp.eq.s32.totalorder %s5200_s21, 0  ;;  %p157_p2 = scmp.eq.s32.totalorder %s5200_s21, 1 }
   0xe   : > { %p163_p3 = scmp.eq.s32.totalorder %s4167_s22, 1  ;;  %p4168_p5 = scmp.ge.s32.totalorder %s5137_s20, 1 }
   0xf   : > { %p5209_p4 = por %p58_p1, %p57_p0  ;;  %p170_p7 = scmp.lt.s32.totalorder %s5137_s20, 3 }
  0x10   : > { %p5214_p6 = por %p163_p3, %p57_p0  ;;  %s7263_s2 = sld [smem:[#allocation63_spill]] }
  0x11   : > { %p5222_p8 = pnand %p4168_p5, %p170_p7  ;;  %s5139_s29 = smov [#allocation8]  }
  0x12   : > { %s183_s30 = sshll.u32 %s5139_s29, 4  ;;  %p4170_p11 = scmp.ge.s32.totalorder %s5137_s20, 2  ;;  %s184_s30 = int_to_ptr.vmem [resolvable:$true] %s183_s30 }
  0x13   : > { %p4798_p9 = pneg %p5222_p8  ;;  %s7246_s5 = smov 64  }
  0x14   : > { %s7248_s6 = smov 4   ;;  %s35_s7 = sadd.s32 1, %s5133_s19 }
  0x15   : > { %p4799_p10 = pnand %p4798_p9, %p58_p1  ;;  %p37_p12 = scmp.ge.s32.totalorder %s35_s7, 2 }
  0x16   : > { %s181_s27 = sshll.u32 %s7263_s2, 4  ;;  %s44_s8 = sadd.s32 1, %s5125_s17  ;;  %s182_s27 = int_to_ptr.hbm [resolvable:$true] %s181_s27 }
  0x17   : > { %4801 = dma.hbm_to_vmem [thread:$0]  (!%p4799_p10), %s182_s27, 9216, %s184_s30, [#allocation7], %s7246_s5, %s7246_s5, %s7248_s6  }
  0x18   : > { %p51_p13 = scmp.ne.s32.totalorder %s5125_s17, %s5121_s16  ;;  %p52_p0 = scmp.eq.s32.totalorder %s5137_s20, 0 }
  0x19   : > { %s7431_s7 = smov (%p37_p12, %s35_s7), 0  ;;  %p4814_p7 = scmp.lt.s32.totalorder %s5137_s20, 2 }
  0x1a   : > { %7265 = sst [smem:[#allocation15_spill]] %s7431_s7  ;;  %p53_p3 = por %p52_p0, %p51_p13 }
  0x1b   : > { %p5243_p5 = por %p157_p2, %p51_p13  ;;  %s39_s10 = ssub.s32 %s5133_s19, %s7431_s7 }
  0x1c   : > { %p42_p9 = scmp.eq.s32.totalorder %s39_s10, 0  ;;  %s200_s11 = sand.u32 1, %s5125_s17  }
  0x1d   : > { %s4783_s12 = smul.u32 192, %s200_s11  ;;  %p5255_p10 = pnand %p4814_p7, %p53_p3 }
  0x1e   : > { %s5252_s13 = scalar_select %p42_p9, %s5125_s17, %s44_s8  }
  0x1f   : > { %s4784_s14 = smul.u32 288, %s5133_s19  ;;  %s204_s22 = scalar_lea.vmem [#allocation3], %s4783_s12 }
  0x20   : > { %7267 = sst [smem:[#allocation16_spill]] %s5252_s13  ;;  %s224_s25 = sshll.u32 %s204_s22, 4  ;;  %s225_s25 = int_to_ptr.vmem [resolvable:$true] %s224_s25 }
  0x21   : > { %s7269_s0 = sld [smem:[#allocation62_spill]]  ;;  %s234_s10 = sand.u32 1, %s5137_s20  }
  0x22   : > { %s201_s6 = scalar_lea.sflag [#allocation4], %s200_s11  ;;  %s7270_s8 = smov 4  }
  0x23   : > { %s7271_s2 = smov 64   ;;  %s4785_s12 = smul.u32 96, %s200_s11 }
  0x24   : > { %s4088_s19 = scalar_lea.hbm %s7242_s1, %s4784_s14 }
  0x25   : > { %s4089_s13 = scalar_lea.hbm %s4088_s19, 192  ;;  %s238_s29 = scalar_lea.vmem [#allocation6], %s4785_s12 }
  0x26   : > { %s249_s27 = sshll.u32 %s4089_s13, 4  ;;  %263 = sbr.rel (%p5222_p8) target bundleno = 980 (0x3d4), region = 36  ;;  %s250_s27 = int_to_ptr.hbm [resolvable:$true] %s249_s27 }
  0x27   : > { %s219_s30 = scalar_lea.hbm %s7269_s0, %s4784_s14  ;;  %s251_s0 = sshll.u32 %s238_s29, 4  ;;  %s252_s0 = int_to_ptr.vmem [resolvable:$true] %s251_s0 }
  0x28   : > { %s222_s5 = sshll.u32 %s219_s30, 4  ;;  %s235_s30 = scalar_lea.sflag [#allocation7], %s234_s10  ;;  %s223_s5 = int_to_ptr.hbm [resolvable:$true] %s222_s5 }
  0x29   : > { %4805 = dma.hbm_to_vmem [thread:$0]  (!%p5255_p10), %s223_s5, 3072, %s225_s25, %s201_s6, %s7271_s2, %s7271_s2, %s7270_s8  }
  0x2a   : > { %4808 = dma.hbm_to_vmem [thread:$0]  (!%p5255_p10), %s250_s27, 1536, %s252_s0, %s235_s30, %s7271_s2, %s7271_s2, %s7270_s8  }
  0x2b   : > { %s5279_s5 = sand.u32 1, %s5121_s16  }
  0x2c   : > { %s4786_s19 = smul.u32 192, %s5279_s5  ;;  %s266_s6 = scalar_lea.sflag [#allocation4], %s5279_s5 }
  0x2e   : > { %s5283_s7 = scalar_lea.vmem [#allocation3], %s4786_s19 }
  0x2f   : > { %5100 = dma.done.wait (%p5209_p4), %s266_s6, 3072  }
  0x30   : > { %5102 = vsyncadd (%p5209_p4), %s266_s6, 4294964224  ;;  %s275_s0 = sand.u32 1, %s5200_s21   ;;  %s4787_s2 = smul.u32 96, %s5279_s5 }
  0x31   : > { %s276_s28 = scalar_lea.sflag [#allocation7], %s275_s0 }
  0x32   : > { %s5291_s11 = scalar_lea.vmem [#allocation6], %s4787_s2 }
  0x33   : > { %5104 = dma.done.wait (%p5209_p4), %s276_s28, 1536  }
  0x34   : > { %5106 = vsyncadd (%p5209_p4), %s276_s28, 4294965760 }
  0x35   : > { %5108 = dma.done.wait (%p58_p1), [#allocation7], 9216  }
  0x36   : > { %5110 = vsyncadd (%p58_p1), [#allocation7], 4294958080  ;;  %v4598_v0 = vld [vmem:[#allocation8 + $0x38] sm:$0xff]  ;;  %v4597_v1 = vld [vmem:[#allocation8 + $0x30] sm:$0xff]  ;;  %vm523_vm0 = vsmask.f32 7424 }
  0x37   : > { %989 = vmatpush.bf16.msra.mxu0 %v4598_v0  ;;  %4759 = vmatpush.bf16.msra.mxu1 %v4598_v0  ;;  %v4596_v2 = vld [vmem:[#allocation8 + $0x28] sm:$0xff]  ;;  %v4595_v3 = vld [vmem:[#allocation8 + $0x20] sm:$0xff]  ;;  %v4594_v4 = vld [vmem:[#allocation8 + $0x18] sm:$0xff]  ;;  %vm732_vm1 = vcmask 1046528   ;;  %s4175_s25 = sshll.u32 %s5279_s5, 7  ;;  %s4663_s28 = sshll.u32 %s5129_s18, 7 }
  0x38   : > { %4760 = vmatpush.bf16.msra.mxu2 %v4598_v0  ;;  %4761 = vmatpush.bf16.msra.mxu3 %v4598_v0  ;;  %v4593_v5 = vld [vmem:[#allocation8 + $0x10] sm:$0xff]  ;;  %v4592_v6 = vld [vmem:[#allocation8 + $0x8] sm:$0xff]  ;;  %v4591_v7 = vld [vmem:[#allocation8] sm:$0xff]  ;;  %s6087_s26 = scalar_lea.vmem [#allocation9], %s4175_s25  ;;  %s4039_s23 = scalar_lea.hbm %s7245_s4, %s4663_s28 }
  0x39   : > { %v4614_v8 = vld [vmem:[#allocation8 + $0xb8] sm:$0xff]  ;;  %v5302_v10 = vld [vmem:[%s5283_s7] sm:$0xff]  ;;  %v5305_v11 = vld [vmem:[%s5283_s7 + $0x30] sm:$0xff]  ;;  %s4040_s13 = sshll.u32 %s6087_s26, 4  ;;  %s4042_s14 = sshll.u32 %s4039_s23, 4  ;;  %s4041_s13 = int_to_ptr.vmem [resolvable:$true] %s4040_s13  ;;  %s4043_s14 = int_to_ptr.hbm [resolvable:$true] %s4042_s14 }
  0x3a   : > { %v4622_v9 = vld [vmem:[#allocation8 + $0xf8] sm:$0xff]  ;;  %v5308_v12 = vld [vmem:[%s5283_s7 + $0x60] sm:$0xff]  ;;  %v5311_v13 = vld [vmem:[%s5283_s7 + $0x90] sm:$0xff]  ;;  %v527_v0 = vshll.u32 %v5302_v10, 16  ;;  %s4025_s18 = scalar_lea.sflag [#allocation5], %s5279_s5  ;;  %s5061_s25 = sshra.s32 %s4043_s14, 4  ;;  %s5062_s25 = int_to_ptr.hbm [resolvable:$true] %s5061_s25 }
  0x3b   : > { %990 = vmatpush.bf16.msra.mxu0 %v4597_v1  ;;  %4762 = vmatpush.bf16.msra.mxu1 %v4597_v1  ;;  %v4606_v14 = vld [vmem:[#allocation8 + $0x78] sm:$0xff]  ;;  %v4613_v16 = vld [vmem:[#allocation8 + $0xb0] sm:$0xff]  ;;  %v4612_v20 = vld [vmem:[#allocation8 + $0xa8] sm:$0xff]  ;;  %s5063_s10 = scalar_lea.hbm %s5062_s25, 128  ;;  %s5067_s22 = scalar_lea.hbm %s7245_s4, 256 }
  0x3c   : > { %4763 = vmatpush.bf16.msra.mxu2 %v4597_v1  ;;  %4764 = vmatpush.bf16.msra.mxu3 %v4597_v1  ;;  %v4630_v15 = vld [vmem:[#allocation8 + $0x138] sm:$0xff]  ;;  %v4621_v17 = vld [vmem:[#allocation8 + $0xf0] sm:$0xff]  ;;  %v4620_v21 = vld [vmem:[#allocation8 + $0xe8] sm:$0xff]  ;;  %p5064_p1 = scmp.ne.s32.totalorder %s5062_s25, %s5063_s10  ;;  %p5068_p8 = scmp.lt.s32.totalorder %s5062_s25, %s7245_s4 }
  0x3d   : > { %v4605_v18 = vld [vmem:[#allocation8 + $0x70] sm:$0xff]  ;;  %v4604_v22 = vld [vmem:[#allocation8 + $0x68] sm:$0xff]  ;;  %v4611_v24 = vld [vmem:[#allocation8 + $0xa0] sm:$0xff]  ;;  %p5069_p12 = scmp.lt.s32.totalorder %s5067_s22, %s5063_s10 }
  0x3e   : > { %v4629_v19 = vld [vmem:[#allocation8 + $0x130] sm:$0xff]  ;;  %v4628_v23 = vld [vmem:[#allocation8 + $0x128] sm:$0xff]  ;;  %v4619_v25 = vld [vmem:[#allocation8 + $0xe0] sm:$0xff]  ;;  %p5065_p2 = pnand %p5064_p1, %p5243_p5 }
  0x3f   : > { %991 = vmatpush.bf16.msra.mxu0 %v4596_v2  ;;  %4765 = vmatpush.bf16.msra.mxu1 %v4596_v2  ;;  %v4603_v26 = vld [vmem:[#allocation8 + $0x60] sm:$0xff]  ;;  %v4610_v28 = vld [vmem:[#allocation8 + $0x98] sm:$0xff]  ;;  %v5318_v30 = vld [vmem:[%s5283_s7 + $0xc] sm:$0xff]  ;;  %p5070_p13 = por %p5069_p12, %p5068_p8 }
  0x40   : > { %4766 = vmatpush.bf16.msra.mxu2 %v4596_v2  ;;  %4767 = vmatpush.bf16.msra.mxu3 %v4596_v2  ;;  %v4627_v27 = vld [vmem:[#allocation8 + $0x120] sm:$0xff]  ;;  %v4618_v29 = vld [vmem:[#allocation8 + $0xd8] sm:$0xff]  ;;  %v5324_v32 = vld [vmem:[%s5283_s7 + $0x6c] sm:$0xff]  ;;  %p5066_p4 = pneg %p5065_p2 }
  0x41   : > { %v5321_v31 = vld [vmem:[%s5283_s7 + $0x3c] sm:$0xff]  ;;  %v4609_v36 = vld [vmem:[#allocation8 + $0x90] sm:$0xff]  ;;  %v4608_v40 = vld [vmem:[#allocation8 + $0x88] sm:$0xff] }
  0x42   : > { %v5327_v33 = vld [vmem:[%s5283_s7 + $0x9c] sm:$0xff]  ;;  %v4617_v37 = vld [vmem:[#allocation8 + $0xd0] sm:$0xff]  ;;  %v4616_v41 = vld [vmem:[#allocation8 + $0xc8] sm:$0xff]  ;;  %p5071_p0 = pnand %p5070_p13, %p5066_p4 }
  0x43   : > { %992 = vmatpush.bf16.msra.mxu0 %v4595_v3  ;;  %4768 = vmatpush.bf16.msra.mxu1 %v4595_v3  ;;  %v4602_v34 = vld [vmem:[#allocation8 + $0x58] sm:$0xff]  ;;  %v4601_v38 = vld [vmem:[#allocation8 + $0x50] sm:$0xff]  ;;  %v4600_v42 = vld [vmem:[#allocation8 + $0x48] sm:$0xff] }
  0x44   : > { %4769 = vmatpush.bf16.msra.mxu2 %v4595_v3  ;;  %4770 = vmatpush.bf16.msra.mxu3 %v4595_v3  ;;  %v4626_v35 = vld [vmem:[#allocation8 + $0x118] sm:$0xff]  ;;  %v4625_v39 = vld [vmem:[#allocation8 + $0x110] sm:$0xff]  ;;  %v4624_v43 = vld [vmem:[#allocation8 + $0x108] sm:$0xff]  ;;  %v539_v3 = vshll.u32 %v5318_v30, 16 }
  0x45   : > { %v4607_v44 = vld [vmem:[#allocation8 + $0x80] sm:$0xff]  ;;  %v5334_v48 = vld [vmem:[%s5283_s7 + $0x18] sm:$0xff]  ;;  %v5337_v49 = vld [vmem:[%s5283_s7 + $0x48] sm:$0xff] }
  0x46   : > { %v4615_v45 = vld [vmem:[#allocation8 + $0xc0] sm:$0xff]  ;;  %v5340_v50 = vld [vmem:[%s5283_s7 + $0x78] sm:$0xff]  ;;  %v5343_v51 = vld [vmem:[%s5283_s7 + $0xa8] sm:$0xff] }
  0x47   : > { %993 = vmatpush.bf16.msra.mxu0 %v4594_v4  ;;  %4771 = vmatpush.bf16.msra.mxu1 %v4594_v4  ;;  %v4599_v46 = vld [vmem:[#allocation8 + $0x40] sm:$0xff]  ;;  %v4646_v52 = vld [vmem:[#allocation8 + $0x1b8] sm:$0xff]  ;;  %v327_v56 = vld [vmem:[%s5283_s7 + $0x8] sm:$0xf] }
  0x48   : > { %4772 = vmatpush.bf16.msra.mxu2 %v4594_v4  ;;  %4773 = vmatpush.bf16.msra.mxu3 %v4594_v4  ;;  %v4623_v47 = vld [vmem:[#allocation8 + $0x100] sm:$0xff]  ;;  %v4654_v53 = vld [vmem:[#allocation8 + $0x1f8] sm:$0xff]  ;;  %v330_v57 = vld [vmem:[%s5283_s7 + $0x14] sm:$0xf]  ;;  %v491_v62 = vunpack.c.l.b16 %v327_v56  ;;  %v525_v4 = vshrl.u32 %v5302_v10, 16 }
  0x49   : > { %v4638_v54 = vld [vmem:[#allocation8 + $0x178] sm:$0xff]  ;;  %v5352_v58 = vld [vmem:[%s5283_s7 + $0x24] sm:$0xff]  ;;  %v492_v63 = vunpack.c.l.b16 %v330_v57 }
  0x4a   : > { %v4662_v55 = vld [vmem:[#allocation8 + $0x238] sm:$0xff]  ;;  %v5358_v60 = vld [vmem:[%s5283_s7 + $0x84] sm:$0xff]  ;;  %v507_v1 = vpack.c.b16 %v491_v62, %v491_v62 }
  0x4b   : > { %994 = vmatpush.bf16.msra.mxu0 %v4593_v5  ;;  %4774 = vmatpush.bf16.msra.mxu1 %v4593_v5  ;;  %v5355_v59 = vld [vmem:[%s5283_s7 + $0x54] sm:$0xff]  ;;  %v508_v2 = vpack.c.b16 %v492_v63, %v492_v63 }
  0x4c   : > { %4775 = vmatpush.bf16.msra.mxu2 %v4593_v5  ;;  %4776 = vmatpush.bf16.msra.mxu3 %v4593_v5  ;;  %v5361_v61 = vld [vmem:[%s5283_s7 + $0xb4] sm:$0xff]  ;;  %v529_v5 = vrot.slane %v527_v0, 1 }
  0x4d   : > { %v339_v57 = vld [vmem:[%s5283_s7 + $0x38] sm:$0xf] }
  0x4e   : > { %v495_v63 = vunpack.c.l.b16 %v339_v57  ;;  %v748_v57 = vrot.slane %v5321_v31, 1 }
  0x4f   : > { %995 = vmatpush.bf16.msra.mxu0 %v4592_v6  ;;  %4777 = vmatpush.bf16.msra.mxu1 %v4592_v6 }
  0x50   : > { %4778 = vmatpush.bf16.msra.mxu2 %v4592_v6  ;;  %4779 = vmatpush.bf16.msra.mxu3 %v4592_v6  ;;  %v532_v6 = vshll.u32 %v507_v1, 16 }
  0x53   : > { %996 = vmatpush.bf16.msra.mxu0 %v4591_v7  ;;  %4780 = vmatpush.bf16.msra.mxu1 %v4591_v7 }
  0x54   : > { %4781 = vmatpush.bf16.msra.mxu2 %v4591_v7  ;;  %4782 = vmatpush.bf16.msra.mxu3 %v4591_v7  ;;  %v537_v7 = vshrl.u32 %v5318_v30, 16 }
  0x56   : > { %997 = vmatmul.bf16.vlgmr.msra.gmra.mxu0 %v5302_v10  ;;  %1017 = vmatmul.bf16.vlgmr.msra.gmra.mxu1 %v5305_v11 }
  0x57   : > { %1037 = vmatmul.bf16.vlgmr.msra.gmra.mxu2 %v5308_v12  ;;  %1057 = vmatmul.bf16.vlgmr.msra.gmra.mxu3 %v5311_v13 }
  0x58   : > { %1167 = vmatpush.bf16.msrb.mxu2 %v4614_v8  ;;  %1507 = vmatpush.bf16.msrb.mxu3 %v4622_v9  ;;  %v541_v8 = vrot.slane %v539_v3, 1  ;;  %v544_v9 = vshll.u32 %v508_v2, 16  ;;  %v4652_v3 = vld [vmem:[#allocation8 + $0x1e8] sm:$0xff] }
  0x59   : > { %1078 = vmatpush.bf16.msrb.mxu1 %v4606_v14  ;;  %1596 = vmatpush.bf16.msrb.mxu0 %v4630_v15  ;;  %v530_v14 = vor.u32 %v529_v5, %v525_v4  ;;  %v534_v15 = vrot.slane %v532_v6, 1  ;;  %v573_v4 = vshrl.u32 %v5305_v11, 16 }
  0x5c   : > { %1168 = vmatpush.bf16.msrb.mxu2 %v4613_v16  ;;  %1508 = vmatpush.bf16.msrb.mxu3 %v4621_v17  ;;  %v542_v16 = vor.u32 %v541_v8, %v537_v7  ;;  %v546_v17 = vrot.slane %v544_v9, 1  ;;  %v4636_v7 = vld [vmem:[#allocation8 + $0x168] sm:$0xff] }
  0x5d   : > { %1079 = vmatpush.bf16.msrb.mxu1 %v4605_v18  ;;  %1597 = vmatpush.bf16.msrb.mxu0 %v4629_v19  ;;  %v733_v18 = vrot.slane %v5302_v10, 1  ;;  %v734_v19 = vrot.slane %v507_v1, 1  ;;  %v4645_v10 = vld [vmem:[#allocation8 + $0x1b0] sm:$0xff]  ;;  %v511_v1 = vpack.c.b16 %v495_v63, %v495_v63  ;;  %v4660_v8 = vld [vmem:[#allocation8 + $0x228] sm:$0xff] }
  0x5f   : > { %v580_v6 = vshll.u32 %v511_v1, 16 }
  0x60   : > { %1169 = vmatpush.bf16.msrb.mxu2 %v4612_v20  ;;  %1509 = vmatpush.bf16.msrb.mxu3 %v4620_v21  ;;  %v333_v20 = vld [vmem:[%s5283_s7 + $0x20] sm:$0xf]  ;;  %v535_v21 = vsel %vm523_vm0, %v530_v14, %v534_v15  ;;  %v742_v15 = vrot.slane %v5352_v58, 1 }
  0x61   : > { %1080 = vmatpush.bf16.msrb.mxu1 %v4604_v22  ;;  %1598 = vmatpush.bf16.msrb.mxu0 %v4628_v23  ;;  %v547_v22 = vsel %vm523_vm0, %v542_v16, %v546_v17  ;;  %v493_v23 = vunpack.c.l.b16 %v333_v20  ;;  %v582_v14 = vrot.slane %v580_v6, 1  ;;  %v342_v17 = vld [vmem:[%s5283_s7 + $0x44] sm:$0xf] }
  0x64   : > { %1170 = vmatpush.bf16.msrb.mxu2 %v4611_v24  ;;  %1510 = vmatpush.bf16.msrb.mxu3 %v4619_v25  ;;  %v735_v24 = vsel %vm732_vm1, %v733_v18, %v734_v19  ;;  %v509_v25 = vpack.c.b16 %v493_v23, %v493_v23  ;;  %v496_v19 = vunpack.c.l.b16 %v342_v17  ;;  %v609_v17 = vshrl.u32 %v5355_v59, 16 }
  0x65   : > { %1081 = vmatpush.bf16.msrb.mxu1 %v4603_v26  ;;  %1599 = vmatpush.bf16.msrb.mxu0 %v4627_v27  ;;  %v551_v26 = vshll.u32 %v5334_v48, 16  ;;  %v4653_v27 = vld [vmem:[#allocation8 + $0x1f0] sm:$0xff] }
  0x66   : > { %1002 = vmatmul.bf16.gmra.mxu0 %v5318_v30  ;;  %1022 = vmatmul.bf16.gmra.mxu1 %v5321_v31  ;;  %v740_v56 = vrot.slane %v509_v25, 1 }
  0x67   : > { %1042 = vmatmul.bf16.gmra.mxu2 %v5324_v32  ;;  %1062 = vmatmul.bf16.gmra.mxu3 %v5327_v33 }
  0x68   : > { %1171 = vmatpush.bf16.msrb.mxu2 %v4610_v28  ;;  %1511 = vmatpush.bf16.msrb.mxu3 %v4618_v29  ;;  %v4637_v28 = vld [vmem:[#allocation8 + $0x170] sm:$0xff] }
  0x69   : > { %1082 = vmatpush.bf16.msrb.mxu1 %v4602_v34  ;;  %1600 = vmatpush.bf16.msrb.mxu0 %v4626_v35  ;;  %v4661_v29 = vld [vmem:[#allocation8 + $0x230] sm:$0xff]  ;;  %v549_v34 = vshrl.u32 %v5334_v48, 16  ;;  %v553_v35 = vrot.slane %v551_v26, 1 }
  0x6c   : > { %1172 = vmatpush.bf16.msrb.mxu2 %v4609_v36  ;;  %1512 = vmatpush.bf16.msrb.mxu3 %v4617_v37  ;;  %v556_v36 = vshll.u32 %v509_v25, 16  ;;  %v554_v37 = vor.u32 %v553_v35, %v549_v34 }
  0x6d   : > { %1083 = vmatpush.bf16.msrb.mxu1 %v4601_v38  ;;  %1601 = vmatpush.bf16.msrb.mxu0 %v4625_v39  ;;  %v736_v39 = vrot.slane %v5318_v30, 1 }
  0x6e   : > { %v558_v38 = vrot.slane %v556_v36, 1 }
  0x70   : > { %1173 = vmatpush.bf16.msrb.mxu2 %v4608_v40  ;;  %1513 = vmatpush.bf16.msrb.mxu3 %v4616_v41  ;;  %v737_v40 = vrot.slane %v508_v2, 1  ;;  %v336_v41 = vld [vmem:[%s5283_s7 + $0x2c] sm:$0xf] }
  0x71   : > { %1084 = vmatpush.bf16.msrb.mxu1 %v4600_v42  ;;  %1602 = vmatpush.bf16.msrb.mxu0 %v4624_v43  ;;  %v5382_v42 = vsel %vm523_vm0, %v554_v37, %v558_v38  ;;  %v494_v43 = vunpack.c.l.b16 %v336_v41  ;;  %v4644_v2 = vld [vmem:[#allocation8 + $0x1a8] sm:$0xff]  ;;  %v599_v38 = vshll.u32 %v5337_v49, 16 }
  0x74   : > { %1174 = vmatpush.bf16.msrb.mxu2 %v4607_v44  ;;  %1514 = vmatpush.bf16.msrb.mxu3 %v4615_v45  ;;  %v5385_v44 = vsel %vm732_vm1, %v736_v39, %v737_v40  ;;  %v510_v45 = vpack.c.b16 %v494_v43, %v494_v43  ;;  %v4643_v39 = vld [vmem:[#allocation8 + $0x1a0] sm:$0xff] }
  0x75   : > { %1085 = vmatpush.bf16.msrb.mxu1 %v4599_v46  ;;  %1603 = vmatpush.bf16.msrb.mxu0 %v4623_v47  ;;  %v561_v46 = vshrl.u32 %v5352_v58, 16  ;;  %v4651_v40 = vld [vmem:[#allocation8 + $0x1e0] sm:$0xff] }
  0x76   : > { %1007 = vmatmul.bf16.gmra.mxu0 %v5334_v48  ;;  %1027 = vmatmul.bf16.gmra.mxu1 %v5337_v49  ;;  %v743_v16 = vrot.slane %v510_v45, 1 }
  0x77   : > { %1047 = vmatmul.bf16.gmra.mxu2 %v5340_v50  ;;  %1067 = vmatmul.bf16.gmra.mxu3 %v5343_v51 }
  0x78   : > { %2089 = vmatpush.bf16.msra.mxu2 %v4646_v52  ;;  %2178 = vmatpush.bf16.msra.mxu3 %v4654_v53  ;;  %v568_v52 = vshll.u32 %v510_v45, 16  ;;  %v5412_v20 = vsel %vm732_vm1, %v742_v15, %v743_v16 }
  0x79   : > { %1685 = vmatpush.bf16.msra.mxu1 %v4638_v54  ;;  %2267 = vmatpush.bf16.msra.mxu0 %v4662_v55  ;;  %v739_v55 = vrot.slane %v5334_v48, 1 }
  0x7a   : > { %v570_v54 = vrot.slane %v568_v52, 1 }
  0x7b   : > { %v5398_v0 = vsel %vm732_vm1, %v739_v55, %v740_v56 }
  0x7c   : > { %2090 = vmatpush.bf16.msra.mxu2 %v4645_v10  ;;  %2179 = vmatpush.bf16.msra.mxu3 %v4653_v27  ;;  %v745_v10 = vrot.slane %v5305_v11, 1  ;;  %v746_v27 = vrot.slane %v511_v1, 1  ;;  %v348_v1 = vld [vmem:[%s5283_s7 + $0x5c] sm:$0xf] }
  0x7d   : > { %1686 = vmatpush.bf16.msra.mxu1 %v4637_v28  ;;  %2268 = vmatpush.bf16.msra.mxu0 %v4661_v29  ;;  %v345_v28 = vld [vmem:[%s5283_s7 + $0x50] sm:$0xf]  ;;  %v498_v6 = vunpack.c.l.b16 %v348_v1  ;;  %v4658_v1 = vld [vmem:[#allocation8 + $0x218] sm:$0xff] }
  0x7e   : > { %v497_v36 = vunpack.c.l.b16 %v345_v28  ;;  %v5430_v37 = vsel %vm732_vm1, %v745_v10, %v746_v27 }
  0x80   : > { %2091 = vmatpush.bf16.msra.mxu2 %v4644_v2  ;;  %2180 = vmatpush.bf16.msra.mxu3 %v4652_v3 }
  0x81   : > { %1687 = vmatpush.bf16.msra.mxu1 %v4636_v7  ;;  %2269 = vmatpush.bf16.msra.mxu0 %v4660_v8  ;;  %v611_v8 = vshll.u32 %v5355_v59, 16 }
  0x84   : > { %2092 = vmatpush.bf16.msra.mxu2 %v4643_v39  ;;  %2181 = vmatpush.bf16.msra.mxu3 %v4651_v40  ;;  %v4642_v40 = vld [vmem:[#allocation8 + $0x198] sm:$0xff] }
  0x86   : > { %1012 = vmatmul.bf16.gmra.mxu0 %v5352_v58  ;;  %1032 = vmatmul.bf16.gmra.mxu1 %v5355_v59 }
  0x87   : > { %1052 = vmatmul.bf16.gmra.mxu2 %v5358_v60  ;;  %1072 = vmatmul.bf16.gmra.mxu3 %v5361_v61 }
  0x88   : > { %2093 = vmatpush.bf16.msra.mxu2 %v4642_v40 }
  0x96   : > { %1086 = vmatmul.bf16.vlgmr.msrb.gmra.mxu1 %v535_v21  ;;  %1604 = vmatmul.bf16.vlgmr.msrb.gmra.mxu0 %v547_v22  ;;  %v512_v21 = vpack.c.b16 %v496_v19, %v496_v19  ;;  %v613_v19 = vrot.slane %v611_v8, 1 }
  0x97   : > { %1175 = vmatmul.bf16.vlgmr.msrb.gmra.mxu2 %v735_v24  ;;  %1515 = vmatmul.bf16.vlgmr.msrb.gmra.mxu3 %v5318_v30  ;;  %v563_v30 = vshll.u32 %v5352_v58, 16 }
  0x98   : > { %v592_v24 = vshll.u32 %v512_v21, 16  ;;  %v749_v63 = vrot.slane %v512_v21, 1 }
  0x99   : > { %v565_v47 = vrot.slane %v563_v30, 1 }
  0x9a   : > { %v594_v26 = vrot.slane %v592_v24, 1  ;;  %v5460_v7 = vsel %vm732_vm1, %v748_v57, %v749_v63  ;;  %v4634_v63 = vld [vmem:[#allocation8 + $0x158] sm:$0xff] }
  0x9b   : > { %v566_v53 = vor.u32 %v565_v47, %v561_v46  ;;  %v597_v46 = vshrl.u32 %v5337_v49, 16  ;;  %v601_v47 = vrot.slane %v599_v38, 1 }
  0x9d   : > { %v5395_v62 = vsel %vm523_vm0, %v566_v53, %v570_v54  ;;  %v4635_v53 = vld [vmem:[#allocation8 + $0x160] sm:$0xff]  ;;  %v602_v55 = vor.u32 %v601_v47, %v597_v46  ;;  %v4650_v46 = vld [vmem:[#allocation8 + $0x1d8] sm:$0xff] }
  0x9e   : > { %v4659_v54 = vld [vmem:[#allocation8 + $0x220] sm:$0xff]  ;;  %1688 = vmatpush.bf16.msra.mxu1 %v4635_v53  ;;  %2182 = vmatpush.bf16.msra.mxu3 %v4650_v46 }
  0x9f   : > { %2270 = vmatpush.bf16.msra.mxu0 %v4659_v54 }
  0xa2   : > { %1689 = vmatpush.bf16.msra.mxu1 %v4634_v63 }
  0xa3   : > { %2271 = vmatpush.bf16.msra.mxu0 %v4658_v1 }
  0xa6   : > { %1091 = vmatmul.bf16.gmra.mxu1 %v547_v22  ;;  %1609 = vmatmul.bf16.gmra.mxu0 %v5382_v42  ;;  %v585_v22 = vshrl.u32 %v5321_v31, 16 }
  0xa7   : > { %1180 = vmatmul.bf16.gmra.mxu2 %v5385_v44  ;;  %1520 = vmatmul.bf16.gmra.mxu3 %v5334_v48  ;;  %v575_v48 = vshll.u32 %v5305_v11, 16 }
  0xa9   : > { %v577_v5 = vrot.slane %v575_v48, 1 }
  0xab   : > { %v578_v9 = vor.u32 %v577_v5, %v573_v4 }
  0xad   : > { %v5409_v18 = vsel %vm523_vm0, %v578_v9, %v582_v14 }
  0xb6   : > { %1096 = vmatmul.bf16.gmra.mxu1 %v5382_v42  ;;  %1614 = vmatmul.bf16.gmra.mxu0 %v5395_v62 }
  0xb7   : > { %1185 = vmatmul.bf16.gmra.mxu2 %v5398_v0  ;;  %1525 = vmatmul.bf16.gmra.mxu3 %v5352_v58  ;;  %v587_v58 = vshll.u32 %v5321_v31, 16 }
  0xb9   : > { %v589_v23 = vrot.slane %v587_v58, 1  ;;  %v614_v58 = vor.u32 %v613_v19, %v609_v17  ;;  %v754_v17 = vrot.slane %v5355_v59, 1 }
  0xbb   : > { %v590_v25 = vor.u32 %v589_v23, %v585_v22  ;;  %v751_v23 = vrot.slane %v5337_v49, 1 }
  0xbd   : > { %v5427_v35 = vsel %vm523_vm0, %v590_v25, %v594_v26  ;;  %v351_v25 = vld [vmem:[%s5283_s7 + $0x68] sm:$0xf] }
  0xbe   : > { %v499_v38 = vunpack.c.l.b16 %v351_v25 }
  0xc6   : > { %1101 = vmatmul.bf16.gmra.mxu1 %v5395_v62  ;;  %1619 = vmatmul.bf16.gmra.mxu0 %v5409_v18 }
  0xc7   : > { %1190 = vmatmul.bf16.gmra.mxu2 %v5412_v20  ;;  %1530 = vmatmul.bf16.gmra.mxu3 %v5305_v11  ;;  %v513_v11 = vpack.c.b16 %v497_v36, %v497_v36 }
  0xc9   : > { %v604_v52 = vshll.u32 %v513_v11, 16  ;;  %v752_v24 = vrot.slane %v513_v11, 1  ;;  %v623_v11 = vshll.u32 %v5308_v12, 16 }
  0xcb   : > { %v606_v56 = vrot.slane %v604_v52, 1  ;;  %v5490_v39 = vsel %vm732_vm1, %v751_v23, %v752_v24 }
  0xcd   : > { %v5457_v5 = vsel %vm523_vm0, %v602_v55, %v606_v56  ;;  %v621_v55 = vshrl.u32 %v5308_v12, 16  ;;  %v625_v56 = vrot.slane %v623_v11, 1 }
  0xd3   : > { %v5422_v29 = vpop.f32.mrf.mxu0  ;;  %v5424_v34 = vpop.f32.mrf.mxu1 }
  0xd6   : > { %1106 = vmatmul.bf16.gmra.mxu1 %v5409_v18  ;;  %1624 = vmatmul.bf16.gmra.mxu0 %v5427_v35 }
  0xd7   : > { %1195 = vmatmul.bf16.gmra.mxu2 %v5430_v37  ;;  %1535 = vmatmul.bf16.gmra.mxu3 %v5321_v31  ;;  %v514_v31 = vpack.c.b16 %v498_v6, %v498_v6  ;;  %v626_v6 = vor.u32 %v625_v56, %v621_v55 }
  0xd9   : > { %v616_v21 = vshll.u32 %v514_v31, 16  ;;  %v755_v19 = vrot.slane %v514_v31, 1  ;;  %v635_v31 = vshll.u32 %v5324_v32, 16 }
  0xda   : > { %v5437_v41 = vpop.f32.mrf.mxu2  ;;  %v5439_v43 = vpop.f32.mrf.mxu3 }
  0xdb   : > { %v5441_v45 = vpop.f32.mrf.mxu0  ;;  %v5443_v30 = vpop.f32.mrf.mxu1  ;;  %v618_v22 = vrot.slane %v616_v21, 1  ;;  %v354_v21 = vld [vmem:[%s5283_s7 + $0x74] sm:$0xf]  ;;  %v5520_v11 = vsel %vm732_vm1, %v754_v17, %v755_v19  ;;  %v637_v63 = vrot.slane %v635_v31, 1  ;;  %v757_v17 = vrot.slane %v5308_v12, 1 }
  0xdc   : > { %7279 = vst [vmem:[#allocation24_spill] sm:$0xff] %v5520_v11 }
  0xdd   : > { %v5487_v36 = vsel %vm523_vm0, %v614_v58, %v618_v22 }
  0xde   : > { %7275 = vst [vmem:[#allocation20_spill] sm:$0xff] %v5487_v36 }
  0xe2   : > { %v5448_v48 = vpop.f32.mrf.mxu2  ;;  %v5450_v2 = vpop.f32.mrf.mxu3 }
  0xe3   : > { %7272 = vst [vmem:[#allocation17_spill] sm:$0xff] %v5450_v2  ;;  %v5452_v3 = vpop.f32.mrf.mxu0  ;;  %v5454_v4 = vpop.f32.mrf.mxu1 }
  0xe6   : > { %1111 = vmatmul.bf16.gmra.mxu1 %v5427_v35  ;;  %1629 = vmatmul.bf16.gmra.mxu0 %v5457_v5 }
  0xe7   : > { %1200 = vmatmul.bf16.gmra.mxu2 %v5460_v7  ;;  %1540 = vmatmul.bf16.gmra.mxu3 %v5337_v49  ;;  %v515_v49 = vpack.c.b16 %v499_v38, %v499_v38  ;;  %v500_v38 = vunpack.c.l.b16 %v354_v21  ;;  %v357_v21 = vld [vmem:[%s5283_s7 + $0x80] sm:$0xf] }
  0xe9   : > { %v628_v57 = vshll.u32 %v515_v49, 16  ;;  %v758_v19 = vrot.slane %v515_v49, 1  ;;  %v647_v49 = vshll.u32 %v5340_v50, 16 }
  0xea   : > { %v5467_v9 = vpop.f32.mrf.mxu2  ;;  %v5469_v14 = vpop.f32.mrf.mxu3 }
  0xeb   : > { %7273 = vst [vmem:[#allocation18_spill] sm:$0xff] %v5469_v14  ;;  %v5471_v15 = vpop.f32.mrf.mxu0  ;;  %v5473_v16 = vpop.f32.mrf.mxu1  ;;  %v630_v8 = vrot.slane %v628_v57, 1  ;;  %v633_v57 = vshrl.u32 %v5324_v32, 16  ;;  %v501_v14 = vunpack.c.l.b16 %v357_v21  ;;  %v5547_v31 = vsel %vm732_vm1, %v757_v17, %v758_v19 }
  0xec   : > { %7282 = vst [vmem:[#allocation27_spill] sm:$0xff] %v5547_v31  ;;  %v649_v21 = vrot.slane %v647_v49, 1 }
  0xed   : > { %v5517_v25 = vsel %vm523_vm0, %v626_v6, %v630_v8  ;;  %v638_v6 = vor.u32 %v637_v63, %v633_v57  ;;  %v4641_v57 = vld [vmem:[#allocation8 + $0x190] sm:$0xff] }
  0xee   : > { %7278 = vst [vmem:[#allocation23_spill] sm:$0xff] %v5517_v25  ;;  %v4649_v63 = vld [vmem:[#allocation8 + $0x1d0] sm:$0xff]  ;;  %2094 = vmatpush.bf16.msra.mxu2 %v4641_v57 }
  0xef   : > { %2183 = vmatpush.bf16.msra.mxu3 %v4649_v63 }
  0xf2   : > { %v5478_v26 = vpop.f32.mrf.mxu2  ;;  %v5480_v10 = vpop.f32.mrf.mxu3 }
  0xf3   : > { %7274 = vst [vmem:[#allocation19_spill] sm:$0xff] %v5480_v10  ;;  %v5482_v27 = vpop.f32.mrf.mxu0  ;;  %v5484_v28 = vpop.f32.mrf.mxu1 }
  0xf6   : > { %1116 = vmatmul.bf16.gmra.mxu1 %v5457_v5  ;;  %1634 = vmatmul.bf16.gmra.mxu0 %v5487_v36 }
  0xf7   : > { %1205 = vmatmul.bf16.gmra.mxu2 %v5490_v39  ;;  %1545 = vmatmul.bf16.gmra.mxu3 %v5355_v59  ;;  %v516_v59 = vpack.c.b16 %v500_v38, %v500_v38 }
  0xf9   : > { %v640_v1 = vshll.u32 %v516_v59, 16  ;;  %v761_v2 = vrot.slane %v516_v59, 1 }
  0xfa   : > { %v5497_v47 = vpop.f32.mrf.mxu2  ;;  %v5499_v52 = vpop.f32.mrf.mxu3 }
  0xfb   : > { %7276 = vst [vmem:[#allocation21_spill] sm:$0xff] %v5499_v52  ;;  %v5501_v53 = vpop.f32.mrf.mxu0  ;;  %v5503_v54 = vpop.f32.mrf.mxu1  ;;  %v642_v8 = vrot.slane %v640_v1, 1  ;;  %v645_v1 = vshrl.u32 %v5340_v50, 16 }
  0xfd   : > { %v5543_v10 = vsel %vm523_vm0, %v638_v6, %v642_v8  ;;  %v650_v57 = vor.u32 %v649_v21, %v645_v1 }
 0x102   : > { %v5508_v58 = vpop.f32.mrf.mxu2  ;;  %v5510_v22 = vpop.f32.mrf.mxu3 }
 0x103   : > { %7277 = vst [vmem:[#allocation22_spill] sm:$0xff] %v5510_v22  ;;  %v5512_v23 = vpop.f32.mrf.mxu0  ;;  %v5514_v24 = vpop.f32.mrf.mxu1 }
 0x106   : > { %1121 = vmatmul.bf16.gmra.mxu1 %v5487_v36  ;;  %1639 = vmatmul.bf16.gmra.mxu0 %v5517_v25 }
 0x107   : > { %1210 = vmatmul.bf16.gmra.mxu2 %v5520_v11  ;;  %1550 = vmatmul.bf16.gmra.mxu3 %v5308_v12  ;;  %v5553_v12 = vpack.c.b16 %v501_v14, %v501_v14  ;;  %v760_v11 = vrot.slane %v5324_v32, 1 }
 0x109   : > { %v652_v14 = vshll.u32 %v5553_v12, 16 }
 0x10a   : > { %v5527_v40 = vpop.f32.mrf.mxu2  ;;  %v5529_v46 = vpop.f32.mrf.mxu3 }
 0x10b   : > { %7280 = vst [vmem:[#allocation25_spill] sm:$0xff] %v5529_v46  ;;  %v5531_v55 = vpop.f32.mrf.mxu0  ;;  %v5533_v56 = vpop.f32.mrf.mxu1  ;;  %v654_v63 = vrot.slane %v652_v14, 1 }
 0x112   : > { %v5538_v38 = vpop.f32.mrf.mxu2  ;;  %v5540_v22 = vpop.f32.mrf.mxu3 }
 0x113   : > { %7281 = vst [vmem:[#allocation26_spill] sm:$0xff] %v5540_v22  ;;  %v1087_v52 = vpop.f32.mrf.mxu1  ;;  %v1605_v46 = vpop.f32.mrf.mxu0 }
 0x114   : > { %v1088_v36 = vadd.f32 %v1087_v52, %v5422_v29 }
 0x116   : > { %1126 = vmatmul.bf16.gmra.mxu1 %v5517_v25  ;;  %1644 = vmatmul.bf16.gmra.mxu0 %v5543_v10  ;;  %v4633_v25 = vld [vmem:[#allocation8 + $0x150] sm:$0xff] }
 0x117   : > { %1215 = vmatmul.bf16.gmra.mxu2 %v5547_v31  ;;  %1555 = vmatmul.bf16.gmra.mxu3 %v5324_v32  ;;  %v4657_v31 = vld [vmem:[#allocation8 + $0x210] sm:$0xff] }
 0x118   : > { %1690 = vmatpush.bf16.msra.mxu1 %v4633_v25  ;;  %2272 = vmatpush.bf16.msra.mxu0 %v4657_v31  ;;  %v5574_v31 = vsel %vm732_vm1, %v760_v11, %v761_v2 }
 0x11a   : > { %v1176_v29 = vpop.f32.mrf.mxu2  ;;  %v1516_v52 = vpop.f32.mrf.mxu3 }
 0x11b   : > { %v5557_v6 = vadd.f32 %v1176_v29, %v1088_v36  ;;  %v5559_v8 = vadd.f32 %v1605_v46, %v1516_v52  ;;  %v1089_v17 = vpop.f32.mrf.mxu1  ;;  %v1607_v19 = vpop.f32.mrf.mxu0  ;;  %v360_v36 = vld [vmem:[%s5283_s7 + $0x8c] sm:$0xf] }
 0x11c   : > { %v1090_v22 = vadd.f32 %v1089_v17, %v5441_v45  ;;  %v5570_v45 = vsel %vm523_vm0, %v650_v57, %v654_v63  ;;  %v502_v17 = vunpack.c.l.b16 %v360_v36 }
 0x11d   : > { %7283 = vst [vmem:[#allocation28_spill] sm:$0xff] %v5557_v6 }
 0x11e   : > { %7284 = vst [vmem:[#allocation29_spill] sm:$0xff] %v5559_v8  ;;  %v5580_v32 = vpack.c.b16 %v502_v17, %v502_v17  ;;  %v363_v17 = vld [vmem:[%s5283_s7 + $0x98] sm:$0xf] }
 0x120   : > { %v664_v57 = vshll.u32 %v5580_v32, 16 }
 0x122   : > { %v1178_v29 = vpop.f32.mrf.mxu2  ;;  %v1518_v46 = vpop.f32.mrf.mxu3 }
 0x123   : > { %v5565_v52 = vadd.f32 %v1178_v29, %v1090_v22  ;;  %v5567_v6 = vadd.f32 %v1607_v19, %v1518_v46  ;;  %v1092_v49 = vpop.f32.mrf.mxu1  ;;  %v1610_v8 = vpop.f32.mrf.mxu0  ;;  %v659_v22 = vshll.u32 %v5358_v60, 16  ;;  %v666_v29 = vrot.slane %v664_v57, 1 }
 0x124   : > { %v1093_v25 = vadd.f32 %v1092_v49, %v5452_v3  ;;  %v657_v3 = vshrl.u32 %v5358_v60, 16  ;;  %v763_v46 = vrot.slane %v5340_v50, 1  ;;  %v764_v49 = vrot.slane %v5553_v12, 1 }
 0x125   : > { %7285 = vst [vmem:[#allocation30_spill] sm:$0xff] %v5565_v52  ;;  %v661_v14 = vrot.slane %v659_v22, 1  ;;  %v671_v12 = vshll.u32 %v5311_v13, 16 }
 0x126   : > { %7286 = vst [vmem:[#allocation31_spill] sm:$0xff] %v5567_v6  ;;  %1131 = vmatmul.bf16.gmra.mxu1 %v5543_v10  ;;  %1649 = vmatmul.bf16.gmra.mxu0 %v5570_v45 }
 0x127   : > { %1220 = vmatmul.bf16.gmra.mxu2 %v5574_v31  ;;  %1560 = vmatmul.bf16.gmra.mxu3 %v5340_v50  ;;  %v662_v36 = vor.u32 %v661_v14, %v657_v3  ;;  %v5602_v3 = vsel %vm732_vm1, %v763_v46, %v764_v49  ;;  %v4632_v49 = vld [vmem:[#allocation8 + $0x148] sm:$0xff] }
 0x128   : > { %1691 = vmatpush.bf16.msra.mxu1 %v4632_v49 }
 0x129   : > { %v5598_v22 = vsel %vm523_vm0, %v662_v36, %v666_v29  ;;  %v673_v29 = vrot.slane %v671_v12, 1 }
 0x12a   : > { %v1181_v59 = vpop.f32.mrf.mxu2  ;;  %v1521_v1 = vpop.f32.mrf.mxu3 }
 0x12b   : > { %v5584_v19 = vadd.f32 %v1181_v59, %v1093_v25  ;;  %v5586_v2 = vadd.f32 %v1610_v8, %v1521_v1  ;;  %v1094_v11 = vpop.f32.mrf.mxu1  ;;  %v1612_v21 = vpop.f32.mrf.mxu0 }
 0x12c   : > { %v1095_v63 = vadd.f32 %v1094_v11, %v5471_v15 }
 0x12d   : > { %7287 = vst [vmem:[#allocation32_spill] sm:$0xff] %v5584_v19  ;;  %v503_v19 = vunpack.c.l.b16 %v363_v17  ;;  %v4656_v17 = vld [vmem:[#allocation8 + $0x208] sm:$0xff] }
 0x12e   : > { %2273 = vmatpush.bf16.msra.mxu0 %v4656_v17 }
 0x12f   : > { %v5608_v50 = vpack.c.b16 %v503_v19, %v503_v19 }
 0x131   : > { %v676_v19 = vshll.u32 %v5608_v50, 16 }
 0x132   : > { %v1183_v52 = vpop.f32.mrf.mxu2  ;;  %v1523_v6 = vpop.f32.mrf.mxu3 }
 0x133   : > { %v5593_v25 = vadd.f32 %v1183_v52, %v1095_v63  ;;  %v5595_v8 = vadd.f32 %v1612_v21, %v1523_v6  ;;  %v1097_v59 = vpop.f32.mrf.mxu1  ;;  %v1615_v1 = vpop.f32.mrf.mxu0  ;;  %v4640_v6 = vld [vmem:[#allocation8 + $0x188] sm:$0xff]  ;;  %v669_v21 = vshrl.u32 %v5311_v13, 16 }
 0x134   : > { %v1098_v15 = vadd.f32 %v1097_v59, %v5482_v27  ;;  %v4648_v52 = vld [vmem:[#allocation8 + $0x1c8] sm:$0xff]  ;;  %2095 = vmatpush.bf16.msra.mxu2 %v4640_v6  ;;  %v678_v6 = vrot.slane %v676_v19, 1 }
 0x135   : > { %7288 = vst [vmem:[#allocation33_spill] sm:$0xff] %v5593_v25  ;;  %2184 = vmatpush.bf16.msra.mxu3 %v4648_v52  ;;  %v674_v59 = vor.u32 %v673_v29, %v669_v21  ;;  %v766_v52 = vrot.slane %v5358_v60, 1 }
 0x136   : > { %1136 = vmatmul.bf16.gmra.mxu1 %v5570_v45  ;;  %1654 = vmatmul.bf16.gmra.mxu0 %v5598_v22 }
 0x137   : > { %1225 = vmatmul.bf16.gmra.mxu2 %v5602_v3  ;;  %1565 = vmatmul.bf16.gmra.mxu3 %v5358_v60 }
 0x13a   : > { %v1186_v27 = vpop.f32.mrf.mxu2  ;;  %v1526_v11 = vpop.f32.mrf.mxu3 }
 0x13b   : > { %v5612_v14 = vadd.f32 %v1186_v27, %v1098_v15  ;;  %v5614_v57 = vadd.f32 %v1615_v1, %v1526_v11  ;;  %v1099_v63 = vpop.f32.mrf.mxu1  ;;  %v1617_v36 = vpop.f32.mrf.mxu0  ;;  %v767_v15 = vrot.slane %v5580_v32, 1  ;;  %v366_v27 = vld [vmem:[%s5283_s7 + $0xa4] sm:$0xf]  ;;  %v683_v32 = vshll.u32 %v5327_v33, 16 }
 0x13c   : > { %v1100_v46 = vadd.f32 %v1099_v63, %v5501_v53  ;;  %v5626_v53 = vsel %vm523_vm0, %v674_v59, %v678_v6  ;;  %v504_v63 = vunpack.c.l.b16 %v366_v27 }
 0x13d   : > { %7289 = vst [vmem:[#allocation34_spill] sm:$0xff] %v5612_v14  ;;  %v5630_v29 = vsel %vm732_vm1, %v766_v52, %v767_v15  ;;  %v685_v59 = vrot.slane %v683_v32, 1 }
 0x13e   : > { %7290 = vst [vmem:[#allocation35_spill] sm:$0xff] %v5614_v57  ;;  %v5636_v60 = vpack.c.b16 %v504_v63, %v504_v63  ;;  %v369_v63 = vld [vmem:[%s5283_s7 + $0xb0] sm:$0xf] }
 0x140   : > { %v688_v6 = vshll.u32 %v5636_v60, 16 }
 0x142   : > { %v1188_v1 = vpop.f32.mrf.mxu2  ;;  %v1528_v11 = vpop.f32.mrf.mxu3  ;;  %v690_v27 = vrot.slane %v688_v6, 1 }
 0x143   : > { %v5621_v14 = vadd.f32 %v1188_v1, %v1100_v46  ;;  %v5623_v12 = vadd.f32 %v1617_v36, %v1528_v11  ;;  %v1102_v57 = vpop.f32.mrf.mxu1  ;;  %v1620_v25 = vpop.f32.mrf.mxu0  ;;  %v769_v1 = vrot.slane %v5311_v13, 1  ;;  %v770_v11 = vrot.slane %v5608_v50, 1 }
 0x144   : > { %v1103_v21 = vadd.f32 %v1102_v57, %v5512_v23  ;;  %v681_v23 = vshrl.u32 %v5327_v33, 16  ;;  %v695_v50 = vshll.u32 %v5343_v51, 16 }
 0x145   : > { %7291 = vst [vmem:[#allocation36_spill] sm:$0xff] %v5621_v14 }
 0x146   : > { %7292 = vst [vmem:[#allocation37_spill] sm:$0xff] %v5623_v12  ;;  %1141 = vmatmul.bf16.gmra.mxu1 %v5598_v22  ;;  %1659 = vmatmul.bf16.gmra.mxu0 %v5626_v53  ;;  %v686_v15 = vor.u32 %v685_v59, %v681_v23  ;;  %v693_v59 = vshrl.u32 %v5343_v51, 16 }
 0x147   : > { %1230 = vmatmul.bf16.gmra.mxu2 %v5630_v29  ;;  %1570 = vmatmul.bf16.gmra.mxu3 %v5311_v13 }
 0x148   : > { %v5654_v32 = vsel %vm523_vm0, %v686_v15, %v690_v27  ;;  %v697_v27 = vrot.slane %v695_v50, 1 }
 0x14a   : > { %v1191_v36 = vpop.f32.mrf.mxu2  ;;  %v1531_v19 = vpop.f32.mrf.mxu3 }
 0x14b   : > { %v5640_v57 = vadd.f32 %v1191_v36, %v1103_v21  ;;  %v5642_v46 = vadd.f32 %v1620_v25, %v1531_v19  ;;  %v1104_v49 = vpop.f32.mrf.mxu1  ;;  %v1622_v17 = vpop.f32.mrf.mxu0 }
 0x14c   : > { %v1105_v52 = vadd.f32 %v1104_v49, %v5531_v55  ;;  %v5657_v55 = vsel %vm732_vm1, %v769_v1, %v770_v11  ;;  %v4631_v11 = vld [vmem:[#allocation8 + $0x140] sm:$0xff] }
 0x14d   : > { %7293 = vst [vmem:[#allocation38_spill] sm:$0xff] %v5640_v57  ;;  %v505_v57 = vunpack.c.l.b16 %v369_v63  ;;  %v4655_v63 = vld [vmem:[#allocation8 + $0x200] sm:$0xff]  ;;  %1692 = vmatpush.bf16.msra.mxu1 %v4631_v11 }
 0x14e   : > { %2274 = vmatpush.bf16.msra.mxu0 %v4655_v63 }
 0x14f   : > { %v5663_v13 = vpack.c.b16 %v505_v57, %v505_v57 }
 0x151   : > { %v700_v1 = vshll.u32 %v5663_v13, 16 }
 0x152   : > { %v1193_v14 = vpop.f32.mrf.mxu2  ;;  %v1533_v12 = vpop.f32.mrf.mxu3 }
 0x153   : > { %v5649_v21 = vadd.f32 %v1193_v14, %v1105_v52  ;;  %v5651_v25 = vadd.f32 %v1622_v17, %v1533_v12  ;;  %v1107_v36 = vpop.f32.mrf.mxu1  ;;  %v1625_v19 = vpop.f32.mrf.mxu0  ;;  %v4639_v14 = vld [vmem:[#allocation8 + $0x180] sm:$0xff] }
 0x154   : > { %v4647_v12 = vld [vmem:[#allocation8 + $0x1c0] sm:$0xff]  ;;  %v1108_v23 = vadd.f32 %v1107_v36, %v5424_v34  ;;  %2096 = vmatpush.bf16.msra.mxu2 %v4639_v14  ;;  %v698_v34 = vor.u32 %v697_v27, %v693_v59  ;;  %v702_v36 = vrot.slane %v700_v1, 1  ;;  %v772_v14 = vrot.slane %v5327_v33, 1 }
 0x155   : > { %7294 = vst [vmem:[#allocation39_spill] sm:$0xff] %v5649_v21  ;;  %2185 = vmatpush.bf16.msra.mxu3 %v4647_v12  ;;  %v773_v12 = vrot.slane %v5636_v60, 1  ;;  %v372_v21 = vld [vmem:[%s5283_s7 + $0xbc] sm:$0xf] }
 0x156   : > { %1146 = vmatmul.bf16.gmra.mxu1 %v5626_v53  ;;  %1664 = vmatmul.bf16.gmra.mxu0 %v5654_v32  ;;  %v5682_v11 = vsel %vm523_vm0, %v698_v34, %v702_v36  ;;  %v506_v59 = vunpack.c.l.b16 %v372_v21  ;;  %v705_v21 = vshrl.u32 %v5361_v61, 16 }
 0x157   : > { %1235 = vmatmul.bf16.gmra.mxu2 %v5657_v55  ;;  %1575 = vmatmul.bf16.gmra.mxu3 %v5327_v33  ;;  %v5685_v27 = vsel %vm732_vm1, %v772_v14, %v773_v12 }
 0x158   : > { %v522_v33 = vpack.c.b16 %v506_v59, %v506_v59  ;;  %v776_v59 = vrot.slane %v5663_v13, 1 }
 0x15a   : > { %v1196_v49 = vpop.f32.mrf.mxu2  ;;  %v1536_v17 = vpop.f32.mrf.mxu3  ;;  %v712_v12 = vshll.u32 %v522_v33, 16 }
 0x15b   : > { %v5668_v6 = vadd.f32 %v1196_v49, %v1108_v23  ;;  %v5670_v52 = vadd.f32 %v1625_v19, %v1536_v17  ;;  %v1109_v15 = vpop.f32.mrf.mxu1  ;;  %v1627_v57 = vpop.f32.mrf.mxu0 }
 0x15c   : > { %v1110_v23 = vadd.f32 %v1109_v15, %v5443_v30  ;;  %v707_v30 = vshll.u32 %v5361_v61, 16 }
 0x15d   : > { %7295 = vst [vmem:[#allocation40_spill] sm:$0xff] %v5668_v6 }
 0x15e   : > { %7296 = vst [vmem:[#allocation41_spill] sm:$0xff] %v5670_v52  ;;  %v709_v14 = vrot.slane %v707_v30, 1 }
 0x162   : > { %v1198_v19 = vpop.f32.mrf.mxu2  ;;  %v1538_v49 = vpop.f32.mrf.mxu3 }
 0x163   : > { %v5677_v17 = vadd.f32 %v1198_v19, %v1110_v23  ;;  %v5679_v50 = vadd.f32 %v1627_v57, %v1538_v49  ;;  %v1112_v6 = vpop.f32.mrf.mxu1  ;;  %v1630_v52 = vpop.f32.mrf.mxu0  ;;  %v710_v23 = vor.u32 %v709_v14, %v705_v21  ;;  %v714_v19 = vrot.slane %v712_v12, 1  ;;  %v4589_v21 = vld [vmem:[%s5291_s11] sm:$0xff] }
 0x164   : > { %v1113_v60 = vadd.f32 %v1112_v6, %v5454_v4  ;;  %v775_v49 = vrot.slane %v5343_v51, 1  ;;  %v375_v4 = vld [vmem:[%s5291_s11 + $0x8] sm:$0xf]  ;;  %v1300_v13 = vshll.u32 %v4589_v21, 16 }
 0x165   : > { %7297 = vst [vmem:[#allocation42_spill] sm:$0xff] %v5677_v17  ;;  %v5707_v30 = vsel %vm523_vm0, %v710_v23, %v714_v19  ;;  %v1295_v14 = vunpack.c.l.b16 %v375_v4 }
 0x166   : > { %7298 = vst [vmem:[#allocation43_spill] sm:$0xff] %v5679_v50  ;;  %1151 = vmatmul.bf16.gmra.mxu1 %v5654_v32  ;;  %1669 = vmatmul.bf16.gmra.mxu0 %v5682_v11 }
 0x167   : > { %1240 = vmatmul.bf16.gmra.mxu2 %v5685_v27  ;;  %1580 = vmatmul.bf16.gmra.mxu3 %v5343_v51  ;;  %v5711_v51 = vsel %vm732_vm1, %v775_v49, %v776_v59  ;;  %v1302_v59 = vrot.slane %v1300_v13, 1 }
 0x16a   : > { %v1201_v15 = vpop.f32.mrf.mxu2  ;;  %v1541_v57 = vpop.f32.mrf.mxu3 }
 0x16b   : > { %v5694_v1 = vadd.f32 %v1201_v15, %v1113_v60  ;;  %v5696_v63 = vadd.f32 %v1630_v52, %v1541_v57  ;;  %v1114_v34 = vpop.f32.mrf.mxu1  ;;  %v1632_v36 = vpop.f32.mrf.mxu0 }
 0x16c   : > { %v1115_v6 = vadd.f32 %v1114_v34, %v5473_v16  ;;  %v5717_v16 = vpack.c.b16 %v1295_v14, %v1295_v14  ;;  %v778_v14 = vrot.slane %v5361_v61, 1 }
 0x16d   : > { %7299 = vst [vmem:[#allocation44_spill] sm:$0xff] %v5694_v1 }
 0x16e   : > { %7300 = vst [vmem:[#allocation45_spill] sm:$0xff] %v5696_v63  ;;  %v1305_v4 = vshll.u32 %v5717_v16, 16 }
 0x172   : > { %v1203_v17 = vpop.f32.mrf.mxu2  ;;  %v1543_v50 = vpop.f32.mrf.mxu3 }
 0x173   : > { %v5702_v60 = vadd.f32 %v1203_v17, %v1115_v6  ;;  %v5704_v52 = vadd.f32 %v1632_v36, %v1543_v50  ;;  %v1117_v15 = vpop.f32.mrf.mxu1  ;;  %v1635_v57 = vpop.f32.mrf.mxu0  ;;  %v1298_v36 = vshrl.u32 %v4589_v21, 16 }
 0x174   : > { %v1118_v17 = vadd.f32 %v1117_v15, %v5484_v28 }
 0x175   : > { %7301 = vst [vmem:[#allocation46_spill] sm:$0xff] %v5702_v60  ;;  %v1303_v6 = vor.u32 %v1302_v59, %v1298_v36  ;;  %v1307_v60 = vrot.slane %v1305_v4, 1 }
 0x176   : > { %7302 = vst [vmem:[#allocation47_spill] sm:$0xff] %v5704_v52  ;;  %1156 = vmatmul.bf16.gmra.mxu1 %v5682_v11  ;;  %1674 = vmatmul.bf16.gmra.mxu0 %v5707_v30  ;;  %v779_v52 = vrot.slane %v522_v33, 1 }
 0x177   : > { %1245 = vmatmul.bf16.gmra.mxu2 %v5711_v51  ;;  %1585 = vmatmul.bf16.gmra.mxu3 %v5361_v61 }
 0x178   : > { %v5735_v13 = vsel %vm732_vm1, %v778_v14, %v779_v52 }
 0x17a   : > { %v1206_v50 = vpop.f32.mrf.mxu2  ;;  %v1546_v34 = vpop.f32.mrf.mxu3 }
 0x17b   : > { %v5720_v12 = vadd.f32 %v1206_v50, %v1118_v17  ;;  %v5722_v23 = vadd.f32 %v1635_v57, %v1546_v34  ;;  %v1119_v19 = vpop.f32.mrf.mxu1  ;;  %v1637_v49 = vpop.f32.mrf.mxu0  ;;  %v5732_v34 = vsel %vm523_vm0, %v1303_v6, %v1307_v60 }
 0x17c   : > { %v1120_v1 = vadd.f32 %v1119_v19, %v5503_v54 }
 0x182   : > { %v1208_v28 = vpop.f32.mrf.mxu2  ;;  %v1548_v15 = vpop.f32.mrf.mxu3 }
 0x183   : > { %v5727_v63 = vadd.f32 %v1208_v28, %v1120_v1  ;;  %v5729_v17 = vadd.f32 %v1637_v49, %v1548_v15  ;;  %v1122_v57 = vpop.f32.mrf.mxu1  ;;  %v1640_v50 = vpop.f32.mrf.mxu0 }
 0x184   : > { %v1123_v61 = vadd.f32 %v1122_v57, %v5514_v24  ;;  %v4936_v24 = vld [vmem:[%s5283_s7 + $0x18] sm:$0xff] }
 0x186   : > { %1161 = vmatmul.bf16.gmra.mxu1 %v5707_v30  ;;  %1679 = vmatmul.bf16.gmra.mxu0 %v5732_v34 }
 0x187   : > { %1250 = vmatmul.bf16.gmra.mxu2 %v5735_v13  ;;  %1590 = vmatmul.bf16.gmra.mxu3 %v4589_v21 }
 0x18a   : > { %v1211_v54 = vpop.f32.mrf.mxu2  ;;  %v1551_v33 = vpop.f32.mrf.mxu3 }
 0x18b   : > { %v5741_v1 = vadd.f32 %v1211_v54, %v1123_v61  ;;  %v5743_v36 = vadd.f32 %v1640_v50, %v1551_v33  ;;  %v1124_v60 = vpop.f32.mrf.mxu1  ;;  %v1642_v19 = vpop.f32.mrf.mxu0 }
 0x18c   : > { %v1125_v52 = vadd.f32 %v1124_v60, %v5533_v56 }
 0x192   : > { %v1213_v49 = vpop.f32.mrf.mxu2  ;;  %v1553_v59 = vpop.f32.mrf.mxu3 }
 0x193   : > { %v5746_v4 = vadd.f32 %v1213_v49, %v1125_v52  ;;  %v5748_v6 = vadd.f32 %v1642_v19, %v1553_v59  ;;  %v1127_v21 = vpop.f32.mrf.mxu1  ;;  %v1645_v14 = vpop.f32.mrf.mxu0 }
 0x194   : > { %v1128_v28 = vadd.f32 %v1127_v21, %v5437_v41  ;;  %v4937_v41 = vld [vmem:[%s5283_s7 + $0x24] sm:$0xff] }
 0x196   : > { %1693 = vmatmul.bf16.vlgmr.msra.gmra.mxu1 %v5385_v44  ;;  %2275 = vmatmul.bf16.vlgmr.msra.gmra.mxu0 %v5398_v0 }
 0x197   : > { %2097 = vmatmul.bf16.vlgmr.msra.gmra.mxu2 %v4936_v24  ;;  %2186 = vmatmul.bf16.vlgmr.msra.gmra.mxu3 %v5382_v42 }
 0x19a   : > { %v1216_v56 = vpop.f32.mrf.mxu2  ;;  %v1556_v15 = vpop.f32.mrf.mxu3 }
 0x19b   : > { %v5755_v57 = vadd.f32 %v1216_v56, %v1128_v28  ;;  %v5757_v50 = vadd.f32 %v1645_v14, %v1556_v15  ;;  %v1129_v61 = vpop.f32.mrf.mxu1  ;;  %v1647_v54 = vpop.f32.mrf.mxu0 }
 0x19c   : > { %v1130_v33 = vadd.f32 %v1129_v61, %v5448_v48 }
 0x1a2   : > { %v1218_v44 = vpop.f32.mrf.mxu2  ;;  %v1558_v60 = vpop.f32.mrf.mxu3 }
 0x1a3   : > { %v5760_v19 = vadd.f32 %v1218_v44, %v1130_v33  ;;  %v5762_v52 = vadd.f32 %v1647_v54, %v1558_v60  ;;  %v1132_v42 = vpop.f32.mrf.mxu1  ;;  %v1650_v49 = vpop.f32.mrf.mxu0 }
 0x1a4   : > { %v1133_v59 = vadd.f32 %v1132_v42, %v5467_v9  ;;  %v4938_v9 = vld [vmem:[%s5283_s7 + $0x30] sm:$0xff] }
 0x1a6   : > { %1698 = vmatmul.bf16.gmra.mxu1 %v5398_v0  ;;  %2280 = vmatmul.bf16.gmra.mxu0 %v5412_v20 }
 0x1a7   : > { %2102 = vmatmul.bf16.gmra.mxu2 %v4937_v41  ;;  %2191 = vmatmul.bf16.gmra.mxu3 %v5395_v62 }
 0x1aa   : > { %v1221_v48 = vpop.f32.mrf.mxu2  ;;  %v1561_v21 = vpop.f32.mrf.mxu3 }
 0x1ab   : > { %v5769_v14 = vadd.f32 %v1221_v48, %v1133_v59  ;;  %v5771_v24 = vadd.f32 %v1650_v49, %v1561_v21  ;;  %v1134_v28 = vpop.f32.mrf.mxu1  ;;  %v1652_v56 = vpop.f32.mrf.mxu0 }
 0x1ac   : > { %v1135_v15 = vadd.f32 %v1134_v28, %v5478_v26 }
 0x1b2   : > { %v1223_v0 = vpop.f32.mrf.mxu2  ;;  %v1563_v61 = vpop.f32.mrf.mxu3 }
 0x1b3   : > { %v5774_v54 = vadd.f32 %v1223_v0, %v1135_v15  ;;  %v5776_v33 = vadd.f32 %v1652_v56, %v1563_v61  ;;  %v1137_v62 = vpop.f32.mrf.mxu1  ;;  %v1655_v44 = vpop.f32.mrf.mxu0 }
 0x1b4   : > { %v1138_v60 = vadd.f32 %v1137_v62, %v5497_v47  ;;  %v4939_v47 = vld [vmem:[%s5283_s7 + $0x3c] sm:$0xff] }
 0x1b5   : > { %7303 = vst [vmem:[#allocation48_spill] sm:$0xff] %v5774_v54 }
 0x1b6   : > { %1703 = vmatmul.bf16.gmra.mxu1 %v5412_v20  ;;  %2285 = vmatmul.bf16.gmra.mxu0 %v5430_v37 }
 0x1b7   : > { %2107 = vmatmul.bf16.gmra.mxu2 %v4938_v9  ;;  %2196 = vmatmul.bf16.gmra.mxu3 %v5409_v18 }
 0x1ba   : > { %v1226_v26 = vpop.f32.mrf.mxu2  ;;  %v1566_v42 = vpop.f32.mrf.mxu3 }
 0x1bb   : > { %v5783_v49 = vadd.f32 %v1226_v26, %v1138_v60  ;;  %v5785_v41 = vadd.f32 %v1655_v44, %v1566_v42  ;;  %v1139_v59 = vpop.f32.mrf.mxu1  ;;  %v1657_v48 = vpop.f32.mrf.mxu0 }
 0x1bc   : > { %v1140_v21 = vadd.f32 %v1139_v59, %v5508_v58 }
 0x1bd   : > { %7304 = vst [vmem:[#allocation49_spill] sm:$0xff] %v5783_v49 }
 0x1be   : > { %7305 = vst [vmem:[#allocation50_spill] sm:$0xff] %v5785_v41 }
 0x1c2   : > { %v1228_v20 = vpop.f32.mrf.mxu2  ;;  %v1568_v28 = vpop.f32.mrf.mxu3 }
 0x1c3   : > { %v5788_v56 = vadd.f32 %v1228_v20, %v1140_v21  ;;  %v5790_v15 = vadd.f32 %v1657_v48, %v1568_v28  ;;  %v1142_v18 = vpop.f32.mrf.mxu1  ;;  %v1660_v0 = vpop.f32.mrf.mxu0 }
 0x1c4   : > { %v1143_v61 = vadd.f32 %v1142_v18, %v5527_v40  ;;  %v4940_v40 = vld [vmem:[%s5283_s7 + $0x48] sm:$0xff] }
 0x1c5   : > { %7306 = vst [vmem:[#allocation51_spill] sm:$0xff] %v5788_v56 }
 0x1c6   : > { %7307 = vst [vmem:[#allocation52_spill] sm:$0xff] %v5790_v15  ;;  %1708 = vmatmul.bf16.gmra.mxu1 %v5430_v37  ;;  %2290 = vmatmul.bf16.gmra.mxu0 %v5460_v7  ;;  %v7348_v15 = vld [vmem:[#allocation36_spill] sm:$0xff] }
 0x1c7   : > { %2112 = vmatmul.bf16.gmra.mxu2 %v4939_v47  ;;  %2201 = vmatmul.bf16.gmra.mxu3 %v5427_v35 }
 0x1ca   : > { %v1231_v58 = vpop.f32.mrf.mxu2  ;;  %v1571_v62 = vpop.f32.mrf.mxu3 }
 0x1cb   : > { %v5797_v44 = vadd.f32 %v1231_v58, %v1143_v61  ;;  %v5799_v9 = vadd.f32 %v1660_v0, %v1571_v62  ;;  %v1144_v60 = vpop.f32.mrf.mxu1  ;;  %v1662_v26 = vpop.f32.mrf.mxu0  ;;  %v7314_v62 = vld [vmem:[#allocation17_spill] sm:$0xff] }
 0x1cc   : > { %v1145_v42 = vadd.f32 %v1144_v60, %v5538_v38 }
 0x1cd   : > { %7308 = vst [vmem:[#allocation53_spill] sm:$0xff] %v5797_v44 }
 0x1ce   : > { %7309 = vst [vmem:[#allocation54_spill] sm:$0xff] %v5799_v9  ;;  %v4946_v9 = vld [vmem:[%s5283_s7 + $0x90] sm:$0xff] }
 0x1d2   : > { %v1233_v37 = vpop.f32.mrf.mxu2  ;;  %v1573_v59 = vpop.f32.mrf.mxu3 }
 0x1d3   : > { %v5802_v48 = vadd.f32 %v1233_v37, %v1145_v42  ;;  %v5804_v21 = vadd.f32 %v1662_v26, %v1573_v59  ;;  %v1147_v35 = vpop.f32.mrf.mxu1  ;;  %v1665_v20 = vpop.f32.mrf.mxu0 }
 0x1d4   : > { %v1148_v28 = vadd.f32 %v1147_v35, %v5439_v43  ;;  %v7317_v43 = vld [vmem:[#allocation24_spill] sm:$0xff] }
 0x1d5   : > { %7310 = vst [vmem:[#allocation55_spill] sm:$0xff] %v5802_v48  ;;  %v4941_v35 = vld [vmem:[%s5283_s7 + $0x54] sm:$0xff] }
 0x1d6   : > { %7311 = vst [vmem:[#allocation56_spill] sm:$0xff] %v5804_v21  ;;  %1713 = vmatmul.bf16.gmra.mxu1 %v5460_v7  ;;  %2295 = vmatmul.bf16.gmra.mxu0 %v5490_v39 }
 0x1d7   : > { %2117 = vmatmul.bf16.gmra.mxu2 %v4940_v40  ;;  %2206 = vmatmul.bf16.gmra.mxu3 %v5457_v5  ;;  %v7319_v40 = vld [vmem:[#allocation18_spill] sm:$0xff] }
 0x1da   : > { %v1236_v38 = vpop.f32.mrf.mxu2  ;;  %v1576_v18 = vpop.f32.mrf.mxu3 }
 0x1db   : > { %v5811_v0 = vadd.f32 %v1236_v38, %v1148_v28  ;;  %v5813_v47 = vadd.f32 %v1665_v20, %v1576_v18  ;;  %v1149_v61 = vpop.f32.mrf.mxu1  ;;  %v1667_v58 = vpop.f32.mrf.mxu0  ;;  %v7318_v20 = vld [vmem:[#allocation20_spill] sm:$0xff] }
 0x1dc   : > { %v1150_v60 = vadd.f32 %v1149_v61, %v7314_v62 }
 0x1dd   : > { %7312 = vst [vmem:[#allocation57_spill] sm:$0xff] %v5811_v0 }
 0x1de   : > { %7313 = vst [vmem:[#allocation58_spill] sm:$0xff] %v5813_v47 }
 0x1e2   : > { %v1238_v7 = vpop.f32.mrf.mxu2  ;;  %v1578_v26 = vpop.f32.mrf.mxu3 }
 0x1e3   : > { %v5816_v42 = vadd.f32 %v1238_v7, %v1150_v60  ;;  %v5818_v37 = vadd.f32 %v1667_v58, %v1578_v26  ;;  %v1152_v5 = vpop.f32.mrf.mxu1  ;;  %v1670_v59 = vpop.f32.mrf.mxu0  ;;  %v7322_v7 = vld [vmem:[#allocation19_spill] sm:$0xff] }
 0x1e4   : > { %v1153_v28 = vadd.f32 %v1152_v5, %v7319_v40  ;;  %v7325_v5 = vld [vmem:[#allocation27_spill] sm:$0xff]  ;;  %v4942_v40 = vld [vmem:[%s5283_s7 + $0x60] sm:$0xff] }
 0x1e5   : > { %7315 = vst [vmem:[#allocation17_spill] sm:$0xff] %v5816_v42 }
 0x1e6   : > { %7316 = vst [vmem:[#allocation59_spill] sm:$0xff] %v5818_v37  ;;  %1718 = vmatmul.bf16.gmra.mxu1 %v5490_v39  ;;  %2300 = vmatmul.bf16.gmra.mxu0 %v7317_v43 }
 0x1e7   : > { %2122 = vmatmul.bf16.gmra.mxu2 %v4941_v35  ;;  %2211 = vmatmul.bf16.gmra.mxu3 %v7318_v20 }
 0x1ea   : > { %v1241_v38 = vpop.f32.mrf.mxu2  ;;  %v1581_v18 = vpop.f32.mrf.mxu3 }
 0x1eb   : > { %v5825_v61 = vadd.f32 %v1241_v38, %v1153_v28  ;;  %v5827_v62 = vadd.f32 %v1670_v59, %v1581_v18  ;;  %v1154_v58 = vpop.f32.mrf.mxu1  ;;  %v1672_v60 = vpop.f32.mrf.mxu0  ;;  %v7326_v59 = vld [vmem:[#allocation23_spill] sm:$0xff]  ;;  %v7327_v28 = vld [vmem:[#allocation21_spill] sm:$0xff] }
 0x1ec   : > { %v1155_v26 = vadd.f32 %v1154_v58, %v7322_v7 }
 0x1ed   : > { %7320 = vst [vmem:[#allocation24_spill] sm:$0xff] %v5825_v61 }
 0x1ee   : > { %7321 = vst [vmem:[#allocation20_spill] sm:$0xff] %v5827_v62 }
 0x1f2   : > { %v1243_v39 = vpop.f32.mrf.mxu2  ;;  %v1583_v42 = vpop.f32.mrf.mxu3 }
 0x1f3   : > { %v5830_v37 = vadd.f32 %v1243_v39, %v1155_v26  ;;  %v5832_v35 = vadd.f32 %v1672_v60, %v1583_v42  ;;  %v1157_v20 = vpop.f32.mrf.mxu1  ;;  %v1675_v0 = vpop.f32.mrf.mxu0  ;;  %v7330_v39 = vld [vmem:[#allocation22_spill] sm:$0xff] }
 0x1f4   : > { %v1158_v38 = vadd.f32 %v1157_v20, %v7327_v28  ;;  %v4943_v20 = vld [vmem:[%s5283_s7 + $0x6c] sm:$0xff] }
 0x1f5   : > { %7323 = vst [vmem:[#allocation18_spill] sm:$0xff] %v5830_v37 }
 0x1f6   : > { %7324 = vst [vmem:[#allocation19_spill] sm:$0xff] %v5832_v35  ;;  %1723 = vmatmul.bf16.gmra.mxu1 %v7317_v43  ;;  %2305 = vmatmul.bf16.gmra.mxu0 %v7325_v5 }
 0x1f7   : > { %2127 = vmatmul.bf16.gmra.mxu2 %v4942_v40  ;;  %2216 = vmatmul.bf16.gmra.mxu3 %v7326_v59 }
 0x1fa   : > { %v1246_v18 = vpop.f32.mrf.mxu2  ;;  %v1586_v58 = vpop.f32.mrf.mxu3 }
 0x1fb   : > { %v5839_v7 = vadd.f32 %v1246_v18, %v1158_v38  ;;  %v5841_v26 = vadd.f32 %v1675_v0, %v1586_v58  ;;  %v1159_v42 = vpop.f32.mrf.mxu1  ;;  %v1677_v60 = vpop.f32.mrf.mxu0  ;;  %v7333_v0 = vld [vmem:[#allocation25_spill] sm:$0xff] }
 0x1fc   : > { %v1160_v37 = vadd.f32 %v1159_v42, %v7330_v39 }
 0x1fd   : > { %7328 = vst [vmem:[#allocation27_spill] sm:$0xff] %v5839_v7  ;;  %v7340_v7 = vld [vmem:[#allocation28_spill] sm:$0xff] }
 0x1fe   : > { %7329 = vst [vmem:[#allocation23_spill] sm:$0xff] %v5841_v26 }
 0x202   : > { %v1248_v43 = vpop.f32.mrf.mxu2  ;;  %v1588_v61 = vpop.f32.mrf.mxu3 }
 0x203   : > { %v5844_v35 = vadd.f32 %v1248_v43, %v1160_v37  ;;  %v5846_v40 = vadd.f32 %v1677_v60, %v1588_v61  ;;  %v1162_v59 = vpop.f32.mrf.mxu1  ;;  %v1680_v62 = vpop.f32.mrf.mxu0  ;;  %v7336_v60 = vld [vmem:[#allocation26_spill] sm:$0xff] }
 0x204   : > { %v1163_v28 = vadd.f32 %v1162_v59, %v7333_v0 }
 0x205   : > { %7331 = vst [vmem:[#allocation21_spill] sm:$0xff] %v5844_v35 }
 0x206   : > { %7332 = vst [vmem:[#allocation22_spill] sm:$0xff] %v5846_v40  ;;  %1728 = vmatmul.bf16.gmra.mxu1 %v7325_v5  ;;  %2310 = vmatmul.bf16.gmra.mxu0 %v5574_v31  ;;  %v7339_v40 = vld [vmem:[#allocation29_spill] sm:$0xff] }
 0x207   : > { %2132 = vmatmul.bf16.gmra.mxu2 %v4943_v20  ;;  %2221 = vmatmul.bf16.gmra.mxu3 %v5543_v10 }
 0x20a   : > { %v1251_v38 = vpop.f32.mrf.mxu2  ;;  %v1591_v18 = vpop.f32.mrf.mxu3 }
 0x20b   : > { %v5853_v58 = vadd.f32 %v1251_v38, %v1163_v28  ;;  %v5855_v37 = vadd.f32 %v1680_v62, %v1591_v18  ;;  %v1164_v61 = vpop.f32.mrf.mxu1  ;;  %v1682_v42 = vpop.f32.mrf.mxu0  ;;  %v4944_v62 = vld [vmem:[%s5283_s7 + $0x78] sm:$0xff] }
 0x20c   : > { %v1165_v39 = vadd.f32 %v1164_v61, %v7336_v60 }
 0x20d   : > { %7334 = vst [vmem:[#allocation25_spill] sm:$0xff] %v5853_v58 }
 0x20e   : > { %7335 = vst [vmem:[#allocation60_spill] sm:$0xff] %v5855_v37 }
 0x212   : > { %v1253_v5 = vpop.f32.mrf.mxu2  ;;  %v1593_v43 = vpop.f32.mrf.mxu3 }
 0x213   : > { %v5858_v35 = vadd.f32 %v1253_v5, %v1165_v39  ;;  %v5860_v20 = vadd.f32 %v1682_v42, %v1593_v43  ;;  %v1694_v10 = vpop.f32.mrf.mxu1  ;;  %v2276_v0 = vpop.f32.mrf.mxu0  ;;  %v7341_v42 = vld [vmem:[#allocation31_spill] sm:$0xff]  ;;  %v5878_v43 = vld [vmem:[%s7244_s3 + $0x1] ss:$0 sm:$0xff] }
 0x214   : > { %v1695_v59 = vadd.f32 %v1694_v10, %v7339_v40  ;;  %v5872_v40 = vld [vmem:[%s7244_s3] ss:$0 sm:$0xff] }
 0x215   : > { %7337 = vst [vmem:[#allocation26_spill] sm:$0xff] %v5858_v35 }
 0x216   : > { %7338 = vst [vmem:[#allocation61_spill] sm:$0xff] %v5860_v20  ;;  %v1806_v26 = vadd.f32 %v1695_v59, %v7340_v7  ;;  %1733 = vmatmul.bf16.gmra.mxu1 %v5574_v31  ;;  %2315 = vmatmul.bf16.gmra.mxu0 %v5602_v3  ;;  %v7342_v7 = vld [vmem:[#allocation30_spill] sm:$0xff] }
 0x217   : > { %2137 = vmatmul.bf16.gmra.mxu2 %v4944_v62  ;;  %2226 = vmatmul.bf16.gmra.mxu3 %v5570_v45 }
 0x21a   : > { %v2098_v28 = vpop.f32.mrf.mxu2  ;;  %v2187_v38 = vpop.f32.mrf.mxu3 }
 0x21b   : > { %v2188_v18 = vadd.f32 %v2187_v38, %v2098_v28  ;;  %v1696_v61 = vpop.f32.mrf.mxu1  ;;  %v2278_v45 = vpop.f32.mrf.mxu0 }
 0x21c   : > { %v1697_v60 = vadd.f32 %v1696_v61, %v7341_v42  ;;  %v7343_v42 = vld [vmem:[#allocation32_spill] sm:$0xff] }
 0x21d   : > { %v2277_v39 = vadd.f32 %v2276_v0, %v2188_v18 }
 0x21e   : > { %v1807_v31 = vadd.f32 %v1697_v60, %v7342_v7 }
 0x21f   : > { %v2388_v5 = vadd.f32 %v2277_v39, %v1806_v26 }
 0x221   : > { %v2487_v10 = vmul.f32 %v5872_v40, %v2388_v5  ;;  %v4945_v5 = vld [vmem:[%s5283_s7 + $0x84] sm:$0xff] }
 0x222   : > { %v2100_v59 = vpop.f32.mrf.mxu2  ;;  %v2189_v62 = vpop.f32.mrf.mxu3 }
 0x223   : > { %v5882_v0 = vadd.f32 %v5878_v43, %v2487_v10  ;;  %v2190_v28 = vadd.f32 %v2189_v62, %v2100_v59  ;;  %v1699_v38 = vpop.f32.mrf.mxu1  ;;  %v2281_v59 = vpop.f32.mrf.mxu0 }
 0x224   : > { %v1700_v18 = vadd.f32 %v1699_v38, %v5586_v2 }
 0x225   : > { %v5886_v26 = vmul.f32 0.70710677, %v5882_v0  ;;  %v2279_v61 = vadd.f32 %v2278_v45, %v2190_v28 }
 0x226   : > { %v1808_v60 = vadd.f32 %v1700_v18, %v7343_v42  ;;  %1738 = vmatmul.bf16.gmra.mxu1 %v5602_v3  ;;  %2320 = vmatmul.bf16.gmra.mxu0 %v5630_v29 }
 0x227   : > { %v2616_v39 = vmul.f32 %v5886_v26, %v5886_v26  ;;  %v2389_v7 = vadd.f32 %v2279_v61, %v1807_v31  ;;  %2142 = vmatmul.bf16.gmra.mxu2 %v4945_v5  ;;  %2231 = vmatmul.bf16.gmra.mxu3 %v5598_v22 }
 0x229   : > { %v2617_v10 = vmin.f32 %v2616_v39, 16.0  ;;  %v2488_v2 = vmul.f32 %v5872_v40, %v2389_v7  ;;  %v7344_v39 = vld [vmem:[#allocation33_spill] sm:$0xff] }
 0x22a   : > { %v2103_v62 = vpop.f32.mrf.mxu2  ;;  %v2192_v45 = vpop.f32.mrf.mxu3 }
 0x22b   : > { %v2618_v28 = vmul.f32 2.1237322e-06, %v2617_v10  ;;  %v2629_v38 = vmul.f32 3.8918573e-05, %v2617_v10  ;;  %v5897_v3 = vadd.f32 %v5878_v43, %v2488_v2  ;;  %v2193_v18 = vadd.f32 %v2192_v45, %v2103_v62  ;;  %v1701_v42 = vpop.f32.mrf.mxu1 }
 0x22c   : > { %v1702_v35 = vadd.f32 %v1701_v42, %v5595_v8  ;;  %v2283_v42 = vpop.f32.mrf.mxu0 }
 0x22d   : > { %v2619_v31 = vadd.f32 0.00028619796, %v2618_v28  ;;  %v2630_v61 = vadd.f32 0.001143296, %v2629_v38  ;;  %v2282_v5 = vadd.f32 %v2281_v59, %v2193_v18  ;;  %v5901_v22 = vmul.f32 0.70710677, %v5897_v3 }
 0x22e   : > { %v1809_v7 = vadd.f32 %v1702_v35, %v7344_v39 }
 0x22f   : > { %v2620_v20 = vmul.f32 %v2619_v31, %v2617_v10  ;;  %v2631_v58 = vmul.f32 %v2630_v61, %v2617_v10  ;;  %v2390_v37 = vadd.f32 %v2282_v5, %v1808_v60  ;;  %v2656_v47 = vmul.f32 %v5901_v22, %v5901_v22 }
 0x231   : > { %v2621_v2 = vadd.f32 0.0036580483, %v2620_v20  ;;  %v2632_v48 = vadd.f32 0.014752088, %v2631_v58  ;;  %v2489_v62 = vmul.f32 %v5872_v40, %v2390_v37  ;;  %v5907_v45 = vmin.f32 %v2656_v47, 16.0  ;;  %v7345_v20 = vld [vmem:[#allocation35_spill] sm:$0xff] }
 0x232   : > { %v2105_v8 = vpop.f32.mrf.mxu2  ;;  %v2194_v28 = vpop.f32.mrf.mxu3 }
 0x233   : > { %v2622_v59 = vmul.f32 %v2621_v2, %v2617_v10  ;;  %v2633_v38 = vmul.f32 %v2632_v48, %v2617_v10  ;;  %v2522_v18 = vadd.f32 %v5878_v43, %v2489_v62  ;;  %v2195_v35 = vadd.f32 %v2194_v28, %v2105_v8  ;;  %v1704_v31 = vpop.f32.mrf.mxu1  ;;  %v7346_v48 = vld [vmem:[#allocation34_spill] sm:$0xff] }
 0x234   : > { %v2658_v60 = vmul.f32 2.1237322e-06, %v5907_v45  ;;  %v2669_v61 = vmul.f32 3.8918573e-05, %v5907_v45  ;;  %v1705_v58 = vadd.f32 %v1704_v31, %v7345_v20 }
 0x235   : > { %v2623_v5 = vadd.f32 0.05243302, %v2622_v59  ;;  %v2634_v37 = vadd.f32 0.112945676, %v2633_v38  ;;  %v2284_v47 = vadd.f32 %v2283_v42, %v2195_v35  ;;  %v5913_v44 = vmul.f32 0.70710677, %v2522_v18 }
 0x236   : > { %v2659_v39 = vadd.f32 0.00028619796, %v2658_v60  ;;  %v2670_v21 = vadd.f32 0.001143296, %v2669_v61  ;;  %v1810_v2 = vadd.f32 %v1705_v58, %v7346_v48  ;;  %1743 = vmatmul.bf16.gmra.mxu1 %v5630_v29  ;;  %2325 = vmatmul.bf16.gmra.mxu0 %v5657_v55 }
 0x237   : > { %v2624_v62 = vmul.f32 %v2623_v5, %v2617_v10  ;;  %v2635_v8 = vmul.f32 %v2634_v37, %v2617_v10  ;;  %v2391_v28 = vadd.f32 %v2284_v47, %v1809_v7  ;;  %2147 = vmatmul.bf16.gmra.mxu2 %v4946_v9  ;;  %2236 = vmatmul.bf16.gmra.mxu3 %v5626_v53 }
 0x238   : > { %v2660_v59 = vmul.f32 %v2659_v39, %v5907_v45  ;;  %v2671_v38 = vmul.f32 %v2670_v21, %v5907_v45  ;;  %v2696_v42 = vmul.f32 %v5913_v44, %v5913_v44 }
 0x239   : > { %v2625_v35 = vadd.f32 0.18741608, %v2624_v62  ;;  %v2636_v31 = vadd.f32 0.4994258, %v2635_v8  ;;  %v2490_v29 = vmul.f32 %v5872_v40, %v2391_v28  ;;  %v2286_v28 = vpop.f32.mrf.mxu0 }
 0x23a   : > { %v2661_v60 = vadd.f32 0.0036580483, %v2660_v59  ;;  %v2672_v61 = vadd.f32 0.014752088, %v2671_v38  ;;  %v5925_v20 = vmin.f32 %v2696_v42, 16.0  ;;  %v2108_v7 = vpop.f32.mrf.mxu2  ;;  %v2197_v58 = vpop.f32.mrf.mxu3 }
 0x23b   : > { %v2626_v9 = vmul.f32 %v2625_v35, %v2617_v10  ;;  %v2637_v5 = vmul.f32 %v2636_v31, %v2617_v10  ;;  %v5928_v53 = vadd.f32 %v5878_v43, %v2490_v29  ;;  %v2198_v37 = vadd.f32 %v2197_v58, %v2108_v7  ;;  %v1706_v31 = vpop.f32.mrf.mxu1 }
 0x23c   : > { %v2662_v21 = vmul.f32 %v2661_v60, %v5907_v45  ;;  %v2673_v47 = vmul.f32 %v2672_v61, %v5907_v45  ;;  %v2698_v39 = vmul.f32 2.1237322e-06, %v5925_v20  ;;  %v2709_v62 = vmul.f32 3.8918573e-05, %v5925_v20 }
 0x23d   : > { %v5933_v48 = vadd.f32 1.0, %v2637_v5  ;;  %v5937_v8 = vmul.f32 0.70710677, %v5928_v53  ;;  %v2287_v42 = vadd.f32 %v2286_v28, %v2198_v37  ;;  %v2627_v35 = vadd.f32 1.1283791, %v2626_v9 }
 0x23e   : > { %v2663_v59 = vadd.f32 0.05243302, %v2662_v21  ;;  %v2674_v10 = vadd.f32 0.112945676, %v2673_v47  ;;  %v2699_v38 = vadd.f32 0.00028619796, %v2698_v39 }
 0x23f   : > { %4872 = vrcp.f32 %v5933_v48  ;;  %v5944_v7 = vmul.f32 0.5, %v5882_v0  ;;  %v5947_v58 = vmul.f32 0.5, %v5897_v3  ;;  %v2710_v5 = vadd.f32 0.001143296, %v2709_v62  ;;  %v7347_v39 = vld [vmem:[#allocation37_spill] sm:$0xff] }
 0x240   : > { %v2664_v29 = vmul.f32 %v2663_v59, %v5907_v45  ;;  %v2675_v60 = vmul.f32 %v2674_v10, %v5907_v45  ;;  %v2700_v61 = vmul.f32 %v2699_v38, %v5925_v20  ;;  %v2736_v37 = vmul.f32 %v5937_v8, %v5937_v8 }
 0x241   : > { %v5951_v21 = vmul.f32 0.5, %v2522_v18  ;;  %v2392_v47 = vadd.f32 %v2287_v42, %v1810_v2  ;;  %v1707_v28 = vadd.f32 %v1706_v31, %v7347_v39  ;;  %v5955_v59 = vmul.f32 %v2627_v35, %v5886_v26 }
 0x242   : > { %v2676_v9 = vadd.f32 0.4994258, %v2675_v60  ;;  %v2701_v10 = vadd.f32 0.0036580483, %v2700_v61  ;;  %v2711_v0 = vmul.f32 %v2710_v5, %v5925_v20  ;;  %v5958_v38 = vmin.f32 %v2736_v37, 16.0  ;;  %v2110_v37 = vpop.f32.mrf.mxu2 }
 0x243   : > { %v2648_v3 = vand.u32 2147483647, %v5933_v48  ;;  %v2665_v62 = vadd.f32 0.18741608, %v2664_v29  ;;  %v5963_v60 = vadd.f32 %v1707_v28, %v7348_v15  ;;  %v2650_v61 = vand.u32 2147483648, %v5933_v48  ;;  %v2199_v15 = vpop.f32.mrf.mxu3 }
 0x244   : > { %v2677_v56 = vmul.f32 %v2676_v9, %v5907_v45  ;;  %v2702_v2 = vmul.f32 %v2701_v10, %v5925_v20  ;;  %v2712_v42 = vadd.f32 0.014752088, %v2711_v0  ;;  %v2738_v26 = vmul.f32 2.1237322e-06, %v5958_v38  ;;  %v4947_v0 = vld [vmem:[%s5283_s7 + $0x9c] sm:$0xff] }
 0x245   : > { %v4873_v18 = vpop.eup %4872  ;;  %v2749_v35 = vmul.f32 3.8918573e-05, %v5958_v38  ;;  %v2491_v29 = vmul.f32 %v5872_v40, %v2392_v47  ;;  %vm2644_vm2 = vweird.f32 %v5933_v48  ;;  %vm5987_vm4 = vcmp.eq.f32.partialorder %v2648_v3, 8.507059e+37 }
 0x246   : > { %v2640_v31 = vmul.f32 %v4873_v18, %v5933_v48  ;;  %v5970_v5 = vadd.f32 1.0, %v2677_v56  ;;  %1748 = vmatmul.bf16.gmra.mxu1 %v5657_v55  ;;  %2330 = vmatmul.bf16.gmra.mxu0 %v5685_v27  ;;  %v2703_v9 = vadd.f32 0.05243302, %v2702_v2  ;;  %v2713_v39 = vmul.f32 %v2712_v42, %v5925_v20 }
 0x247   : > { %v2739_v28 = vadd.f32 0.00028619796, %v2738_v26  ;;  %v2750_v10 = vadd.f32 0.001143296, %v2749_v35  ;;  %2152 = vmatmul.bf16.gmra.mxu2 %v4947_v0  ;;  %2241 = vmatmul.bf16.gmra.mxu3 %v5654_v32  ;;  %v2666_v56 = vmul.f32 %v2665_v62, %v5907_v45  ;;  %vm2645_vm3 = vweird.f32 %v4873_v18 }
 0x248   : > { %v2641_v49 = vsub.f32 1.0, %v2640_v31  ;;  %4874 = vrcp.f32 %v5970_v5  ;;  %v2704_v55 = vmul.f32 %v2703_v9, %v5925_v20  ;;  %v2714_v47 = vadd.f32 0.112945676, %v2713_v39  ;;  %vm2646_vm5 = vmor %vm2644_vm2, %vm2645_vm3 }
 0x249   : > { %v2200_v2 = vadd.f32 %v2199_v15, %v2110_v37  ;;  %v2740_v42 = vmul.f32 %v2739_v28, %v5958_v38  ;;  %v2751_v26 = vmul.f32 %v2750_v10, %v5958_v38  ;;  %v5985_v35 = vadd.f32 %v5878_v43, %v2491_v29  ;;  %v1709_v15 = vpop.f32.mrf.mxu1 }
 0x24a   : > { %v2642_v41 = vmul.f32 %v4873_v18, %v2641_v49  ;;  %v2651_v45 = vor.u32 1.1754944e-38, %v2650_v61  ;;  %v2705_v62 = vadd.f32 0.18741608, %v2704_v55  ;;  %v2715_v31 = vmul.f32 %v2714_v47, %v5925_v20  ;;  %v2288_v49 = vpop.f32.mrf.mxu0 }
 0x24b   : > { %v2667_v9 = vadd.f32 1.1283791, %v2666_v56  ;;  %v2741_v39 = vadd.f32 0.0036580483, %v2740_v42  ;;  %v2752_v37 = vadd.f32 0.014752088, %v2751_v26  ;;  %vm2684_vm6 = vweird.f32 %v5970_v5 }
 0x24c   : > { %v2643_v0 = vadd.f32 %v4873_v18, %v2642_v41  ;;  %v2688_v3 = vand.u32 2147483647, %v5970_v5  ;;  %v2716_v29 = vadd.f32 0.4994258, %v2715_v31  ;;  %v5998_v61 = vmul.f32 0.70710677, %v5985_v35 }
 0x24d   : > { %v2289_v28 = vadd.f32 %v2288_v49, %v2200_v2  ;;  %v2690_v56 = vand.u32 2147483648, %v5970_v5  ;;  %v2742_v55 = vmul.f32 %v2741_v39, %v5958_v38  ;;  %v2753_v47 = vmul.f32 %v2752_v37, %v5958_v38 }
 0x24e   : > { %v4875_v10 = vpop.eup %4874  ;;  %v2647_v41 = vsel %vm2646_vm5, %v4873_v18, %v2643_v0  ;;  %v2706_v26 = vmul.f32 %v2705_v62, %v5925_v20  ;;  %v1710_v31 = vadd.f32 %v1709_v15, %v5642_v46  ;;  %v2717_v2 = vmul.f32 %v2716_v29, %v5925_v20 }
 0x24f   : > { %v2652_v48 = vsel %vm5987_vm4, %v2651_v45, %v2647_v41  ;;  %v2680_v42 = vmul.f32 %v4875_v10, %v5970_v5  ;;  %v2743_v18 = vadd.f32 0.05243302, %v2742_v55  ;;  %v2754_v0 = vadd.f32 0.112945676, %v2753_v47  ;;  %v2113_v41 = vpop.f32.mrf.mxu2  ;;  %v2202_v55 = vpop.f32.mrf.mxu3 }
 0x250   : > { %v2653_v54 = vmul.f32 %v2652_v48, %v5955_v59  ;;  %vm6010_vm7 = vcmp.eq.f32.partialorder %v2688_v3, 8.507059e+37  ;;  %v2776_v32 = vmul.f32 %v5998_v61, %v5998_v61  ;;  %v2393_v45 = vadd.f32 %v2289_v28, %v5963_v60  ;;  %v7353_v3 = vld [vmem:[#allocation38_spill] sm:$0xff] }
 0x251   : > { %v2681_v49 = vsub.f32 1.0, %v2680_v42  ;;  %v6017_v62 = vadd.f32 1.0, %v2717_v2  ;;  %v2744_v46 = vmul.f32 %v2743_v18, %v5958_v38  ;;  %v2755_v59 = vmul.f32 %v2754_v0, %v5958_v38 }
 0x252   : > { %v4536_v37 = vclamps-f32 %v2653_v54, 1.0  ;;  %vm2685_vm8 = vweird.f32 %v4875_v10  ;;  %v6021_v15 = vmin.f32 %v2776_v32, 16.0  ;;  %v6024_v29 = vadd.f32 %v1710_v31, %v7353_v3 }
 0x253   : > { %v2682_v20 = vmul.f32 %v4875_v10, %v2681_v49  ;;  %v2691_v47 = vor.u32 1.1754944e-38, %v2690_v56  ;;  %v2707_v48 = vadd.f32 1.1283791, %v2706_v26  ;;  %4876 = vrcp.f32 %v6017_v62  ;;  %vm2686_vm9 = vmor %vm2684_vm6, %vm2685_vm8 }
 0x254   : > { %v2492_v54 = vmul.f32 %v5872_v40, %v2393_v45  ;;  %v3896_v60 = vadd.f32 1.0, %v4536_v37  ;;  %v2745_v42 = vadd.f32 0.18741608, %v2744_v46  ;;  %v2756_v2 = vadd.f32 0.4994258, %v2755_v59 }
 0x255   : > { %v2683_v28 = vadd.f32 %v4875_v10, %v2682_v20  ;;  %v2668_v18 = vmul.f32 %v2667_v9, %v5901_v22  ;;  %v2728_v31 = vand.u32 2147483647, %v6017_v62  ;;  %v2778_v0 = vmul.f32 2.1237322e-06, %v6021_v15  ;;  %v4948_v9 = vld [vmem:[%s5283_s7 + $0xa8] sm:$0xff] }
 0x256   : > { %v2789_v56 = vmul.f32 3.8918573e-05, %v6021_v15  ;;  %1753 = vmatmul.bf16.gmra.mxu1 %v5685_v27  ;;  %2335 = vmatmul.bf16.gmra.mxu0 %v5711_v51  ;;  %v2730_v49 = vand.u32 2147483648, %v6017_v62  ;;  %v2746_v32 = vmul.f32 %v2745_v42, %v5958_v38  ;;  %v2757_v22 = vmul.f32 %v2756_v2, %v5958_v38 }
 0x257   : > { %v2687_v26 = vsel %vm2686_vm9, %v4875_v10, %v2683_v28  ;;  %2157 = vmatmul.bf16.gmra.mxu2 %v4948_v9  ;;  %2246 = vmatmul.bf16.gmra.mxu3 %v5682_v11  ;;  %v2779_v45 = vadd.f32 0.00028619796, %v2778_v0  ;;  %v6044_v27 = vadd.f32 %v5878_v43, %v2492_v54  ;;  %v6047_v46 = vmul.f32 0.5, %v5928_v53  ;;  %v2291_v53 = vpop.f32.mrf.mxu0 }
 0x258   : > { %v2692_v5 = vsel %vm6010_vm7, %v2691_v47, %v2687_v26  ;;  %v2790_v37 = vadd.f32 0.001143296, %v2789_v56  ;;  %v2747_v59 = vadd.f32 1.1283791, %v2746_v32  ;;  %v6049_v20 = vadd.f32 1.0, %v2757_v22  ;;  %v1711_v56 = vpop.f32.mrf.mxu1  ;;  %v2204_v32 = vpop.f32.mrf.mxu3 }
 0x259   : > { %v2693_v10 = vmul.f32 %v2692_v5, %v2668_v18  ;;  %v4877_v38 = vpop.eup %4876  ;;  %v2780_v3 = vmul.f32 %v2779_v45, %v6021_v15  ;;  %v6054_v39 = vmul.f32 0.70710677, %v6044_v27  ;;  %v2203_v47 = vadd.f32 %v2202_v55, %v2113_v41 }
 0x25a   : > { %v2791_v11 = vmul.f32 %v2790_v37, %v6021_v15  ;;  %v2708_v54 = vmul.f32 %v2707_v48, %v5913_v44  ;;  %v2720_v42 = vmul.f32 %v4877_v38, %v6017_v62  ;;  %vm2724_vm10 = vweird.f32 %v6017_v62  ;;  %v2115_v48 = vpop.f32.mrf.mxu2 }
 0x25b   : > { %v4537_v28 = vclamps-f32 %v2693_v10, 1.0  ;;  %v3928_v2 = vmul.f32 %v3896_v60, %v5944_v7  ;;  %vm6061_vm11 = vcmp.eq.f32.partialorder %v2728_v31, 8.507059e+37  ;;  %v2731_v0 = vor.u32 1.1754944e-38, %v2730_v49 }
 0x25c   : > { %4878 = vrcp.f32 %v6049_v20  ;;  %v2721_v55 = vsub.f32 1.0, %v2720_v42  ;;  %v2781_v26 = vadd.f32 0.0036580483, %v2780_v3  ;;  %v2792_v44 = vadd.f32 0.014752088, %v2791_v11 }
 0x25d   : > { %v3897_v41 = vadd.f32 1.0, %v4537_v28  ;;  %vm2725_vm12 = vweird.f32 %v4877_v38  ;;  %v6067_v22 = vmul.f32 %v2747_v59, %v5937_v8  ;;  %v2816_v7 = vmul.f32 %v6054_v39, %v6054_v39 }
 0x25e   : > { %v2292_v60 = vadd.f32 %v2291_v53, %v2203_v47  ;;  %v2722_v49 = vmul.f32 %v4877_v38, %v2721_v55  ;;  %v2782_v9 = vmul.f32 %v2781_v26, %v6021_v15  ;;  %v2793_v5 = vmul.f32 %v2792_v44, %v6021_v15  ;;  %vm2726_vm13 = vmor %vm2724_vm10, %vm2725_vm12 }
 0x25f   : > { %v3929_v31 = vmul.f32 %v3897_v41, %v5947_v58  ;;  %v6074_v45 = vmin.f32 %v2816_v7, 16.0  ;;  %v1712_v10 = vadd.f32 %v1711_v56, %v5651_v25  ;;  %v2205_v8 = vadd.f32 %v2204_v32, %v2115_v48  ;;  %v7356_v41 = vld [vmem:[#allocation39_spill] sm:$0xff] }
 0x260   : > { %v2394_v37 = vadd.f32 %v2292_v60, %v6024_v29  ;;  %v2723_v3 = vadd.f32 %v4877_v38, %v2722_v49  ;;  %v2783_v11 = vadd.f32 0.05243302, %v2782_v9  ;;  %v2794_v28 = vadd.f32 0.112945676, %v2793_v5  ;;  %v2293_v60 = vpop.f32.mrf.mxu0  ;;  %v1714_v18 = vpop.f32.mrf.mxu1 }
 0x261   : > { %v4667_v59 = vpack.c.bf16 %v3929_v31, %v3928_v2  ;;  %v2818_v58 = vmul.f32 2.1237322e-06, %v6074_v45  ;;  %v2829_v42 = vmul.f32 3.8918573e-05, %v6074_v45  ;;  %v1813_v29 = vadd.f32 %v1712_v10, %v7356_v41  ;;  %v4949_v10 = vld [vmem:[%s5283_s7 + $0xb4] sm:$0xff] }
 0x262   : > { %v4879_v47 = vpop.eup %4878  ;;  %v2493_v53 = vmul.f32 %v5872_v40, %v2394_v37  ;;  %v2727_v25 = vsel %vm2726_vm13, %v4877_v38, %v2723_v3  ;;  %vm2764_vm14 = vweird.f32 %v6049_v20  ;;  %v2784_v62 = vmul.f32 %v2783_v11, %v6021_v15 }
 0x263   : > { %4668 = vst [vmem:[%s6087_s26] sm:$0xff] %v4667_v59   ;;  %v2760_v2 = vmul.f32 %v4879_v47, %v6049_v20  ;;  %v2732_v56 = vsel %vm6061_vm11, %v2731_v0, %v2727_v25  ;;  %v2795_v55 = vmul.f32 %v2794_v28, %v6021_v15  ;;  %v2819_v26 = vadd.f32 0.00028619796, %v2818_v58 }
 0x264   : > { %v2830_v44 = vadd.f32 0.001143296, %v2829_v42  ;;  %v2733_v48 = vmul.f32 %v2732_v56, %v2708_v54  ;;  %v2770_v7 = vand.u32 2147483648, %v6049_v20  ;;  %v2526_v38 = vadd.f32 %v5878_v43, %v2493_v53 }
 0x265   : > { %v2761_v32 = vsub.f32 1.0, %v2760_v2  ;;  %v2796_v31 = vadd.f32 0.4994258, %v2795_v55  ;;  %v2820_v49 = vmul.f32 %v2819_v26, %v6074_v45  ;;  %v2294_v5 = vadd.f32 %v2293_v60, %v2205_v8  ;;  %v7357_v60 = vld [vmem:[#allocation41_spill] sm:$0xff] }
 0x266   : > { %v2831_v9 = vmul.f32 %v2830_v44, %v6074_v45  ;;  %1758 = vmatmul.bf16.gmra.mxu1 %v5711_v51  ;;  %2340 = vmatmul.bf16.gmra.mxu0 %v5735_v13  ;;  %vm2765_vm15 = vweird.f32 %v4879_v47  ;;  %v2768_v54 = vand.u32 2147483647, %v6049_v20  ;;  %v2785_v37 = vadd.f32 0.18741608, %v2784_v62 }
 0x267   : > { %v2762_v0 = vmul.f32 %v4879_v47, %v2761_v32  ;;  %2162 = vmatmul.bf16.gmra.mxu2 %v4949_v10  ;;  %2251 = vmatmul.bf16.gmra.mxu3 %v5707_v30  ;;  %v2797_v59 = vmul.f32 %v2796_v31, %v6021_v15  ;;  %v2821_v3 = vadd.f32 0.0036580483, %v2820_v49  ;;  %v6106_v28 = vmul.f32 0.70710677, %v2526_v38  ;;  %vm2766_vm2 = vmor %vm2764_vm14, %vm2765_vm15  ;;  %v2118_v31 = vpop.f32.mrf.mxu2  ;;  %v2207_v49 = vpop.f32.mrf.mxu3 }
 0x268   : > { %v2832_v11 = vadd.f32 0.014752088, %v2831_v9  ;;  %v4538_v8 = vclamps-f32 %v2733_v48, 1.0  ;;  %v2771_v51 = vor.u32 1.1754944e-38, %v2770_v7  ;;  %v2395_v42 = vadd.f32 %v2294_v5, %v1813_v29 }
 0x269   : > { %v2763_v58 = vadd.f32 %v4879_v47, %v2762_v0  ;;  %v6110_v53 = vadd.f32 1.0, %v2797_v59  ;;  %v2822_v41 = vmul.f32 %v2821_v3, %v6074_v45  ;;  %v2856_v30 = vmul.f32 %v6106_v28, %v6106_v28  ;;  %v1716_v59 = vpop.f32.mrf.mxu1 }
 0x26a   : > { %v2833_v25 = vmul.f32 %v2832_v11, %v6074_v45  ;;  %vm2769_vm3 = vcmp.eq.f32.partialorder %v2768_v54, 8.507059e+37  ;;  %v2786_v62 = vmul.f32 %v2785_v37, %v6021_v15  ;;  %v2494_v56 = vmul.f32 %v5872_v40, %v2395_v42  ;;  %v7358_v37 = vld [vmem:[#allocation40_spill] sm:$0xff] }
 0x26b   : > { %v2767_v2 = vsel %vm2766_vm2, %v4879_v47, %v2763_v58  ;;  %v6119_v29 = vmul.f32 0.5, %v5985_v35  ;;  %4880 = vrcp.f32 %v6110_v53  ;;  %v6123_v20 = vmul.f32 0.5, %v6044_v27 }
 0x26c   : > { %v2772_v55 = vsel %vm2769_vm3, %v2771_v51, %v2767_v2  ;;  %v2823_v44 = vadd.f32 0.05243302, %v2822_v41  ;;  %v2834_v48 = vadd.f32 0.112945676, %v2833_v25  ;;  %v6126_v32 = vmul.f32 0.5, %v2526_v38 }
 0x26d   : > { %v2773_v26 = vmul.f32 %v2772_v55, %v6067_v22  ;;  %v3898_v47 = vadd.f32 1.0, %v4538_v8  ;;  %v6128_v7 = vmin.f32 %v2856_v30, 16.0  ;;  %v6131_v15 = vadd.f32 %v5878_v43, %v2494_v56  ;;  %v2296_v56 = vpop.f32.mrf.mxu0  ;;  %v7359_v55 = vld [vmem:[#allocation43_spill] sm:$0xff] }
 0x26e   : > { %v1715_v35 = vadd.f32 %v1714_v18, %v7357_v60  ;;  %v2787_v5 = vadd.f32 1.1283791, %v2786_v62  ;;  %v2824_v27 = vmul.f32 %v2823_v44, %v6074_v45  ;;  %v2835_v22 = vmul.f32 %v2834_v48, %v6074_v45 }
 0x26f   : > { %v4539_v9 = vclamps-f32 %v2773_v26, 1.0  ;;  %v2808_v0 = vand.u32 2147483647, %v6110_v53  ;;  %v2858_v38 = vmul.f32 2.1237322e-06, %v6128_v7  ;;  %v2208_v8 = vadd.f32 %v2207_v49, %v2118_v31 }
 0x270   : > { %v2869_v54 = vmul.f32 3.8918573e-05, %v6128_v7  ;;  %v1814_v10 = vadd.f32 %v1715_v35, %v7358_v37  ;;  %v2825_v11 = vadd.f32 0.18741608, %v2824_v27  ;;  %v2836_v18 = vadd.f32 0.4994258, %v2835_v22 }
 0x271   : > { %v3899_v3 = vadd.f32 1.0, %v4539_v9  ;;  %v4881_v58 = vpop.eup %4880  ;;  %v3930_v51 = vmul.f32 %v3898_v47, %v5951_v21  ;;  %v2859_v42 = vadd.f32 0.00028619796, %v2858_v38  ;;  %v6142_v25 = vmul.f32 0.70710677, %v6131_v15  ;;  %v7360_v37 = vld [vmem:[#allocation42_spill] sm:$0xff] }
 0x272   : > { %v2870_v41 = vadd.f32 0.001143296, %v2869_v54  ;;  %v2800_v2 = vmul.f32 %v4881_v58, %v6110_v53  ;;  %v2810_v62 = vand.u32 2147483648, %v6110_v53  ;;  %v1717_v26 = vadd.f32 %v1716_v59, %v7359_v55 }
 0x273   : > { %v3931_v30 = vmul.f32 %v3899_v3, %v6047_v46  ;;  %v2837_v44 = vmul.f32 %v2836_v18, %v6074_v45  ;;  %v2860_v48 = vmul.f32 %v2859_v42, %v6128_v7  ;;  %v2896_v47 = vmul.f32 %v6142_v25, %v6142_v25 }
 0x274   : > { %v2871_v21 = vmul.f32 %v2870_v41, %v6128_v7  ;;  %v2801_v35 = vsub.f32 1.0, %v2800_v2  ;;  %v2826_v46 = vmul.f32 %v2825_v11, %v6074_v45  ;;  %v2297_v31 = vadd.f32 %v2296_v56, %v2208_v8  ;;  %v6169_v11 = vld [vmem:[%s5291_s11] sm:$0xff] }
 0x275   : > { %v4672_v60 = vpack.c.bf16 %v3931_v30, %v3930_v51  ;;  %v6154_v49 = vadd.f32 1.0, %v2837_v44  ;;  %v2861_v9 = vadd.f32 0.0036580483, %v2860_v48  ;;  %v6156_v22 = vmin.f32 %v2896_v47, 16.0 }
 0x276   : > { %v2872_v27 = vadd.f32 0.014752088, %v2871_v21  ;;  %1763 = vmatmul.bf16.gmra.mxu1 %v5735_v13  ;;  %v2802_v38 = vmul.f32 %v4881_v58, %v2801_v35  ;;  %vm2805_vm4 = vweird.f32 %v4881_v58  ;;  %v2396_v54 = vadd.f32 %v2297_v31, %v1814_v10 }
 0x277   : > { %4744 = vst [vmem:[%s6087_s26 + $0x8] sm:$0xff] %v4672_v60   ;;  %v1815_v59 = vadd.f32 %v1717_v26, %v7360_v37  ;;  %v2788_v3 = vmul.f32 %v2787_v5, %v5998_v61  ;;  %vm2804_vm5 = vweird.f32 %v6110_v53  ;;  %vm6163_vm6 = vcmp.eq.f32.partialorder %v2808_v0, 8.507059e+37  ;;  %2167 = vmatmul.bf16.gmra.mxu2 %v6169_v11  ;;  %2256 = vmatmul.bf16.gmra.mxu3 %v5732_v34  ;;  %v2120_v53 = vpop.f32.mrf.mxu2  ;;  %v2209_v5 = vpop.f32.mrf.mxu3 }
 0x278   : > { %4882 = vrcp.f32 %v6154_v49  ;;  %v2803_v13 = vadd.f32 %v4881_v58, %v2802_v38  ;;  %v2862_v10 = vmul.f32 %v2861_v9, %v6128_v7  ;;  %v2873_v18 = vmul.f32 %v2872_v27, %v6128_v7  ;;  %vm2806_vm7 = vmor %vm2804_vm5, %vm2805_vm4  ;;  %v2298_v60 = vpop.f32.mrf.mxu0 }
 0x279   : > { %v2898_v61 = vmul.f32 2.1237322e-06, %v6156_v22  ;;  %v2811_v0 = vor.u32 1.1754944e-38, %v2810_v62  ;;  %v2827_v8 = vadd.f32 1.1283791, %v2826_v46  ;;  %v2495_v42 = vmul.f32 %v5872_v40, %v2396_v54 }
 0x27a   : > { %v2909_v51 = vmul.f32 3.8918573e-05, %v6156_v22  ;;  %v2807_v41 = vsel %vm2806_vm7, %v4881_v58, %v2803_v13  ;;  %v2863_v30 = vadd.f32 0.05243302, %v2862_v10  ;;  %v2874_v34 = vadd.f32 0.112945676, %v2873_v18 }
 0x27b   : > { %v2899_v2 = vadd.f32 0.00028619796, %v2898_v61  ;;  %v2812_v56 = vsel %vm6163_vm6, %v2811_v0, %v2807_v41  ;;  %v2528_v26 = vadd.f32 %v5878_v43, %v2495_v42  ;;  %v2210_v44 = vadd.f32 %v2209_v5, %v2120_v53  ;;  %v1719_v41 = vpop.f32.mrf.mxu1 }
 0x27c   : > { %v2910_v55 = vadd.f32 0.001143296, %v2909_v51  ;;  %v2813_v48 = vmul.f32 %v2812_v56, %v2788_v3  ;;  %v2864_v21 = vmul.f32 %v2863_v30, %v6128_v7  ;;  %v2875_v62 = vmul.f32 %v2874_v34, %v6128_v7 }
 0x27d   : > { %v2900_v47 = vmul.f32 %v2899_v2, %v6156_v22  ;;  %v6186_v58 = vmul.f32 0.5, %v6131_v15  ;;  %v6189_v31 = vmul.f32 0.70710677, %v2528_v26  ;;  %v2299_v9 = vadd.f32 %v2298_v60, %v2210_v44 }
 0x27e   : > { %v4883_v35 = vpop.eup %4882  ;;  %v2911_v46 = vmul.f32 %v2910_v55, %v6156_v22  ;;  %v4540_v27 = vclamps-f32 %v2813_v48, 1.0  ;;  %v2828_v38 = vmul.f32 %v2827_v8, %v6054_v39  ;;  %v2848_v37 = vand.u32 2147483647, %v6154_v49 }
 0x27f   : > { %v2840_v54 = vmul.f32 %v4883_v35, %v6154_v49  ;;  %v2876_v3 = vadd.f32 0.4994258, %v2875_v62  ;;  %v2901_v45 = vadd.f32 0.0036580483, %v2900_v47  ;;  %v2936_v10 = vmul.f32 %v6189_v31, %v6189_v31  ;;  %v7365_v62 = vld [vmem:[#allocation45_spill] sm:$0xff] }
 0x280   : > { %v2912_v13 = vadd.f32 0.014752088, %v2911_v46  ;;  %v2850_v18 = vand.u32 2147483648, %v6154_v49  ;;  %v2865_v61 = vadd.f32 0.18741608, %v2864_v21  ;;  %v2397_v53 = vadd.f32 %v2299_v9, %v1815_v59 }
 0x281   : > { %v2841_v15 = vsub.f32 1.0, %v2840_v54  ;;  %v2877_v5 = vmul.f32 %v2876_v3, %v6128_v7  ;;  %v2902_v0 = vmul.f32 %v2901_v45, %v6156_v22  ;;  %v6200_v8 = vmin.f32 %v2936_v10, 16.0  ;;  %v2123_v54 = vpop.f32.mrf.mxu2 }
 0x282   : > { %v2913_v39 = vmul.f32 %v2912_v13, %v6156_v22  ;;  %vm2844_vm8 = vweird.f32 %v6154_v49  ;;  %vm2845_vm9 = vweird.f32 %v4883_v35  ;;  %vm6203_vm10 = vcmp.eq.f32.partialorder %v2848_v37, 8.507059e+37  ;;  %v2212_v37 = vpop.f32.mrf.mxu3 }
 0x283   : > { %v2842_v51 = vmul.f32 %v4883_v35, %v2841_v15  ;;  %v3900_v30 = vadd.f32 1.0, %v4540_v27  ;;  %v6207_v34 = vadd.f32 1.0, %v2877_v5  ;;  %v2903_v59 = vadd.f32 0.05243302, %v2902_v0  ;;  %vm2846_vm11 = vmor %vm2844_vm8, %vm2845_vm9  ;;  %v7366_v5 = vld [vmem:[#allocation44_spill] sm:$0xff] }
 0x284   : > { %v2914_v2 = vadd.f32 0.112945676, %v2913_v39  ;;  %v2851_v55 = vor.u32 1.1754944e-38, %v2850_v18  ;;  %v2938_v44 = vmul.f32 2.1237322e-06, %v6200_v8  ;;  %v2866_v49 = vmul.f32 %v2865_v61, %v6128_v7 }
 0x285   : > { %v2843_v56 = vadd.f32 %v4883_v35, %v2842_v51  ;;  %v2949_v48 = vmul.f32 3.8918573e-05, %v6200_v8  ;;  %4884 = vrcp.f32 %v6207_v34  ;;  %v2496_v21 = vmul.f32 %v5872_v40, %v2397_v53 }
 0x286   : > { %v1720_v47 = vadd.f32 %v1719_v41, %v7365_v62  ;;  %v2904_v46 = vmul.f32 %v2903_v59, %v6156_v22  ;;  %v2915_v9 = vmul.f32 %v2914_v2, %v6156_v22  ;;  %v2939_v27 = vadd.f32 0.00028619796, %v2938_v44  ;;  %v2301_v41 = vpop.f32.mrf.mxu0 }
 0x287   : > { %v2847_v60 = vsel %vm2846_vm11, %v4883_v35, %v2843_v56  ;;  %v3932_v3 = vmul.f32 %v3900_v30, %v6119_v29  ;;  %v6220_v7 = vmul.f32 0.5, %v2528_v26  ;;  %v2950_v13 = vadd.f32 0.001143296, %v2949_v48 }
 0x288   : > { %v2852_v45 = vsel %vm6203_vm10, %v2851_v55, %v2847_v60  ;;  %v2905_v15 = vadd.f32 0.18741608, %v2904_v46  ;;  %v2916_v18 = vadd.f32 0.4994258, %v2915_v9  ;;  %v2940_v35 = vmul.f32 %v2939_v27, %v6200_v8 }
 0x289   : > { %v2853_v10 = vmul.f32 %v2852_v45, %v2828_v38  ;;  %v2951_v61 = vmul.f32 %v2950_v13, %v6200_v8  ;;  %v6225_v53 = vadd.f32 %v5878_v43, %v2496_v21  ;;  %v1816_v0 = vadd.f32 %v1720_v47, %v7366_v5 }
 0x28a   : > { %v2213_v39 = vadd.f32 %v2212_v37, %v2123_v54  ;;  %v2867_v51 = vadd.f32 1.1283791, %v2866_v49  ;;  %v2917_v42 = vmul.f32 %v2916_v18, %v6156_v22  ;;  %v2941_v26 = vadd.f32 0.0036580483, %v2940_v35  ;;  %v1721_v37 = vpop.f32.mrf.mxu1 }
 0x28b   : > { %v4541_v29 = vclamps-f32 %v2853_v10, 1.0  ;;  %v4885_v30 = vpop.eup %4884  ;;  %v2888_v38 = vand.u32 2147483647, %v6207_v34  ;;  %v2952_v59 = vadd.f32 0.014752088, %v2951_v61  ;;  %v2890_v48 = vand.u32 2147483648, %v6207_v34 }
 0x28c   : > { %v6231_v2 = vmul.f32 0.70710677, %v6225_v53  ;;  %v2302_v56 = vadd.f32 %v2301_v41, %v2213_v39  ;;  %v2880_v44 = vmul.f32 %v4885_v30, %v6207_v34  ;;  %v2906_v21 = vmul.f32 %v2905_v15, %v6156_v22  ;;  %v2125_v15 = vpop.f32.mrf.mxu2 }
 0x28d   : > { %v3901_v55 = vadd.f32 1.0, %v4541_v29  ;;  %v6236_v49 = vadd.f32 1.0, %v2917_v42  ;;  %v2942_v62 = vmul.f32 %v2941_v26, %v6200_v8  ;;  %v2953_v47 = vmul.f32 %v2952_v59, %v6200_v8 }
 0x28e   : > { %v2976_v60 = vmul.f32 %v6231_v2, %v6231_v2  ;;  %v2868_v9 = vmul.f32 %v2867_v51, %v6106_v28  ;;  %v2881_v27 = vsub.f32 1.0, %v2880_v44  ;;  %v2398_v54 = vadd.f32 %v2302_v56, %v1816_v0  ;;  %v2214_v28 = vpop.f32.mrf.mxu3  ;;  %v6254_v0 = vld [vmem:[%s5291_s11 + $0xc] sm:$0xff] }
 0x28f   : > { %v3933_v46 = vmul.f32 %v3901_v55, %v6123_v20  ;;  %vm2884_vm12 = vweird.f32 %v6207_v34  ;;  %vm2885_vm13 = vweird.f32 %v4885_v30  ;;  %vm6245_vm14 = vcmp.eq.f32.partialorder %v2888_v38, 8.507059e+37  ;;  %2172 = vmatmul.bf16.gmra.mxu2 %v6254_v0  ;;  %v7370_v44 = vld [vmem:[#allocation46_spill] sm:$0xff] }
 0x290   : > { %4886 = vrcp.f32 %v6236_v49  ;;  %v2882_v13 = vmul.f32 %v4885_v30, %v2881_v27  ;;  %v2943_v10 = vadd.f32 0.05243302, %v2942_v62  ;;  %v2954_v20 = vadd.f32 0.112945676, %v2953_v47  ;;  %vm2886_vm15 = vmor %vm2884_vm12, %vm2885_vm13 }
 0x291   : > { %v4677_v45 = vpack.c.bf16 %v3933_v46, %v3932_v3  ;;  %v2891_v18 = vor.u32 1.1754944e-38, %v2890_v48  ;;  %v2907_v35 = vadd.f32 1.1283791, %v2906_v21  ;;  %v6250_v61 = vmin.f32 %v2976_v60, 16.0  ;;  %v7369_v3 = vld [vmem:[#allocation47_spill] sm:$0xff] }
 0x292   : > { %v2497_v5 = vmul.f32 %v5872_v40, %v2398_v54  ;;  %v2883_v39 = vadd.f32 %v4885_v30, %v2882_v13  ;;  %v2944_v29 = vmul.f32 %v2943_v10, %v6200_v8  ;;  %v2955_v51 = vmul.f32 %v2954_v20, %v6200_v8  ;;  %v2303_v13 = vpop.f32.mrf.mxu0 }
 0x293   : > { %4745 = vst [vmem:[%s6087_s26 + $0x10] sm:$0xff] %v4677_v45   ;;  %v1722_v42 = vadd.f32 %v1721_v37, %v7369_v3  ;;  %v2978_v26 = vmul.f32 2.1237322e-06, %v6250_v61  ;;  %v2989_v41 = vmul.f32 3.8918573e-05, %v6250_v61  ;;  %v2215_v38 = vadd.f32 %v2214_v28, %v2125_v15 }
 0x294   : > { %v6266_v40 = vadd.f32 %v5878_v43, %v2497_v5  ;;  %v2887_v59 = vsel %vm2886_vm15, %v4885_v30, %v2883_v39  ;;  %v2945_v56 = vadd.f32 0.18741608, %v2944_v29  ;;  %v2956_v55 = vadd.f32 0.4994258, %v2955_v51 }
 0x295   : > { %v1817_v48 = vadd.f32 %v1722_v42, %v7370_v44  ;;  %v2892_v34 = vsel %vm6245_vm14, %v2891_v18, %v2887_v59  ;;  %v2928_v62 = vand.u32 2147483647, %v6236_v49  ;;  %v2979_v47 = vadd.f32 0.00028619796, %v2978_v26  ;;  %v1724_v26 = vpop.f32.mrf.mxu1 }
 0x296   : > { %v4887_v21 = vpop.eup %4886  ;;  %v2990_v60 = vadd.f32 0.001143296, %v2989_v41  ;;  %v2893_v46 = vmul.f32 %v2892_v34, %v2868_v9  ;;  %v2930_v27 = vand.u32 2147483648, %v6236_v49  ;;  %v2946_v54 = vmul.f32 %v2945_v56, %v6200_v8 }
 0x297   : > { %v2920_v43 = vmul.f32 %v4887_v21, %v6236_v49  ;;  %v2957_v30 = vmul.f32 %v2956_v55, %v6200_v8  ;;  %v2980_v37 = vmul.f32 %v2979_v47, %v6250_v61  ;;  %v6280_v22 = vmul.f32 0.70710677, %v6266_v40  ;;  %v6304_v55 = vld [vmem:[%s7244_s3] ss:$0 sm:$0xff] }
 0x298   : > { %v2991_v45 = vmul.f32 %v2990_v60, %v6250_v61  ;;  %v4542_v10 = vclamps-f32 %v2893_v46, 1.0  ;;  %v2947_v15 = vadd.f32 1.1283791, %v2946_v54  ;;  %v2304_v9 = vadd.f32 %v2303_v13, %v2215_v38 }
 0x299   : > { %v2921_v20 = vsub.f32 1.0, %v2920_v43  ;;  %v6282_v28 = vadd.f32 1.0, %v2957_v30  ;;  %v2981_v18 = vadd.f32 0.0036580483, %v2980_v37  ;;  %v3016_v39 = vmul.f32 %v6280_v22, %v6280_v22  ;;  %v6315_v43 = vld [vmem:[%s7244_s3 + $0x1] ss:$0 sm:$0xff] }
 0x29a   : > { %v2992_v5 = vadd.f32 0.014752088, %v2991_v45  ;;  %v2908_v8 = vmul.f32 %v2907_v35, %v6142_v25  ;;  %vm2925_vm2 = vweird.f32 %v4887_v21  ;;  %v2399_v51 = vadd.f32 %v2304_v9, %v1817_v48  ;;  %v2217_v9 = vpop.f32.mrf.mxu3 }
 0x29b   : > { %v2922_v29 = vmul.f32 %v4887_v21, %v2921_v20  ;;  %vm2924_vm3 = vweird.f32 %v6236_v49  ;;  %vm6288_vm4 = vcmp.eq.f32.partialorder %v2928_v62, 8.507059e+37  ;;  %v2931_v42 = vor.u32 1.1754944e-38, %v2930_v27 }
 0x29c   : > { %4888 = vrcp.f32 %v6282_v28  ;;  %v3902_v41 = vadd.f32 1.0, %v4542_v10  ;;  %v2982_v59 = vmul.f32 %v2981_v18, %v6250_v61  ;;  %v2993_v56 = vmul.f32 %v2992_v5, %v6250_v61  ;;  %vm2926_vm5 = vmor %vm2924_vm3, %vm2925_vm2 }
 0x29d   : > { %v2923_v38 = vadd.f32 %v4887_v21, %v2922_v29  ;;  %v6296_v25 = vmul.f32 %v2947_v15, %v6189_v31  ;;  %v2968_v49 = vand.u32 2147483647, %v6282_v28  ;;  %v6299_v35 = vmin.f32 %v3016_v39, 16.0  ;;  %v2128_v15 = vpop.f32.mrf.mxu2 }
 0x29e   : > { %v2498_v44 = vmul.f32 %v6304_v55, %v2399_v51  ;;  %v2983_v34 = vadd.f32 0.05243302, %v2982_v59  ;;  %v2994_v62 = vadd.f32 0.112945676, %v2993_v56  ;;  %v1725_v47 = vadd.f32 %v1724_v26, %v5722_v23 }
 0x29f   : > { %v2927_v48 = vsel %vm2926_vm5, %v4887_v21, %v2923_v38  ;;  %v3018_v60 = vmul.f32 2.1237322e-06, %v6299_v35  ;;  %v3029_v46 = vmul.f32 3.8918573e-05, %v6299_v35  ;;  %v3934_v45 = vmul.f32 %v3902_v41, %v6126_v32 }
 0x2a0   : > { %v2932_v31 = vsel %vm6288_vm4, %v2931_v42, %v2927_v48  ;;  %v6318_v27 = vadd.f32 %v6315_v43, %v2498_v44  ;;  %v2984_v54 = vmul.f32 %v2983_v34, %v6250_v61  ;;  %v2995_v23 = vmul.f32 %v2994_v62, %v6250_v61  ;;  %v1726_v44 = vpop.f32.mrf.mxu1 }
 0x2a1   : > { %v2933_v21 = vmul.f32 %v2932_v31, %v2908_v8  ;;  %v1818_v30 = vadd.f32 %v1725_v47, %v5720_v12  ;;  %v2970_v13 = vand.u32 2147483648, %v6282_v28  ;;  %v3019_v10 = vadd.f32 0.00028619796, %v3018_v60  ;;  %v2306_v60 = vpop.f32.mrf.mxu0 }
 0x2a2   : > { %v4889_v37 = vpop.eup %4888  ;;  %v3030_v20 = vadd.f32 0.001143296, %v3029_v46  ;;  %v2985_v39 = vadd.f32 0.18741608, %v2984_v54  ;;  %v1310_v8 = vrot.slane %v6169_v11, 1  ;;  %v1311_v41 = vrot.slane %v5717_v16, 1 }
 0x2a3   : > { %v4543_v18 = vclamps-f32 %v2933_v21, 1.0  ;;  %v2960_v5 = vmul.f32 %v4889_v37, %v6282_v28  ;;  %v2996_v29 = vadd.f32 0.4994258, %v2995_v23  ;;  %v3020_v51 = vmul.f32 %v3019_v10, %v6299_v35 }
 0x2a4   : > { %v3031_v12 = vmul.f32 %v3030_v20, %v6299_v35  ;;  %v6330_v3 = vmul.f32 0.70710677, %v6318_v27  ;;  %v2986_v26 = vmul.f32 %v2985_v39, %v6250_v61  ;;  %vm2965_vm6 = vweird.f32 %v4889_v37 }
 0x2a5   : > { %v3903_v32 = vadd.f32 1.0, %v4543_v18  ;;  %v2961_v42 = vsub.f32 1.0, %v2960_v5  ;;  %v2997_v38 = vmul.f32 %v2996_v29, %v6250_v61  ;;  %v3021_v59 = vadd.f32 0.0036580483, %v3020_v51 }
 0x2a6   : > { %v3032_v56 = vadd.f32 0.014752088, %v3031_v12  ;;  %v3056_v11 = vmul.f32 %v6330_v3, %v6330_v3  ;;  %v1312_v62 = vsel %vm732_vm1, %v1310_v8, %v1311_v41  ;;  %vm2964_vm7 = vweird.f32 %v6282_v28 }
 0x2a7   : > { %v3935_v48 = vmul.f32 %v3903_v32, %v6186_v58  ;;  %v2962_v34 = vmul.f32 %v4889_v37, %v2961_v42  ;;  %v6339_v47 = vadd.f32 1.0, %v2997_v38  ;;  %v3022_v31 = vmul.f32 %v3021_v59, %v6299_v35  ;;  %2345 = vmatmul.bf16.gmra.mxu0 %v1312_v62  ;;  %1768 = vmatmul.bf16.gmra.mxu1 %v1312_v62  ;;  %vm2966_vm8 = vmor %vm2964_vm7, %vm2965_vm6 }
 0x2a8   : > { %v3033_v16 = vmul.f32 %v3032_v56, %v6299_v35  ;;  %v6343_v61 = vmin.f32 %v3056_v11, 16.0  ;;  %v2218_v58 = vadd.f32 %v2217_v9, %v2128_v15  ;;  %vm2969_vm9 = vcmp.eq.f32.partialorder %v2968_v49, 8.507059e+37  ;;  %v2130_v15 = vpop.f32.mrf.mxu2  ;;  %v2219_v49 = vpop.f32.mrf.mxu3 }
 0x2a9   : > { %v4682_v46 = vpack.c.bf16 %v3935_v48, %v3934_v45  ;;  %v2963_v21 = vadd.f32 %v4889_v37, %v2962_v34  ;;  %v2971_v54 = vor.u32 1.1754944e-38, %v2970_v13  ;;  %v2987_v23 = vadd.f32 1.1283791, %v2986_v26  ;;  %v1729_v48 = vpop.f32.mrf.mxu1 }
 0x2aa   : > { %4890 = vrcp.f32 %v6339_v47  ;;  %v3023_v20 = vadd.f32 0.05243302, %v3022_v31  ;;  %v3034_v18 = vadd.f32 0.112945676, %v3033_v16  ;;  %v2307_v5 = vadd.f32 %v2306_v60, %v2218_v58  ;;  %v2308_v16 = vpop.f32.mrf.mxu0 }
 0x2ab   : > { %4746 = vst [vmem:[%s6087_s26 + $0x18] sm:$0xff] %v4682_v46   ;;  %v2967_v10 = vsel %vm2966_vm8, %v4889_v37, %v2963_v21  ;;  %v6349_v8 = vmul.f32 0.5, %v6225_v53  ;;  %v6352_v45 = vmul.f32 0.5, %v6266_v40  ;;  %v3058_v28 = vmul.f32 2.1237322e-06, %v6343_v61 }
 0x2ac   : > { %v2972_v39 = vsel %vm2969_vm9, %v2971_v54, %v2967_v10  ;;  %v3024_v9 = vmul.f32 %v3023_v20, %v6299_v35  ;;  %v3035_v37 = vmul.f32 %v3034_v18, %v6299_v35  ;;  %v3069_v29 = vmul.f32 3.8918573e-05, %v6343_v61 }
 0x2ad   : > { %v2973_v13 = vmul.f32 %v2972_v39, %v6296_v25  ;;  %v6360_v51 = vmul.f32 0.5, %v6318_v27  ;;  %v3059_v53 = vadd.f32 0.00028619796, %v3058_v28  ;;  %v2400_v12 = vadd.f32 %v2307_v5, %v1818_v30 }
 0x2ae   : > { %v1727_v40 = vadd.f32 %v1726_v44, %v5729_v17  ;;  %v2988_v42 = vmul.f32 %v2987_v23, %v6231_v2  ;;  %v3036_v26 = vadd.f32 0.4994258, %v3035_v37  ;;  %v2220_v41 = vadd.f32 %v2219_v49, %v2130_v15 }
 0x2af   : > { %v4544_v32 = vclamps-f32 %v2973_v13, 1.0  ;;  %v3060_v25 = vmul.f32 %v3059_v53, %v6343_v61  ;;  %v3070_v59 = vadd.f32 0.001143296, %v3069_v29  ;;  %v2499_v56 = vmul.f32 %v6304_v55, %v2400_v12 }
 0x2b0   : > { %v4891_v38 = vpop.eup %4890  ;;  %v1819_v11 = vadd.f32 %v1727_v40, %v5727_v63  ;;  %v3008_v30 = vand.u32 2147483647, %v6339_v47  ;;  %v3010_v17 = vand.u32 2147483648, %v6339_v47  ;;  %v3025_v44 = vadd.f32 0.18741608, %v3024_v9 }
 0x2b1   : > { %v3000_v27 = vmul.f32 %v4891_v38, %v6339_v47  ;;  %v3037_v2 = vmul.f32 %v3036_v26, %v6299_v35  ;;  %v3061_v34 = vadd.f32 0.0036580483, %v3060_v25  ;;  %v3071_v62 = vmul.f32 %v3070_v59, %v6343_v61  ;;  %v378_v9 = vld [vmem:[%s5291_s11 + $0x14] sm:$0xf] }
 0x2b2   : > { %v6373_v31 = vadd.f32 %v6315_v43, %v2499_v56  ;;  %vm3004_vm10 = vweird.f32 %v6339_v47  ;;  %v2309_v63 = vadd.f32 %v2308_v16, %v2220_v41  ;;  %v1730_v46 = vadd.f32 %v1729_v48, %v5743_v36 }
 0x2b3   : > { %v3001_v60 = vsub.f32 1.0, %v3000_v27  ;;  %v3904_v21 = vadd.f32 1.0, %v4544_v32  ;;  %v6377_v58 = vadd.f32 1.0, %v3037_v2  ;;  %v3062_v54 = vmul.f32 %v3061_v34, %v6343_v61  ;;  %v2133_v34 = vpop.f32.mrf.mxu2 }
 0x2b4   : > { %v3072_v23 = vadd.f32 0.014752088, %v3071_v62  ;;  %vm3005_vm11 = vweird.f32 %v4891_v38  ;;  %v6381_v20 = vmul.f32 0.70710677, %v6373_v31  ;;  %v2401_v18 = vadd.f32 %v2309_v63, %v1819_v11  ;;  %v2222_v62 = vpop.f32.mrf.mxu3 }
 0x2b5   : > { %v3002_v10 = vmul.f32 %v4891_v38, %v3001_v60  ;;  %vm6383_vm12 = vcmp.eq.f32.partialorder %v3008_v30, 8.507059e+37  ;;  %v3011_v39 = vor.u32 1.1754944e-38, %v3010_v17  ;;  %v3026_v36 = vmul.f32 %v3025_v44, %v6299_v35  ;;  %vm3006_vm13 = vmor %vm3004_vm10, %vm3005_vm11 }
 0x2b6   : > { %4892 = vrcp.f32 %v6377_v58  ;;  %v3063_v15 = vadd.f32 0.05243302, %v3062_v54  ;;  %v3073_v49 = vmul.f32 %v3072_v23, %v6343_v61  ;;  %v3096_v13 = vmul.f32 %v6381_v20, %v6381_v20 }
 0x2b7   : > { %v3003_v28 = vadd.f32 %v4891_v38, %v3002_v10  ;;  %v3936_v37 = vmul.f32 %v3904_v21, %v6220_v7  ;;  %v3048_v29 = vand.u32 2147483647, %v6377_v58  ;;  %v2500_v53 = vmul.f32 %v6304_v55, %v2401_v18 }
 0x2b8   : > { %v6399_v35 = vadd.f32 %v1730_v46, %v5741_v1  ;;  %v3064_v40 = vmul.f32 %v3063_v15, %v6343_v61  ;;  %v3074_v32 = vadd.f32 0.112945676, %v3073_v49  ;;  %v6402_v26 = vmin.f32 %v3096_v13, 16.0  ;;  %v2311_v13 = vpop.f32.mrf.mxu0 }
 0x2b9   : > { %v3007_v12 = vsel %vm3006_vm13, %v4891_v38, %v3003_v28  ;;  %v3027_v7 = vadd.f32 1.1283791, %v3026_v36  ;;  %v6407_v47 = vadd.f32 %v6315_v43, %v2500_v53  ;;  %v1877_v25 = vunpack.c.l.b16 %v378_v9 }
 0x2ba   : > { %v3012_v41 = vsel %vm6383_vm12, %v3011_v39, %v3007_v12  ;;  %v3065_v56 = vadd.f32 0.18741608, %v3064_v40  ;;  %v3075_v11 = vmul.f32 %v3074_v32, %v6343_v61  ;;  %v3098_v1 = vmul.f32 2.1237322e-06, %v6402_v26 }
 0x2bb   : > { %v3013_v59 = vmul.f32 %v3012_v41, %v2988_v42  ;;  %vm3044_vm14 = vweird.f32 %v6377_v58  ;;  %v3050_v48 = vand.u32 2147483648, %v6377_v58  ;;  %v3109_v27 = vmul.f32 3.8918573e-05, %v6402_v26 }
 0x2bc   : > { %v4893_v38 = vpop.eup %4892  ;;  %v6415_v30 = vmul.f32 0.70710677, %v6407_v47  ;;  %vm6418_vm15 = vcmp.eq.f32.partialorder %v3048_v29, 8.507059e+37  ;;  %v3066_v2 = vmul.f32 %v3065_v56, %v6343_v61  ;;  %v3076_v16 = vadd.f32 0.4994258, %v3075_v11 }
 0x2bd   : > { %v4545_v17 = vclamps-f32 %v3013_v59, 1.0  ;;  %v3040_v44 = vmul.f32 %v4893_v38, %v6377_v58  ;;  %v3099_v60 = vadd.f32 0.00028619796, %v3098_v1  ;;  %v3110_v63 = vadd.f32 0.001143296, %v3109_v27 }
 0x2be   : > { %v3136_v46 = vmul.f32 %v6415_v30, %v6415_v30  ;;  %v6425_v23 = vpack.c.b16 %v1877_v25, %v1877_v25  ;;  %v1882_v10 = vshll.u32 %v6254_v0, 16  ;;  %v3077_v18 = vmul.f32 %v3076_v16, %v6343_v61  ;;  %v1731_v25 = vpop.f32.mrf.mxu1 }
 0x2bf   : > { %v3905_v21 = vadd.f32 1.0, %v4545_v17  ;;  %v3041_v54 = vsub.f32 1.0, %v3040_v44  ;;  %v3100_v5 = vmul.f32 %v3099_v60, %v6402_v26  ;;  %v3111_v39 = vmul.f32 %v3110_v63, %v6402_v26  ;;  %v2135_v63 = vpop.f32.mrf.mxu2 }
 0x2c0   : > { %v6431_v36 = vmin.f32 %v3136_v46, 16.0  ;;  %vm3045_vm2 = vweird.f32 %v4893_v38  ;;  %v3067_v49 = vadd.f32 1.1283791, %v3066_v2  ;;  %v3051_v9 = vor.u32 1.1754944e-38, %v3050_v48  ;;  %v2224_v46 = vpop.f32.mrf.mxu3 }
 0x2c1   : > { %v3937_v28 = vmul.f32 %v3905_v21, %v6349_v8  ;;  %v3042_v15 = vmul.f32 %v4893_v38, %v3041_v54  ;;  %v6434_v29 = vadd.f32 1.0, %v3077_v18  ;;  %v3101_v53 = vadd.f32 0.0036580483, %v3100_v5  ;;  %vm3046_vm3 = vmor %vm3044_vm14, %vm3045_vm2 }
 0x2c2   : > { %v3112_v12 = vadd.f32 0.014752088, %v3111_v39  ;;  %v3138_v32 = vmul.f32 2.1237322e-06, %v6431_v36  ;;  %v3149_v41 = vmul.f32 3.8918573e-05, %v6431_v36  ;;  %v3028_v27 = vmul.f32 %v3027_v7, %v6280_v22 }
 0x2c3   : > { %v4687_v40 = vpack.c.bf16 %v3937_v28, %v3936_v37  ;;  %v3043_v61 = vadd.f32 %v4893_v38, %v3042_v15  ;;  %4894 = vrcp.f32 %v6434_v29  ;;  %v1880_v8 = vshrl.u32 %v6254_v0, 16 }
 0x2c4   : > { %v1884_v59 = vrot.slane %v1882_v10, 1  ;;  %v1887_v56 = vshll.u32 %v6425_v23, 16  ;;  %v3102_v37 = vmul.f32 %v3101_v53, %v6402_v26  ;;  %v3113_v1 = vmul.f32 %v3112_v12, %v6402_v26  ;;  %v2313_v12 = vpop.f32.mrf.mxu0 }
 0x2c5   : > { %4747 = vst [vmem:[%s6087_s26 + $0x20] sm:$0xff] %v4687_v40   ;;  %v3047_v11 = vsel %vm3046_vm3, %v4893_v38, %v3043_v61  ;;  %v3139_v48 = vadd.f32 0.00028619796, %v3138_v32  ;;  %v6450_v17 = vmul.f32 0.5, %v6373_v31  ;;  %v3150_v44 = vadd.f32 0.001143296, %v3149_v41 }
 0x2c6   : > { %v3052_v58 = vsel %vm6418_vm15, %v3051_v9, %v3047_v11  ;;  %v6453_v2 = vmul.f32 %v3067_v49, %v6330_v3  ;;  %v3103_v16 = vadd.f32 0.05243302, %v3102_v37  ;;  %v3114_v60 = vadd.f32 0.112945676, %v3113_v1 }
 0x2c7   : > { %v3140_v38 = vmul.f32 %v3139_v48, %v6431_v36  ;;  %v3151_v21 = vmul.f32 %v3150_v44, %v6431_v36  ;;  %v1885_v54 = vor.u32 %v1884_v59, %v1880_v8  ;;  %v1889_v22 = vrot.slane %v1887_v56, 1 }
 0x2c8   : > { %v1892_v7 = vrot.slane %v6254_v0, 1  ;;  %v3053_v42 = vmul.f32 %v3052_v58, %v3028_v27  ;;  %v3104_v31 = vmul.f32 %v3103_v16, %v6402_v26  ;;  %v3115_v10 = vmul.f32 %v3114_v60, %v6402_v26 }
 0x2c9   : > { %v3141_v18 = vadd.f32 0.0036580483, %v3140_v38  ;;  %v4895_v3 = vpop.eup %4894  ;;  %v3152_v5 = vadd.f32 0.014752088, %v3151_v21  ;;  %v1890_v39 = vsel %vm523_vm0, %v1885_v54, %v1889_v22  ;;  %v1893_v28 = vrot.slane %v6425_v23, 1  ;;  %v2227_v54 = vpop.f32.mrf.mxu3 }
 0x2ca   : > { %v2223_v15 = vadd.f32 %v2222_v62, %v2133_v34  ;;  %v3080_v49 = vmul.f32 %v4895_v3, %v6434_v29  ;;  %v3088_v9 = vand.u32 2147483647, %v6434_v29  ;;  %v3090_v53 = vand.u32 2147483648, %v6434_v29  ;;  %2261 = vmatmul.bf16.gmra.mxu3 %v1890_v39  ;;  %v1734_v62 = vpop.f32.mrf.mxu1 }
 0x2cb   : > { %v3105_v0 = vadd.f32 0.18741608, %v3104_v31  ;;  %v3116_v40 = vadd.f32 0.4994258, %v3115_v10  ;;  %v3142_v61 = vmul.f32 %v3141_v18, %v6431_v36  ;;  %v3153_v32 = vmul.f32 %v3152_v5, %v6431_v36 }
 0x2cc   : > { %v1894_v41 = vsel %vm732_vm1, %v1892_v7, %v1893_v28  ;;  %v4546_v8 = vclamps-f32 %v3053_v42, 1.0  ;;  %v3081_v59 = vsub.f32 1.0, %v3080_v49  ;;  %vm3085_vm0 = vweird.f32 %v4895_v3 }
 0x2cd   : > { %2350 = vmatmul.bf16.gmra.mxu0 %v1894_v41  ;;  %v2312_v34 = vadd.f32 %v2311_v13, %v2223_v15  ;;  %v3117_v23 = vmul.f32 %v3116_v40, %v6402_v26  ;;  %v3143_v56 = vadd.f32 0.05243302, %v3142_v61  ;;  %v3154_v11 = vadd.f32 0.112945676, %v3153_v32 }
 0x2ce   : > { %v1732_v37 = vadd.f32 %v1731_v25, %v5748_v6  ;;  %v3082_v1 = vmul.f32 %v4895_v3, %v3081_v59  ;;  %v3106_v48 = vmul.f32 %v3105_v0, %v6402_v26  ;;  %v2225_v58 = vadd.f32 %v2224_v46, %v2135_v63  ;;  %v2138_v25 = vpop.f32.mrf.mxu2 }
 0x2cf   : > { %v2402_v27 = vadd.f32 %v2312_v34, %v6399_v35  ;;  %v6472_v44 = vadd.f32 1.0, %v3117_v23  ;;  %v3144_v16 = vmul.f32 %v3143_v56, %v6431_v36  ;;  %v3155_v60 = vmul.f32 %v3154_v11, %v6431_v36 }
 0x2d0   : > { %v1821_v13 = vadd.f32 %v1732_v37, %v5746_v4  ;;  %v3083_v38 = vadd.f32 %v4895_v3, %v3082_v1  ;;  %vm3084_vm1 = vweird.f32 %v6434_v29  ;;  %v2314_v6 = vadd.f32 %v2313_v12, %v2225_v58 }
 0x2d1   : > { %v2501_v21 = vmul.f32 %v6304_v55, %v2402_v27  ;;  %v3906_v26 = vadd.f32 1.0, %v4546_v8  ;;  %vm3086_vm4 = vmor %vm3084_vm1, %vm3085_vm0  ;;  %vm3089_vm5 = vcmp.eq.f32.partialorder %v3088_v9, 8.507059e+37  ;;  %v3091_v35 = vor.u32 1.1754944e-38, %v3090_v53  ;;  %v2229_v37 = vpop.f32.mrf.mxu3 }
 0x2d2   : > { %4896 = vrcp.f32 %v6472_v44  ;;  %v3087_v63 = vsel %vm3086_vm4, %v4895_v3, %v3083_v38  ;;  %v3145_v46 = vadd.f32 0.18741608, %v3144_v16  ;;  %v3156_v22 = vadd.f32 0.4994258, %v3155_v60  ;;  %v2316_v3 = vpop.f32.mrf.mxu0  ;;  %v1736_v12 = vpop.f32.mrf.mxu1 }
 0x2d3   : > { %v6482_v4 = vadd.f32 %v6315_v43, %v2501_v21  ;;  %v3092_v7 = vsel %vm3089_vm5, %v3091_v35, %v3087_v63  ;;  %v3107_v29 = vadd.f32 1.1283791, %v3106_v48  ;;  %v6485_v42 = vmul.f32 0.5, %v6407_v47 }
 0x2d4   : > { %v2403_v31 = vadd.f32 %v2314_v6, %v1821_v13  ;;  %v3093_v10 = vmul.f32 %v3092_v7, %v6453_v2  ;;  %v3128_v18 = vand.u32 2147483647, %v6472_v44  ;;  %v3130_v5 = vand.u32 2147483648, %v6472_v44 }
 0x2d5   : > { %v3157_v39 = vmul.f32 %v3156_v22, %v6431_v36  ;;  %v6492_v28 = vmul.f32 0.70710677, %v6482_v4  ;;  %v1735_v49 = vadd.f32 %v1734_v62, %v5757_v50  ;;  %v2228_v9 = vadd.f32 %v2227_v54, %v2138_v25 }
 0x2d6   : > { %v2502_v15 = vmul.f32 %v6304_v55, %v2403_v31  ;;  %v3938_v47 = vmul.f32 %v3906_v26, %v6352_v45  ;;  %v4547_v53 = vclamps-f32 %v3093_v10, 1.0  ;;  %v3146_v2 = vmul.f32 %v3145_v46, %v6431_v36 }
 0x2d7   : > { %v6498_v0 = vadd.f32 1.0, %v3157_v39  ;;  %v3176_v61 = vmul.f32 %v6492_v28, %v6492_v28  ;;  %v1822_v41 = vadd.f32 %v1735_v49, %v5755_v57  ;;  %v2317_v8 = vadd.f32 %v2316_v3, %v2228_v9 }
 0x2d8   : > { %v4897_v40 = vpop.eup %4896  ;;  %v6503_v32 = vadd.f32 %v6315_v43, %v2502_v15  ;;  %v3907_v50 = vadd.f32 1.0, %v4547_v53  ;;  %v3108_v59 = vmul.f32 %v3107_v29, %v6381_v20  ;;  %vm3124_vm6 = vweird.f32 %v6472_v44  ;;  %v2140_v20 = vpop.f32.mrf.mxu2 }
 0x2d9   : > { %v3120_v45 = vmul.f32 %v4897_v40, %v6472_v44  ;;  %vm6509_vm7 = vcmp.eq.f32.partialorder %v3128_v18, 8.507059e+37  ;;  %v3131_v34 = vor.u32 1.1754944e-38, %v3130_v5  ;;  %4898 = vrcp.f32 %v6498_v0 }
 0x2da   : > { %v1737_v62 = vadd.f32 %v1736_v12, %v5762_v52  ;;  %v3939_v23 = vmul.f32 %v3907_v50, %v6360_v51  ;;  %v3147_v56 = vadd.f32 1.1283791, %v3146_v2  ;;  %v6516_v11 = vmin.f32 %v3176_v61, 16.0  ;;  %v2318_v35 = vpop.f32.mrf.mxu0  ;;  %v1739_v12 = vpop.f32.mrf.mxu1 }
 0x2db   : > { %v3121_v57 = vsub.f32 1.0, %v3120_v45  ;;  %vm3125_vm8 = vweird.f32 %v4897_v40  ;;  %v3168_v1 = vand.u32 2147483647, %v6498_v0  ;;  %v6520_v48 = vmul.f32 0.70710677, %v6503_v32 }
 0x2dc   : > { %v2404_v27 = vadd.f32 %v2317_v8, %v1822_v41  ;;  %v4692_v58 = vpack.c.bf16 %v3939_v23, %v3938_v47  ;;  %v3178_v52 = vmul.f32 2.1237322e-06, %v6516_v11  ;;  %v3189_v51 = vmul.f32 3.8918573e-05, %v6516_v11  ;;  %vm3126_vm9 = vmor %vm3124_vm6, %vm3125_vm8 }
 0x2dd   : > { %v3122_v16 = vmul.f32 %v4897_v40, %v3121_v57  ;;  %v3216_v60 = vmul.f32 %v6520_v48, %v6520_v48  ;;  %v1823_v38 = vadd.f32 %v1737_v62, %v5760_v19  ;;  %v2230_v21 = vadd.f32 %v2229_v37, %v2140_v20 }
 0x2de   : > { %v2503_v13 = vmul.f32 %v6304_v55, %v2404_v27  ;;  %4748 = vst [vmem:[%s6087_s26 + $0x28] sm:$0xff] %v4692_v58   ;;  %v3148_v25 = vmul.f32 %v3147_v56, %v6415_v30  ;;  %v3179_v54 = vadd.f32 0.00028619796, %v3178_v52  ;;  %v3190_v26 = vadd.f32 0.001143296, %v3189_v51 }
 0x2df   : > { %v3123_v6 = vadd.f32 %v4897_v40, %v3122_v16  ;;  %v4899_v63 = vpop.eup %4898  ;;  %vm3164_vm10 = vweird.f32 %v6498_v0  ;;  %v3170_v46 = vand.u32 2147483648, %v6498_v0  ;;  %v6535_v22 = vmin.f32 %v3216_v60, 16.0 }
 0x2e0   : > { %v2319_v19 = vadd.f32 %v2318_v35, %v2230_v21  ;;  %v3160_v29 = vmul.f32 %v4899_v63, %v6498_v0  ;;  %vm6538_vm11 = vcmp.eq.f32.partialorder %v3168_v1, 8.507059e+37  ;;  %v3180_v31 = vmul.f32 %v3179_v54, %v6516_v11 }
 0x2e1   : > { %v3127_v7 = vsel %vm3126_vm9, %v4897_v40, %v3123_v6  ;;  %v6544_v10 = vadd.f32 %v6315_v43, %v2503_v13  ;;  %v3191_v18 = vmul.f32 %v3190_v26, %v6516_v11  ;;  %v3218_v5 = vmul.f32 2.1237322e-06, %v6535_v22  ;;  %v2143_v13 = vpop.f32.mrf.mxu2 }
 0x2e2   : > { %v3132_v44 = vsel %vm6509_vm7, %v3131_v34, %v3127_v7  ;;  %v3229_v39 = vmul.f32 3.8918573e-05, %v6535_v22  ;;  %v3161_v15 = vsub.f32 1.0, %v3160_v29  ;;  %vm3165_vm12 = vweird.f32 %v4899_v63 }
 0x2e3   : > { %v3133_v3 = vmul.f32 %v3132_v44, %v3108_v59  ;;  %v3181_v49 = vadd.f32 0.0036580483, %v3180_v31  ;;  %v3192_v9 = vadd.f32 0.014752088, %v3191_v18  ;;  %v3219_v47 = vadd.f32 0.00028619796, %v3218_v5  ;;  %vm3166_vm13 = vmor %vm3164_vm10, %vm3165_vm12 }
 0x2e4   : > { %v3230_v53 = vadd.f32 0.001143296, %v3229_v39  ;;  %v2405_v2 = vadd.f32 %v2319_v19, %v1823_v38  ;;  %v3162_v61 = vmul.f32 %v4899_v63, %v3161_v15  ;;  %v6553_v8 = vmul.f32 0.70710677, %v6544_v10  ;;  %v2232_v38 = vpop.f32.mrf.mxu3 }
 0x2e5   : > { %v4548_v40 = vclamps-f32 %v3133_v3, 1.0  ;;  %v3182_v41 = vmul.f32 %v3181_v49, %v6516_v11  ;;  %v3171_v50 = vor.u32 1.1754944e-38, %v3170_v46  ;;  %v3193_v45 = vmul.f32 %v3192_v9, %v6516_v11 }
 0x2e6   : > { %v3220_v59 = vmul.f32 %v3219_v47, %v6535_v22  ;;  %v3231_v36 = vmul.f32 %v3230_v53, %v6535_v22  ;;  %v3163_v34 = vadd.f32 %v4899_v63, %v3162_v61  ;;  %v3256_v23 = vmul.f32 %v6553_v8, %v6553_v8 }
 0x2e7   : > { %v3183_v62 = vadd.f32 0.05243302, %v3182_v41  ;;  %v1740_v57 = vadd.f32 %v1739_v12, %v5771_v24  ;;  %v3194_v56 = vadd.f32 0.112945676, %v3193_v45  ;;  %v2504_v1 = vmul.f32 %v6304_v55, %v2405_v2  ;;  %v2321_v2 = vpop.f32.mrf.mxu0 }
 0x2e8   : > { %v3221_v20 = vadd.f32 0.0036580483, %v3220_v59  ;;  %v3232_v37 = vadd.f32 0.014752088, %v3231_v36  ;;  %v3908_v27 = vadd.f32 1.0, %v4548_v40  ;;  %v3167_v58 = vsel %vm3166_vm13, %v4899_v63, %v3163_v34  ;;  %v1741_v36 = vpop.f32.mrf.mxu1 }
 0x2e9   : > { %v3184_v16 = vmul.f32 %v3183_v62, %v6516_v11  ;;  %v6566_v52 = vmin.f32 %v3256_v23, 16.0  ;;  %v3172_v51 = vsel %vm6538_vm11, %v3171_v50, %v3167_v58  ;;  %v3195_v24 = vmul.f32 %v3194_v56, %v6516_v11 }
 0x2ea   : > { %v3222_v60 = vmul.f32 %v3221_v20, %v6535_v22  ;;  %v3233_v0 = vmul.f32 %v3232_v37, %v6535_v22  ;;  %v3173_v21 = vmul.f32 %v3172_v51, %v3148_v25  ;;  %v1824_v19 = vadd.f32 %v1740_v57, %v5769_v14 }
 0x2eb   : > { %v3185_v6 = vadd.f32 0.18741608, %v3184_v16  ;;  %v3258_v54 = vmul.f32 2.1237322e-06, %v6566_v52  ;;  %v3269_v26 = vmul.f32 3.8918573e-05, %v6566_v52  ;;  %v2233_v31 = vadd.f32 %v2232_v38, %v2143_v13  ;;  %v2145_v16 = vpop.f32.mrf.mxu2 }
 0x2ec   : > { %v3196_v35 = vadd.f32 0.4994258, %v3195_v24  ;;  %v3223_v63 = vadd.f32 0.05243302, %v3222_v60  ;;  %v3234_v46 = vadd.f32 0.112945676, %v3233_v0  ;;  %v6583_v49 = vadd.f32 %v6315_v43, %v2504_v1  ;;  %v2234_v51 = vpop.f32.mrf.mxu3 }
 0x2ed   : > { %v4549_v7 = vclamps-f32 %v3173_v21, 1.0  ;;  %v3259_v29 = vadd.f32 0.00028619796, %v3258_v54  ;;  %v3270_v30 = vadd.f32 0.001143296, %v3269_v26  ;;  %v3186_v44 = vmul.f32 %v3185_v6, %v6516_v11 }
 0x2ee   : > { %v3197_v18 = vmul.f32 %v3196_v35, %v6516_v11  ;;  %v3224_v25 = vmul.f32 %v3223_v63, %v6535_v22  ;;  %v3235_v5 = vmul.f32 %v3234_v46, %v6535_v22  ;;  %v3940_v14 = vmul.f32 %v3908_v27, %v6450_v17  ;;  %v7383_v46 = vld [vmem:[#allocation48_spill] sm:$0xff] }
 0x2ef   : > { %v3909_v39 = vadd.f32 1.0, %v4549_v7  ;;  %v3260_v3 = vmul.f32 %v3259_v29, %v6566_v52  ;;  %v3271_v15 = vmul.f32 %v3270_v30, %v6566_v52  ;;  %v2322_v61 = vadd.f32 %v2321_v2, %v2233_v31 }
 0x2f0   : > { %v6586_v9 = vadd.f32 1.0, %v3197_v18  ;;  %v3225_v47 = vadd.f32 0.18741608, %v3224_v25  ;;  %v3236_v53 = vadd.f32 0.4994258, %v3235_v5  ;;  %v1742_v58 = vadd.f32 %v1741_v36, %v5776_v33  ;;  %v1744_v2 = vpop.f32.mrf.mxu1  ;;  %v7386_v36 = vld [vmem:[#allocation50_spill] sm:$0xff] }
 0x2f1   : > { %v3941_v11 = vmul.f32 %v3909_v39, %v6485_v42  ;;  %v3261_v12 = vadd.f32 0.0036580483, %v3260_v3  ;;  %v3272_v40 = vadd.f32 0.014752088, %v3271_v15  ;;  %v3187_v41 = vadd.f32 1.1283791, %v3186_v44 }
 0x2f2   : > { %4900 = vrcp.f32 %v6586_v9  ;;  %v3226_v45 = vmul.f32 %v3225_v47, %v6535_v22  ;;  %v3237_v59 = vmul.f32 %v3236_v53, %v6535_v22  ;;  %v3208_v34 = vand.u32 2147483647, %v6586_v9 }
 0x2f3   : > { %v4697_v50 = vpack.c.bf16 %v3941_v11, %v3940_v14  ;;  %v3262_v17 = vmul.f32 %v3261_v12, %v6566_v52  ;;  %v3210_v62 = vand.u32 2147483648, %v6586_v9  ;;  %v3273_v42 = vmul.f32 %v3272_v40, %v6566_v52 }
 0x2f4   : > { %v6597_v23 = vmul.f32 0.70710677, %v6583_v49  ;;  %v3227_v57 = vadd.f32 1.1283791, %v3226_v45  ;;  %v6600_v56 = vadd.f32 1.0, %v3237_v59  ;;  %v2406_v37 = vadd.f32 %v2322_v61, %v1824_v19  ;;  %v2323_v61 = vpop.f32.mrf.mxu0 }
 0x2f5   : > { %4749 = vst [vmem:[%s6087_s26 + $0x30] sm:$0xff] %v4697_v50   ;;  %v3263_v20 = vadd.f32 0.05243302, %v3262_v17  ;;  %v6603_v22 = vmul.f32 0.5, %v6482_v4  ;;  %v3274_v1 = vadd.f32 0.112945676, %v3273_v42  ;;  %v3188_v24 = vmul.f32 %v3187_v41, %v6492_v28 }
 0x2f6   : > { %v3296_v27 = vmul.f32 %v6597_v23, %v6597_v23  ;;  %vm3204_vm14 = vweird.f32 %v6586_v9  ;;  %v6611_v60 = vmul.f32 0.5, %v6503_v32  ;;  %4902 = vrcp.f32 %v6600_v56 }
 0x2f7   : > { %v3211_v4 = vor.u32 1.1754944e-38, %v3210_v62  ;;  %v3264_v13 = vmul.f32 %v3263_v20, %v6566_v52  ;;  %v3275_v38 = vmul.f32 %v3274_v1, %v6566_v52  ;;  %vm6619_vm15 = vcmp.eq.f32.partialorder %v3208_v34, 8.507059e+37 }
 0x2f8   : > { %v4901_v0 = vpop.eup %4900  ;;  %v6616_v21 = vmin.f32 %v3296_v27, 16.0  ;;  %v6624_v28 = vmul.f32 %v3227_v57, %v6520_v48  ;;  %v2505_v32 = vmul.f32 %v6304_v55, %v2406_v37  ;;  %v2235_v54 = vadd.f32 %v2234_v51, %v2145_v16 }
 0x2f9   : > { %v3200_v33 = vmul.f32 %v4901_v0, %v6586_v9  ;;  %v3248_v26 = vand.u32 2147483647, %v6600_v56  ;;  %v3265_v35 = vadd.f32 0.18741608, %v3264_v13  ;;  %v3276_v63 = vadd.f32 0.4994258, %v3275_v38  ;;  %v2237_v13 = vpop.f32.mrf.mxu3 }
 0x2fa   : > { %v1825_v19 = vadd.f32 %v1742_v58, %v7383_v46  ;;  %v3298_v29 = vmul.f32 2.1237322e-06, %v6616_v21  ;;  %v3309_v30 = vmul.f32 3.8918573e-05, %v6616_v21  ;;  %v6632_v31 = vadd.f32 %v6315_v43, %v2505_v32 }
 0x2fb   : > { %v3201_v7 = vsub.f32 1.0, %v3200_v33  ;;  %vm3244_vm2 = vweird.f32 %v6600_v56  ;;  %v3250_v48 = vand.u32 2147483648, %v6600_v56  ;;  %v3266_v44 = vmul.f32 %v3265_v35, %v6566_v52  ;;  %v7387_v33 = vld [vmem:[#allocation49_spill] sm:$0xff] }
 0x2fc   : > { %v3277_v18 = vmul.f32 %v3276_v63, %v6566_v52  ;;  %v4903_v25 = vpop.eup %4902  ;;  %vm3205_vm3 = vweird.f32 %v4901_v0  ;;  %v3299_v39 = vadd.f32 0.00028619796, %v3298_v29  ;;  %v3310_v3 = vadd.f32 0.001143296, %v3309_v30 }
 0x2fd   : > { %v3202_v5 = vmul.f32 %v4901_v0, %v3201_v7  ;;  %v3240_v15 = vmul.f32 %v4903_v25, %v6600_v56  ;;  %vm6639_vm0 = vcmp.eq.f32.partialorder %v3248_v26, 8.507059e+37  ;;  %v3267_v47 = vadd.f32 1.1283791, %v3266_v44  ;;  %vm3206_vm1 = vmor %vm3204_vm14, %vm3205_vm3 }
 0x2fe   : > { %v6643_v53 = vadd.f32 1.0, %v3277_v18  ;;  %v3300_v12 = vmul.f32 %v3299_v39, %v6616_v21  ;;  %v3311_v52 = vmul.f32 %v3310_v3, %v6616_v21  ;;  %v6648_v40 = vmul.f32 0.70710677, %v6632_v31  ;;  %v1746_v3 = vpop.f32.mrf.mxu1 }
 0x2ff   : > { %v3203_v11 = vadd.f32 %v4901_v0, %v3202_v5  ;;  %v3241_v41 = vsub.f32 1.0, %v3240_v15  ;;  %v3251_v50 = vor.u32 1.1754944e-38, %v3250_v48  ;;  %v2324_v45 = vadd.f32 %v2323_v61, %v2235_v54 }
 0x300   : > { %4904 = vrcp.f32 %v6643_v53  ;;  %vm3245_vm4 = vweird.f32 %v4903_v25  ;;  %v3301_v17 = vadd.f32 0.0036580483, %v3300_v12  ;;  %v1745_v34 = vadd.f32 %v1744_v2, %v7386_v36  ;;  %v2326_v2 = vpop.f32.mrf.mxu0 }
 0x301   : > { %v3207_v59 = vsel %vm3206_vm1, %v4901_v0, %v3203_v11  ;;  %v3242_v42 = vmul.f32 %v4903_v25, %v3241_v41  ;;  %v3312_v57 = vadd.f32 0.014752088, %v3311_v52  ;;  %v3336_v20 = vmul.f32 %v6648_v40, %v6648_v40  ;;  %vm3246_vm5 = vmor %vm3244_vm2, %vm3245_vm4 }
 0x302   : > { %v3212_v62 = vsel %vm6619_vm15, %v3211_v4, %v3207_v59  ;;  %v3268_v37 = vmul.f32 %v3267_v47, %v6553_v8  ;;  %v3288_v1 = vand.u32 2147483647, %v6643_v53  ;;  %v3302_v27 = vmul.f32 %v3301_v17, %v6616_v21  ;;  %v2148_v4 = vpop.f32.mrf.mxu2 }
 0x303   : > { %v3213_v9 = vmul.f32 %v3212_v62, %v3188_v24  ;;  %v3243_v58 = vadd.f32 %v4903_v25, %v3242_v42  ;;  %v3290_v16 = vand.u32 2147483648, %v6643_v53  ;;  %v3313_v51 = vmul.f32 %v3312_v57, %v6616_v21 }
 0x304   : > { %v6663_v0 = vmin.f32 %v3336_v20, 16.0  ;;  %vm3284_vm6 = vweird.f32 %v6643_v53  ;;  %v3303_v8 = vadd.f32 0.05243302, %v3302_v27  ;;  %v2407_v24 = vadd.f32 %v2324_v45, %v1825_v19 }
 0x305   : > { %v4550_v38 = vclamps-f32 %v3213_v9, 1.0  ;;  %v1826_v6 = vadd.f32 %v1745_v34, %v7387_v33  ;;  %v3247_v54 = vsel %vm3246_vm5, %v4903_v25, %v3243_v58  ;;  %v3314_v26 = vadd.f32 0.112945676, %v3313_v51 }
 0x306   : > { %v4905_v32 = vpop.eup %4904  ;;  %v3338_v35 = vmul.f32 2.1237322e-06, %v6663_v0  ;;  %v3349_v63 = vmul.f32 3.8918573e-05, %v6663_v0  ;;  %v3252_v46 = vsel %vm6639_vm0, %v3251_v50, %v3247_v54  ;;  %vm6675_vm7 = vcmp.eq.f32.partialorder %v3288_v1, 8.507059e+37 }
 0x307   : > { %v3280_v7 = vmul.f32 %v4905_v32, %v6643_v53  ;;  %v2238_v29 = vadd.f32 %v2237_v13, %v2148_v4  ;;  %v3910_v19 = vadd.f32 1.0, %v4550_v38  ;;  %v3253_v30 = vmul.f32 %v3252_v46, %v6624_v28  ;;  %v6713_v38 = vld [vmem:[%s7244_s3] ss:$0 sm:$0xff] }
 0x308   : > { %v3315_v48 = vmul.f32 %v3314_v26, %v6616_v21  ;;  %v3339_v44 = vadd.f32 0.00028619796, %v3338_v35  ;;  %v3304_v25 = vmul.f32 %v3303_v8, %v6616_v21  ;;  %v3350_v5 = vadd.f32 0.001143296, %v3349_v63 }
 0x309   : > { %v3281_v18 = vsub.f32 1.0, %v3280_v7  ;;  %v2506_v39 = vmul.f32 %v6304_v55, %v2407_v24  ;;  %v4551_v15 = vclamps-f32 %v3253_v30, 1.0  ;;  %vm3285_vm8 = vweird.f32 %v4905_v32  ;;  %v7391_v7 = vld [vmem:[#allocation51_spill] sm:$0xff] }
 0x30a   : > { %v3316_v14 = vadd.f32 0.4994258, %v3315_v48  ;;  %v3340_v47 = vmul.f32 %v3339_v44, %v6663_v0  ;;  %v3351_v12 = vmul.f32 %v3350_v5, %v6663_v0  ;;  %v2327_v52 = vadd.f32 %v2326_v2, %v2238_v29  ;;  %vm3286_vm9 = vmor %vm3284_vm6, %vm3285_vm8  ;;  %v2150_v58 = vpop.f32.mrf.mxu2 }
 0x30b   : > { %v3282_v11 = vmul.f32 %v4905_v32, %v3281_v18  ;;  %v6686_v28 = vadd.f32 %v6315_v43, %v2506_v39  ;;  %v3911_v61 = vadd.f32 1.0, %v4551_v15  ;;  %v3291_v41 = vor.u32 1.1754944e-38, %v3290_v16  ;;  %v2239_v16 = vpop.f32.mrf.mxu3  ;;  %v2328_v18 = vpop.f32.mrf.mxu0 }
 0x30c   : > { %v3317_v50 = vmul.f32 %v3316_v14, %v6616_v21  ;;  %v3341_v45 = vadd.f32 0.0036580483, %v3340_v47  ;;  %v3305_v59 = vadd.f32 0.18741608, %v3304_v25  ;;  %v3352_v17 = vadd.f32 0.014752088, %v3351_v12 }
 0x30d   : > { %v3283_v55 = vadd.f32 %v4905_v32, %v3282_v11  ;;  %v6690_v36 = vmul.f32 0.70710677, %v6686_v28  ;;  %v3942_v34 = vmul.f32 %v3910_v19, %v6603_v22  ;;  %v3943_v62 = vmul.f32 %v3911_v61, %v6611_v60  ;;  %v7392_v25 = vld [vmem:[#allocation54_spill] sm:$0xff] }
 0x30e   : > { %v6697_v43 = vadd.f32 1.0, %v3317_v50  ;;  %v3342_v42 = vmul.f32 %v3341_v45, %v6663_v0  ;;  %v3353_v20 = vmul.f32 %v3352_v17, %v6663_v0  ;;  %v2408_v1 = vadd.f32 %v2327_v52, %v1826_v6 }
 0x30f   : > { %v3287_v57 = vsel %vm3286_vm9, %v4905_v32, %v3283_v55  ;;  %v3376_v9 = vmul.f32 %v6690_v36, %v6690_v36  ;;  %v4702_v27 = vpack.c.bf16 %v3943_v62, %v3942_v34  ;;  %v3306_v53 = vmul.f32 %v3305_v59, %v6616_v21  ;;  %v7390_v21 = vld [vmem:[#allocation52_spill] sm:$0xff]  ;;  %v1749_v32 = vpop.f32.mrf.mxu1  ;;  %v7393_v59 = vld [vmem:[#allocation53_spill] sm:$0xff] }
 0x310   : > { %v3292_v22 = vsel %vm6675_vm7, %v3291_v41, %v3287_v57  ;;  %4906 = vrcp.f32 %v6697_v43  ;;  %v3343_v51 = vadd.f32 0.05243302, %v3342_v42  ;;  %v3354_v4 = vadd.f32 0.112945676, %v3353_v20 }
 0x311   : > { %v3293_v60 = vmul.f32 %v3292_v22, %v3268_v37  ;;  %4750 = vst [vmem:[%s6087_s26 + $0x38] sm:$0xff] %v4702_v27   ;;  %v6708_v13 = vmin.f32 %v3376_v9, 16.0  ;;  %v2507_v8 = vmul.f32 %v6713_v38, %v2408_v1  ;;  %v2568_v24 = vmul.f32 0.5, %v6544_v10  ;;  %v6728_v10 = vld [vmem:[%s7244_s3 + $0x1] ss:$0 sm:$0xff] }
 0x312   : > { %v6718_v37 = vmul.f32 0.5, %v6583_v49  ;;  %v1747_v6 = vadd.f32 %v1746_v3, %v7390_v21  ;;  %v3344_v54 = vmul.f32 %v3343_v51, %v6663_v0  ;;  %v3355_v26 = vmul.f32 %v3354_v4, %v6663_v0  ;;  %v2153_v20 = vpop.f32.mrf.mxu2 }
 0x313   : > { %v4552_v33 = vclamps-f32 %v3293_v60, 1.0  ;;  %v3378_v35 = vmul.f32 2.1237322e-06, %v6708_v13  ;;  %v3389_v63 = vmul.f32 3.8918573e-05, %v6708_v13  ;;  %v6731_v49 = vadd.f32 %v6728_v10, %v2507_v8  ;;  %v2242_v9 = vpop.f32.mrf.mxu3 }
 0x314   : > { %v3307_v46 = vadd.f32 1.1283791, %v3306_v53  ;;  %v1827_v56 = vadd.f32 %v1747_v6, %v7391_v7  ;;  %v2240_v29 = vadd.f32 %v2239_v16, %v2150_v58  ;;  %v3345_v30 = vadd.f32 0.18741608, %v3344_v54  ;;  %v2331_v54 = vpop.f32.mrf.mxu0 }
 0x315   : > { %v3356_v48 = vadd.f32 0.4994258, %v3355_v26  ;;  %v3379_v44 = vadd.f32 0.00028619796, %v3378_v35  ;;  %v1750_v5 = vadd.f32 %v1749_v32, %v7392_v25  ;;  %v3328_v3 = vand.u32 2147483647, %v6697_v43 }
 0x316   : > { %v4907_v19 = vpop.eup %4906  ;;  %v3330_v15 = vand.u32 2147483648, %v6697_v43  ;;  %v3390_v14 = vadd.f32 0.001143296, %v3389_v63  ;;  %v3912_v47 = vadd.f32 1.0, %v4552_v33  ;;  %v6742_v61 = vmul.f32 0.70710677, %v6731_v49 }
 0x317   : > { %v3320_v39 = vmul.f32 %v4907_v19, %v6697_v43  ;;  %vm3325_vm10 = vweird.f32 %v4907_v19  ;;  %v3357_v2 = vmul.f32 %v3356_v48, %v6663_v0  ;;  %v3380_v11 = vmul.f32 %v3379_v44, %v6708_v13 }
 0x318   : > { %v3391_v52 = vmul.f32 %v3390_v14, %v6708_v13  ;;  %v2329_v41 = vadd.f32 %v2328_v18, %v2240_v29  ;;  %v3346_v50 = vmul.f32 %v3345_v30, %v6663_v0  ;;  %v1828_v17 = vadd.f32 %v1750_v5, %v7393_v59 }
 0x319   : > { %v3321_v12 = vsub.f32 1.0, %v3320_v39  ;;  %v6745_v45 = vadd.f32 1.0, %v3357_v2  ;;  %v3381_v55 = vadd.f32 0.0036580483, %v3380_v11  ;;  %v3416_v42 = vmul.f32 %v6742_v61, %v6742_v61  ;;  %v1751_v2 = vpop.f32.mrf.mxu1 }
 0x31a   : > { %v3392_v62 = vadd.f32 0.014752088, %v3391_v52  ;;  %v2409_v57 = vadd.f32 %v2329_v41, %v1827_v56  ;;  %v3308_v1 = vmul.f32 %v3307_v46, %v6597_v23  ;;  %vm3324_vm11 = vweird.f32 %v6697_v43 }
 0x31b   : > { %v3322_v34 = vmul.f32 %v4907_v19, %v3321_v12  ;;  %vm3329_vm12 = vcmp.eq.f32.partialorder %v3328_v3, 8.507059e+37  ;;  %4908 = vrcp.f32 %v6745_v45  ;;  %v3331_v27 = vor.u32 1.1754944e-38, %v3330_v15  ;;  %vm3326_vm13 = vmor %vm3324_vm11, %vm3325_vm10 }
 0x31c   : > { %v3382_v22 = vmul.f32 %v3381_v55, %v6708_v13  ;;  %v3393_v60 = vmul.f32 %v3392_v62, %v6708_v13  ;;  %v3347_v53 = vadd.f32 1.1283791, %v3346_v50  ;;  %v6756_v58 = vmin.f32 %v3416_v42, 16.0 }
 0x31d   : > { %v3323_v0 = vadd.f32 %v4907_v19, %v3322_v34  ;;  %v2508_v16 = vmul.f32 %v6713_v38, %v2409_v57  ;;  %v2243_v51 = vadd.f32 %v2242_v9, %v2153_v20  ;;  %v3944_v23 = vmul.f32 %v3912_v47, %v2568_v24 }
 0x31e   : > { %v3383_v43 = vadd.f32 0.05243302, %v3382_v22  ;;  %v3394_v8 = vadd.f32 0.112945676, %v3393_v60  ;;  %v3418_v21 = vmul.f32 2.1237322e-06, %v6756_v58  ;;  %v3348_v24 = vmul.f32 %v3347_v53, %v6648_v40  ;;  %v2155_v53 = vpop.f32.mrf.mxu2 }
 0x31f   : > { %v3327_v4 = vsel %vm3326_vm13, %v4907_v19, %v3323_v0  ;;  %v3429_v6 = vmul.f32 3.8918573e-05, %v6756_v58  ;;  %v6762_v32 = vadd.f32 %v6728_v10, %v2508_v16  ;;  %v2332_v46 = vadd.f32 %v2331_v54, %v2243_v51  ;;  %v2244_v16 = vpop.f32.mrf.mxu3  ;;  %v7395_v54 = vld [vmem:[#allocation55_spill] sm:$0xff] }
 0x320   : > { %v3332_v33 = vsel %vm3329_vm12, %v3331_v27, %v3327_v4  ;;  %v3384_v35 = vmul.f32 %v3383_v43, %v6708_v13  ;;  %v3395_v63 = vmul.f32 %v3394_v8, %v6708_v13  ;;  %v3368_v56 = vand.u32 2147483647, %v6745_v45 }
 0x321   : > { %v3333_v26 = vmul.f32 %v3332_v33, %v3308_v1  ;;  %v4909_v7 = vpop.eup %4908  ;;  %v3419_v29 = vadd.f32 0.00028619796, %v3418_v21  ;;  %v3430_v19 = vadd.f32 0.001143296, %v3429_v6  ;;  %v3370_v44 = vand.u32 2147483648, %v6745_v45  ;;  %v7394_v1 = vld [vmem:[#allocation56_spill] sm:$0xff] }
 0x322   : > { %v3360_v48 = vmul.f32 %v4909_v7, %v6745_v45  ;;  %v3385_v18 = vadd.f32 0.18741608, %v3384_v35  ;;  %v3396_v25 = vadd.f32 0.4994258, %v3395_v63  ;;  %v6773_v3 = vmul.f32 0.70710677, %v6762_v32 }
 0x323   : > { %v4553_v30 = vclamps-f32 %v3333_v26, 1.0  ;;  %v3420_v5 = vmul.f32 %v3419_v29, %v6756_v58  ;;  %v3431_v39 = vmul.f32 %v3430_v19, %v6756_v58  ;;  %v2410_v47 = vadd.f32 %v2332_v46, %v1828_v17 }
 0x324   : > { %v3361_v40 = vsub.f32 1.0, %v3360_v48  ;;  %v3386_v14 = vmul.f32 %v3385_v18, %v6708_v13  ;;  %v3397_v11 = vmul.f32 %v3396_v25, %v6708_v13  ;;  %v3456_v41 = vmul.f32 %v6773_v3, %v6773_v3 }
 0x325   : > { %v3913_v15 = vadd.f32 1.0, %v4553_v30  ;;  %v3421_v12 = vadd.f32 0.0036580483, %v3420_v5  ;;  %v3432_v52 = vadd.f32 0.014752088, %v3431_v39  ;;  %vm3365_vm14 = vweird.f32 %v4909_v7 }
 0x326   : > { %v3362_v55 = vmul.f32 %v4909_v7, %v3361_v40  ;;  %v2509_v59 = vmul.f32 %v6713_v38, %v2410_v47  ;;  %v6781_v34 = vadd.f32 1.0, %v3397_v11  ;;  %v6785_v42 = vmin.f32 %v3456_v41, 16.0 }
 0x327   : > { %v3945_v50 = vmul.f32 %v3913_v15, %v6718_v37  ;;  %v3422_v62 = vmul.f32 %v3421_v12, %v6756_v58  ;;  %v3433_v17 = vmul.f32 %v3432_v52, %v6756_v58  ;;  %vm3364_vm15 = vweird.f32 %v6745_v45 }
 0x328   : > { %v3363_v57 = vadd.f32 %v4909_v7, %v3362_v55  ;;  %v3371_v20 = vor.u32 1.1754944e-38, %v3370_v44  ;;  %vm3366_vm2 = vmor %vm3364_vm15, %vm3365_vm14  ;;  %v3387_v37 = vadd.f32 1.1283791, %v3386_v14  ;;  %4910 = vrcp.f32 %v6781_v34 }
 0x329   : > { %v4707_v13 = vpack.c.bf16 %v3945_v50, %v3944_v23  ;;  %v6790_v9 = vadd.f32 %v6728_v10, %v2509_v59  ;;  %v1752_v0 = vadd.f32 %v1751_v2, %v7394_v1  ;;  %vm3369_vm3 = vcmp.eq.f32.partialorder %v3368_v56, 8.507059e+37  ;;  %v1754_v56 = vpop.f32.mrf.mxu1 }
 0x32a   : > { %v3367_v27 = vsel %vm3366_vm2, %v4909_v7, %v3363_v57  ;;  %v3423_v22 = vadd.f32 0.05243302, %v3422_v62  ;;  %v3434_v60 = vadd.f32 0.112945676, %v3433_v17  ;;  %v2570_v51 = vmul.f32 0.5, %v6632_v31 }
 0x32b   : > { %4751 = vst [vmem:[%s6087_s26 + $0x40] sm:$0xff] %v4707_v13   ;;  %v3372_v45 = vsel %vm3369_vm3, %v3371_v20, %v3367_v27  ;;  %v3458_v23 = vmul.f32 2.1237322e-06, %v6785_v42  ;;  %v3469_v33 = vmul.f32 3.8918573e-05, %v6785_v42  ;;  %v1829_v26 = vadd.f32 %v1752_v0, %v7395_v54 }
 0x32c   : > { %v3373_v4 = vmul.f32 %v3372_v45, %v3348_v24  ;;  %v3424_v43 = vmul.f32 %v3423_v22, %v6756_v58  ;;  %v3435_v8 = vmul.f32 %v3434_v60, %v6756_v58  ;;  %v6800_v6 = vmul.f32 0.70710677, %v6790_v9  ;;  %v2333_v24 = vpop.f32.mrf.mxu0  ;;  %v7398_v22 = vld [vmem:[#allocation58_spill] sm:$0xff] }
 0x32d   : > { %v3459_v21 = vadd.f32 0.00028619796, %v3458_v23  ;;  %v2245_v35 = vadd.f32 %v2244_v16, %v2155_v53  ;;  %v6804_v63 = vmul.f32 0.5, %v6686_v28  ;;  %v3388_v31 = vmul.f32 %v3387_v37, %v6690_v36  ;;  %v2158_v53 = vpop.f32.mrf.mxu2 }
 0x32e   : > { %v3425_v46 = vadd.f32 0.18741608, %v3424_v43  ;;  %v3436_v7 = vadd.f32 0.4994258, %v3435_v8  ;;  %v4911_v29 = vpop.eup %4910  ;;  %v3470_v30 = vadd.f32 0.001143296, %v3469_v33  ;;  %v3496_v48 = vmul.f32 %v6800_v6, %v6800_v6  ;;  %v2247_v43 = vpop.f32.mrf.mxu3 }
 0x32f   : > { %v3460_v19 = vmul.f32 %v3459_v21, %v6785_v42  ;;  %v2334_v44 = vadd.f32 %v2333_v24, %v2245_v35  ;;  %v4554_v18 = vclamps-f32 %v3373_v4, 1.0  ;;  %v3400_v25 = vmul.f32 %v4911_v29, %v6781_v34 }
 0x330   : > { %v3408_v28 = vand.u32 2147483647, %v6781_v34  ;;  %v3426_v5 = vmul.f32 %v3425_v46, %v6756_v58  ;;  %v3437_v36 = vmul.f32 %v3436_v7, %v6756_v58  ;;  %v3471_v15 = vmul.f32 %v3470_v30, %v6785_v42 }
 0x331   : > { %v3461_v39 = vadd.f32 0.0036580483, %v3460_v19  ;;  %v6815_v40 = vmin.f32 %v3496_v48, 16.0  ;;  %v3401_v14 = vsub.f32 1.0, %v3400_v25  ;;  %vm3404_vm0 = vweird.f32 %v6781_v34  ;;  %v6839_v8 = vpop.f32.mrf.mxu1 }
 0x332   : > { %v3410_v47 = vand.u32 2147483648, %v6781_v34  ;;  %v2411_v2 = vadd.f32 %v2334_v44, %v1829_v26  ;;  %v6819_v11 = vadd.f32 1.0, %v3437_v36  ;;  %v3472_v52 = vadd.f32 0.014752088, %v3471_v15 }
 0x333   : > { %v3462_v12 = vmul.f32 %v3461_v39, %v6785_v42  ;;  %v3498_v41 = vmul.f32 2.1237322e-06, %v6815_v40  ;;  %v3402_v50 = vmul.f32 %v4911_v29, %v3401_v14  ;;  %vm3405_vm1 = vweird.f32 %v4911_v29 }
 0x334   : > { %v3509_v58 = vmul.f32 3.8918573e-05, %v6815_v40  ;;  %v2510_v55 = vmul.f32 %v6713_v38, %v2411_v2  ;;  %v3914_v59 = vadd.f32 1.0, %v4554_v18  ;;  %vm6825_vm4 = vcmp.eq.f32.partialorder %v3408_v28, 8.507059e+37  ;;  %vm3406_vm5 = vmor %vm3404_vm0, %vm3405_vm1 }
 0x335   : > { %v3427_v17 = vadd.f32 1.1283791, %v3426_v5  ;;  %4912 = vrcp.f32 %v6819_v11  ;;  %v3403_v13 = vadd.f32 %v4911_v29, %v3402_v50  ;;  %v3463_v57 = vadd.f32 0.05243302, %v3462_v12 }
 0x336   : > { %v3473_v20 = vmul.f32 %v3472_v52, %v6785_v42  ;;  %v3499_v37 = vadd.f32 0.00028619796, %v3498_v41  ;;  %v3411_v1 = vor.u32 1.1754944e-38, %v3410_v47  ;;  %v3510_v0 = vadd.f32 0.001143296, %v3509_v58 }
 0x337   : > { %v6834_v27 = vadd.f32 %v6728_v10, %v2510_v55  ;;  %v1755_v60 = vadd.f32 %v1754_v56, %v7398_v22  ;;  %v3407_v16 = vsel %vm3406_vm5, %v4911_v29, %v3403_v13  ;;  %v3464_v45 = vmul.f32 %v3463_v57, %v6785_v42  ;;  %v2160_v57 = vpop.f32.mrf.mxu2 }
 0x338   : > { %v3474_v23 = vadd.f32 0.112945676, %v3473_v20  ;;  %v3500_v4 = vmul.f32 %v3499_v37, %v6815_v40  ;;  %v3946_v33 = vmul.f32 %v3914_v59, %v2570_v51  ;;  %v3412_v34 = vsel %vm6825_vm4, %v3411_v1, %v3407_v16  ;;  %v7399_v51 = vld [vmem:[#allocation57_spill] sm:$0xff] }
 0x339   : > { %v3511_v21 = vmul.f32 %v3510_v0, %v6815_v40  ;;  %v6845_v54 = vmul.f32 0.70710677, %v6834_v27  ;;  %v3413_v26 = vmul.f32 %v3412_v34, %v3388_v31  ;;  %v3428_v35 = vmul.f32 %v3427_v17, %v6742_v61  ;;  %v2336_v31 = vpop.f32.mrf.mxu0  ;;  %v2249_v0 = vpop.f32.mrf.mxu3 }
 0x33a   : > { %v3475_v46 = vmul.f32 %v3474_v23, %v6785_v42  ;;  %v3501_v7 = vadd.f32 0.0036580483, %v3500_v4  ;;  %v1830_v19 = vadd.f32 %v1755_v60, %v7399_v51  ;;  %v2248_v30 = vadd.f32 %v2247_v43, %v2158_v53 }
 0x33b   : > { %v4913_v24 = vpop.eup %4912  ;;  %v3512_v56 = vadd.f32 0.014752088, %v3511_v21  ;;  %v3536_v29 = vmul.f32 %v6845_v54, %v6845_v54  ;;  %v4555_v48 = vclamps-f32 %v3413_v26, 1.0  ;;  %v3448_v18 = vand.u32 2147483647, %v6819_v11 }
 0x33c   : > { %v3440_v44 = vmul.f32 %v4913_v24, %v6819_v11  ;;  %v3465_v25 = vadd.f32 0.18741608, %v3464_v45  ;;  %v3476_v28 = vadd.f32 0.4994258, %v3475_v46  ;;  %v3502_v61 = vmul.f32 %v3501_v7, %v6815_v40 }
 0x33d   : > { %v3513_v5 = vmul.f32 %v3512_v56, %v6815_v40  ;;  %v6856_v36 = vmin.f32 %v3536_v29, 16.0  ;;  %v3915_v39 = vadd.f32 1.0, %v4555_v48  ;;  %vm3445_vm6 = vweird.f32 %v4913_v24 }
 0x33e   : > { %v3441_v15 = vsub.f32 1.0, %v3440_v44  ;;  %v3450_v14 = vand.u32 2147483648, %v6819_v11  ;;  %v3477_v47 = vmul.f32 %v3476_v28, %v6785_v42  ;;  %v2337_v52 = vadd.f32 %v2336_v31, %v2248_v30  ;;  %v7401_v31 = vld [vmem:[#allocation17_spill] sm:$0xff] }
 0x33f   : > { %v3514_v2 = vadd.f32 0.112945676, %v3513_v5  ;;  %v3538_v12 = vmul.f32 2.1237322e-06, %v6856_v36  ;;  %v3947_v41 = vmul.f32 %v3915_v39, %v6804_v63  ;;  %v3503_v58 = vadd.f32 0.05243302, %v3502_v61  ;;  %v1759_v63 = vpop.f32.mrf.mxu1 }
 0x340   : > { %v3442_v50 = vmul.f32 %v4913_v24, %v3441_v15  ;;  %v3549_v55 = vmul.f32 3.8918573e-05, %v6856_v36  ;;  %v3466_v59 = vmul.f32 %v3465_v25, %v6785_v42  ;;  %v6864_v62 = vadd.f32 1.0, %v3477_v47  ;;  %v2163_v47 = vpop.f32.mrf.mxu2 }
 0x341   : > { %v3515_v17 = vmul.f32 %v3514_v2, %v6815_v40  ;;  %v3539_v13 = vadd.f32 0.00028619796, %v3538_v12  ;;  %v4712_v20 = vpack.c.bf16 %v3947_v41, %v3946_v33  ;;  %vm3444_vm7 = vweird.f32 %v6819_v11  ;;  %v2338_v26 = vpop.f32.mrf.mxu0 }
 0x342   : > { %v3443_v37 = vadd.f32 %v4913_v24, %v3442_v50  ;;  %v3550_v1 = vadd.f32 0.001143296, %v3549_v55  ;;  %vm3446_vm8 = vmor %vm3444_vm7, %vm3445_vm6  ;;  %vm3449_vm9 = vcmp.eq.f32.partialorder %v3448_v18, 8.507059e+37  ;;  %v3451_v22 = vor.u32 1.1754944e-38, %v3450_v14 }
 0x343   : > { %4914 = vrcp.f32 %v6864_v62  ;;  %v2412_v42 = vadd.f32 %v2337_v52, %v1830_v19  ;;  %4752 = vst [vmem:[%s6087_s26 + $0x48] sm:$0xff] %v4712_v20   ;;  %v3504_v53 = vmul.f32 %v3503_v58, %v6815_v40  ;;  %v3516_v16 = vadd.f32 0.4994258, %v3515_v17  ;;  %v7404_v20 = vld [vmem:[#allocation20_spill] sm:$0xff] }
 0x344   : > { %v3447_v60 = vsel %vm3446_vm8, %v4913_v24, %v3443_v37  ;;  %v3540_v45 = vmul.f32 %v3539_v13, %v6856_v36  ;;  %v3467_v4 = vadd.f32 1.1283791, %v3466_v59  ;;  %v3551_v11 = vmul.f32 %v3550_v1, %v6856_v36  ;;  %v7400_v24 = vld [vmem:[#allocation59_spill] sm:$0xff] }
 0x345   : > { %v3452_v23 = vsel %vm3449_vm9, %v3451_v22, %v3447_v60  ;;  %v3488_v33 = vand.u32 2147483647, %v6864_v62  ;;  %v3517_v34 = vmul.f32 %v3516_v16, %v6815_v40  ;;  %v2511_v7 = vmul.f32 %v6713_v38, %v2412_v42 }
 0x346   : > { %v3453_v43 = vmul.f32 %v3452_v23, %v3428_v35  ;;  %v3541_v21 = vadd.f32 0.0036580483, %v3540_v45  ;;  %v3552_v46 = vadd.f32 0.014752088, %v3551_v11  ;;  %v1757_v56 = vadd.f32 %v6839_v8, %v7400_v24 }
 0x347   : > { %v2250_v29 = vadd.f32 %v2249_v0, %v2160_v57  ;;  %v3490_v51 = vand.u32 2147483648, %v6864_v62  ;;  %v3505_v19 = vadd.f32 0.18741608, %v3504_v53  ;;  %v6880_v30 = vadd.f32 1.0, %v3517_v34  ;;  %v1761_v41 = vpop.f32.mrf.mxu1  ;;  %v7405_v0 = vld [vmem:[#allocation19_spill] sm:$0xff] }
 0x348   : > { %v3542_v35 = vmul.f32 %v3541_v21, %v6856_v36  ;;  %v4556_v44 = vclamps-f32 %v3453_v43, 1.0  ;;  %v3553_v18 = vmul.f32 %v3552_v46, %v6856_v36  ;;  %v6885_v25 = vadd.f32 %v6728_v10, %v2511_v7 }
 0x349   : > { %v4915_v48 = vpop.eup %4914  ;;  %v1831_v28 = vadd.f32 %v1757_v56, %v7401_v31  ;;  %v2572_v61 = vmul.f32 0.5, %v6731_v49  ;;  %v6890_v8 = vmul.f32 0.5, %v6762_v32  ;;  %v2339_v39 = vadd.f32 %v2338_v26, %v2250_v29  ;;  %v2252_v32 = vpop.f32.mrf.mxu3 }
 0x34a   : > { %v3480_v5 = vmul.f32 %v4915_v48, %v6864_v62  ;;  %v3468_v15 = vmul.f32 %v3467_v4, %v6773_v3  ;;  %vm3484_vm10 = vweird.f32 %v6864_v62  ;;  %vm6895_vm11 = vcmp.eq.f32.partialorder %v3488_v33, 8.507059e+37  ;;  %v2341_v16 = vpop.f32.mrf.mxu0  ;;  %v7406_v4 = vld [vmem:[#allocation24_spill] sm:$0xff] }
 0x34b   : > { %4916 = vrcp.f32 %v6880_v30  ;;  %v3491_v12 = vor.u32 1.1754944e-38, %v3490_v51  ;;  %v3543_v49 = vadd.f32 0.05243302, %v3542_v35  ;;  %v3554_v52 = vadd.f32 0.112945676, %v3553_v18 }
 0x34c   : > { %v3481_v2 = vsub.f32 1.0, %v3480_v5  ;;  %v3916_v50 = vadd.f32 1.0, %v4556_v44  ;;  %vm3485_vm12 = vweird.f32 %v4915_v48  ;;  %v3506_v58 = vmul.f32 %v3505_v19, %v6815_v40 }
 0x34d   : > { %v6902_v3 = vmul.f32 0.70710677, %v6885_v25  ;;  %v3544_v59 = vmul.f32 %v3543_v49, %v6856_v36  ;;  %v3555_v17 = vmul.f32 %v3554_v52, %v6856_v36  ;;  %v2413_v13 = vadd.f32 %v2339_v39, %v1831_v28  ;;  %vm3486_vm13 = vmor %vm3484_vm10, %vm3485_vm12  ;;  %v2165_v49 = vpop.f32.mrf.mxu2 }
 0x34e   : > { %v3482_v55 = vmul.f32 %v4915_v48, %v3481_v2  ;;  %v1760_v37 = vadd.f32 %v1759_v63, %v7404_v20  ;;  %v2253_v1 = vadd.f32 %v2252_v32, %v2163_v47  ;;  %v1762_v22 = vadd.f32 %v1761_v41, %v7405_v0  ;;  %v7407_v63 = vld [vmem:[#allocation18_spill] sm:$0xff] }
 0x34f   : > { %v3576_v57 = vmul.f32 %v6902_v3, %v6902_v3  ;;  %v3545_v60 = vadd.f32 0.18741608, %v3544_v59  ;;  %v3556_v40 = vadd.f32 0.4994258, %v3555_v17  ;;  %v2512_v53 = vmul.f32 %v6713_v38, %v2413_v13 }
 0x350   : > { %v3483_v42 = vadd.f32 %v4915_v48, %v3482_v55  ;;  %v1832_v11 = vadd.f32 %v1760_v37, %v7406_v4  ;;  %v2342_v43 = vadd.f32 %v2341_v16, %v2253_v1  ;;  %v6918_v33 = vadd.f32 %v1762_v22, %v7407_v63 }
 0x351   : > { %v4917_v45 = vpop.eup %4916  ;;  %v6914_v23 = vmin.f32 %v3576_v57, 16.0  ;;  %v3528_v26 = vand.u32 2147483647, %v6880_v30  ;;  %v3530_v46 = vand.u32 2147483648, %v6880_v30  ;;  %v3557_v62 = vmul.f32 %v3556_v40, %v6856_v36  ;;  %v2254_v52 = vpop.f32.mrf.mxu3 }
 0x352   : > { %v3487_v34 = vsel %vm3486_vm13, %v4915_v48, %v3483_v42  ;;  %v3520_v21 = vmul.f32 %v4917_v45, %v6880_v30  ;;  %v3546_v19 = vmul.f32 %v3545_v60, %v6856_v36  ;;  %v6930_v35 = vadd.f32 %v6728_v10, %v2512_v53  ;;  %v2343_v22 = vpop.f32.mrf.mxu0 }
 0x353   : > { %v3492_v7 = vsel %vm6895_vm11, %v3491_v12, %v3487_v34  ;;  %v3578_v24 = vmul.f32 2.1237322e-06, %v6914_v23  ;;  %v3589_v56 = vmul.f32 3.8918573e-05, %v6914_v23  ;;  %v6932_v48 = vadd.f32 1.0, %v3557_v62 }
 0x354   : > { %v3493_v29 = vmul.f32 %v3492_v7, %v3468_v15  ;;  %v3521_v51 = vsub.f32 1.0, %v3520_v21  ;;  %v2414_v31 = vadd.f32 %v2342_v43, %v1832_v11  ;;  %v3507_v5 = vadd.f32 1.1283791, %v3506_v58 }
 0x355   : > { %v3579_v44 = vadd.f32 0.00028619796, %v3578_v24  ;;  %v3590_v18 = vadd.f32 0.001143296, %v3589_v56  ;;  %vm3525_vm14 = vweird.f32 %v4917_v45  ;;  %v3948_v14 = vmul.f32 %v3916_v50, %v2572_v61 }
 0x356   : > { %v4557_v28 = vclamps-f32 %v3493_v29, 1.0  ;;  %v3522_v39 = vmul.f32 %v4917_v45, %v3521_v51  ;;  %vm3524_vm15 = vweird.f32 %v6880_v30  ;;  %vm6935_vm2 = vcmp.eq.f32.partialorder %v3528_v26, 8.507059e+37 }
 0x357   : > { %4918 = vrcp.f32 %v6932_v48  ;;  %v3580_v2 = vmul.f32 %v3579_v44, %v6914_v23  ;;  %v3591_v12 = vmul.f32 %v3590_v18, %v6914_v23  ;;  %vm3526_vm3 = vmor %vm3524_vm15, %vm3525_vm14  ;;  %v3531_v32 = vor.u32 1.1754944e-38, %v3530_v46  ;;  %v1764_v44 = vpop.f32.mrf.mxu1 }
 0x358   : > { %v3917_v36 = vadd.f32 1.0, %v4557_v28  ;;  %v3523_v47 = vadd.f32 %v4917_v45, %v3522_v39  ;;  %v3547_v41 = vadd.f32 1.1283791, %v3546_v19  ;;  %v6943_v61 = vmul.f32 0.70710677, %v6930_v35 }
 0x359   : > { %v2513_v30 = vmul.f32 %v6713_v38, %v2414_v31  ;;  %v3581_v55 = vadd.f32 0.0036580483, %v3580_v2  ;;  %v3592_v59 = vadd.f32 0.014752088, %v3591_v12  ;;  %v2255_v20 = vadd.f32 %v2254_v52, %v2165_v49 }
 0x35a   : > { %v3949_v50 = vmul.f32 %v3917_v36, %v6890_v8  ;;  %v3527_v58 = vsel %vm3526_vm3, %v4917_v45, %v3523_v47  ;;  %v3616_v13 = vmul.f32 %v6943_v61, %v6943_v61  ;;  %v3508_v1 = vmul.f32 %v3507_v5, %v6800_v6 }
 0x35b   : > { %v3532_v17 = vsel %vm6935_vm2, %v3531_v32, %v3527_v58  ;;  %v6952_v57 = vadd.f32 %v6728_v10, %v2513_v30  ;;  %v3582_v0 = vmul.f32 %v3581_v55, %v6914_v23  ;;  %v3593_v8 = vmul.f32 %v3592_v59, %v6914_v23 }
 0x35c   : > { %v4717_v37 = vpack.c.bf16 %v3949_v50, %v3948_v14  ;;  %v3548_v60 = vmul.f32 %v3547_v41, %v6845_v54  ;;  %v6958_v40 = vmin.f32 %v3616_v13, 16.0  ;;  %v2344_v16 = vadd.f32 %v2343_v22, %v2255_v20  ;;  %v2168_v13 = vpop.f32.mrf.mxu2  ;;  %v2257_v20 = vpop.f32.mrf.mxu3 }
 0x35d   : > { %v4919_v42 = vpop.eup %4918  ;;  %v6961_v53 = vmul.f32 0.70710677, %v6952_v57  ;;  %v3533_v45 = vmul.f32 %v3532_v17, %v3508_v1  ;;  %vm3564_vm0 = vweird.f32 %v6932_v48  ;;  %v3570_v6 = vand.u32 2147483648, %v6932_v48 }
 0x35e   : > { %4753 = vst [vmem:[%s6087_s26 + $0x50] sm:$0xff] %v4717_v37   ;;  %v3560_v4 = vmul.f32 %v4919_v42, %v6932_v48  ;;  %v3594_v11 = vadd.f32 0.112945676, %v3593_v8  ;;  %v3618_v43 = vmul.f32 2.1237322e-06, %v6958_v40  ;;  %v2415_v46 = vadd.f32 %v2344_v16, %v6918_v33 }
 0x35f   : > { %v3629_v63 = vmul.f32 3.8918573e-05, %v6958_v40  ;;  %v3656_v54 = vmul.f32 %v6961_v53, %v6961_v53  ;;  %v3568_v21 = vand.u32 2147483647, %v6932_v48  ;;  %v3583_v26 = vadd.f32 0.05243302, %v3582_v0 }
 0x360   : > { %v3561_v34 = vsub.f32 1.0, %v3560_v4  ;;  %v3595_v7 = vmul.f32 %v3594_v11, %v6914_v23  ;;  %v3619_v62 = vadd.f32 0.00028619796, %v3618_v43  ;;  %v4558_v29 = vclamps-f32 %v3533_v45, 1.0 }
 0x361   : > { %v3630_v24 = vadd.f32 0.001143296, %v3629_v63  ;;  %v6974_v56 = vmin.f32 %v3656_v54, 16.0  ;;  %vm3565_vm1 = vweird.f32 %v4919_v42  ;;  %v3571_v19 = vor.u32 1.1754944e-38, %v3570_v6  ;;  %v1766_v54 = vpop.f32.mrf.mxu1 }
 0x362   : > { %v3562_v51 = vmul.f32 %v4919_v42, %v3561_v34  ;;  %v3596_v18 = vadd.f32 0.4994258, %v3595_v7  ;;  %v3620_v31 = vmul.f32 %v3619_v62, %v6958_v40  ;;  %v3584_v33 = vmul.f32 %v3583_v26, %v6914_v23  ;;  %vm3566_vm4 = vmor %vm3564_vm0, %vm3565_vm1  ;;  %v7411_v26 = vld [vmem:[#allocation27_spill] sm:$0xff] }
 0x363   : > { %v3631_v28 = vmul.f32 %v3630_v24, %v6958_v40  ;;  %v3658_v5 = vmul.f32 2.1237322e-06, %v6974_v56  ;;  %v3669_v14 = vmul.f32 3.8918573e-05, %v6974_v56  ;;  %v2514_v15 = vmul.f32 %v6713_v38, %v2415_v46 }
 0x364   : > { %v3563_v39 = vadd.f32 %v4919_v42, %v3562_v51  ;;  %v3597_v36 = vmul.f32 %v3596_v18, %v6914_v23  ;;  %v3621_v47 = vadd.f32 0.0036580483, %v3620_v31  ;;  %v3918_v49 = vadd.f32 1.0, %v4558_v29  ;;  %v2346_v51 = vpop.f32.mrf.mxu0 }
 0x365   : > { %v3632_v2 = vadd.f32 0.014752088, %v3631_v28  ;;  %v3659_v12 = vadd.f32 0.00028619796, %v3658_v5  ;;  %vm3569_vm5 = vcmp.eq.f32.partialorder %v3568_v21, 8.507059e+37  ;;  %v6992_v17 = vadd.f32 %v6728_v10, %v2514_v15  ;;  %v7412_v28 = vld [vmem:[#allocation22_spill] sm:$0xff] }
 0x366   : > { %v3567_v52 = vsel %vm3566_vm4, %v4919_v42, %v3563_v39  ;;  %v3670_v32 = vadd.f32 0.001143296, %v3669_v14  ;;  %v6985_v30 = vadd.f32 1.0, %v3597_v36  ;;  %v3622_v50 = vmul.f32 %v3621_v47, %v6958_v40  ;;  %v7410_v42 = vld [vmem:[#allocation23_spill] sm:$0xff] }
 0x367   : > { %v3572_v41 = vsel %vm3569_vm5, %v3571_v19, %v3567_v52  ;;  %v3633_v58 = vmul.f32 %v3632_v2, %v6958_v40  ;;  %v3660_v48 = vmul.f32 %v3659_v12, %v6974_v56  ;;  %v2574_v37 = vmul.f32 0.5, %v6790_v9  ;;  %v7413_v12 = vld [vmem:[#allocation21_spill] sm:$0xff]  ;;  %v2170_v52 = vpop.f32.mrf.mxu2 }
 0x368   : > { %v3573_v55 = vmul.f32 %v3572_v41, %v3548_v60  ;;  %v3671_v59 = vmul.f32 %v3670_v32, %v6974_v56  ;;  %v3585_v1 = vadd.f32 0.18741608, %v3584_v33  ;;  %4920 = vrcp.f32 %v6985_v30  ;;  %v2259_v32 = vpop.f32.mrf.mxu3 }
 0x369   : > { %v3623_v8 = vadd.f32 0.05243302, %v3622_v50  ;;  %v3634_v22 = vadd.f32 0.112945676, %v3633_v58  ;;  %v1765_v16 = vadd.f32 %v1764_v44, %v7410_v42  ;;  %v3950_v60 = vmul.f32 %v3918_v49, %v2574_v37 }
 0x36a   : > { %v4559_v0 = vclamps-f32 %v3573_v55, 1.0  ;;  %v2575_v45 = vmul.f32 0.5, %v6834_v27  ;;  %v3661_v4 = vadd.f32 0.0036580483, %v3660_v48  ;;  %v3672_v6 = vadd.f32 0.014752088, %v3671_v59 }
 0x36b   : > { %v3624_v43 = vmul.f32 %v3623_v8, %v6958_v40  ;;  %v3635_v63 = vmul.f32 %v3634_v22, %v6958_v40  ;;  %v7001_v9 = vmul.f32 0.70710677, %v6992_v17  ;;  %v1834_v46 = vadd.f32 %v1765_v16, %v7411_v26 }
 0x36c   : > { %v3919_v11 = vadd.f32 1.0, %v4559_v0  ;;  %v3662_v34 = vmul.f32 %v3661_v4, %v6974_v56  ;;  %v3673_v21 = vmul.f32 %v3672_v6, %v6974_v56  ;;  %v2258_v7 = vadd.f32 %v2257_v20, %v2168_v13 }
 0x36d   : > { %v3586_v27 = vmul.f32 %v3585_v1, %v6914_v23  ;;  %v3636_v24 = vadd.f32 0.4994258, %v3635_v63  ;;  %v3696_v29 = vmul.f32 %v7001_v9, %v7001_v9  ;;  %v3625_v44 = vadd.f32 0.18741608, %v3624_v43  ;;  %v2348_v43 = vpop.f32.mrf.mxu0 }
 0x36e   : > { %v3951_v62 = vmul.f32 %v3919_v11, %v2575_v45  ;;  %v4921_v19 = vpop.eup %4920  ;;  %v3674_v18 = vadd.f32 0.112945676, %v3673_v21  ;;  %v2347_v31 = vadd.f32 %v2346_v51, %v2258_v7  ;;  %v1767_v5 = vadd.f32 %v1766_v54, %v7412_v28 }
 0x36f   : > { %v3600_v33 = vmul.f32 %v4921_v19, %v6985_v30  ;;  %v3663_v14 = vadd.f32 0.05243302, %v3662_v34  ;;  %v3637_v15 = vmul.f32 %v3636_v24, %v6958_v40  ;;  %v7013_v23 = vmin.f32 %v3696_v29, 16.0  ;;  %v1769_v29 = vpop.f32.mrf.mxu1 }
 0x370   : > { %v4722_v39 = vpack.c.bf16 %v3951_v62, %v3950_v60  ;;  %v3675_v36 = vmul.f32 %v3674_v18, %v6974_v56  ;;  %v3587_v47 = vadd.f32 1.1283791, %v3586_v27  ;;  %v1835_v49 = vadd.f32 %v1767_v5, %v7413_v12  ;;  %v2173_v18 = vpop.f32.mrf.mxu2 }
 0x371   : > { %v3601_v2 = vsub.f32 1.0, %v3600_v33  ;;  %v3626_v41 = vmul.f32 %v3625_v44, %v6958_v40  ;;  %v7018_v50 = vadd.f32 1.0, %v3637_v15  ;;  %v2416_v55 = vadd.f32 %v2347_v31, %v1834_v46  ;;  %v2262_v31 = vpop.f32.mrf.mxu3 }
 0x372   : > { %4754 = vst [vmem:[%s6087_s26 + $0x58] sm:$0xff] %v4722_v39   ;;  %v3676_v58 = vadd.f32 0.4994258, %v3675_v36  ;;  %v3664_v59 = vmul.f32 %v3663_v14, %v6974_v56  ;;  %v3698_v13 = vmul.f32 2.1237322e-06, %v7013_v23  ;;  %vm3604_vm6 = vweird.f32 %v6985_v30 }
 0x373   : > { %v3602_v48 = vmul.f32 %v4921_v19, %v3601_v2  ;;  %v3709_v20 = vmul.f32 3.8918573e-05, %v7013_v23  ;;  %vm3605_vm7 = vweird.f32 %v4921_v19  ;;  %v3610_v37 = vand.u32 2147483648, %v6985_v30  ;;  %v7418_v2 = vld [vmem:[#allocation60_spill] sm:$0xff] }
 0x374   : > { %4922 = vrcp.f32 %v7018_v50  ;;  %v3677_v40 = vmul.f32 %v3676_v58, %v6974_v56  ;;  %v3699_v0 = vadd.f32 0.00028619796, %v3698_v13  ;;  %v2260_v8 = vadd.f32 %v2259_v32, %v2170_v52  ;;  %vm7029_vm8 = vmor %vm3604_vm6, %vm3605_vm7 }
 0x375   : > { %v3603_v1 = vadd.f32 %v4921_v19, %v3602_v48  ;;  %v3608_v22 = vand.u32 2147483647, %v6985_v30  ;;  %v3627_v42 = vadd.f32 1.1283791, %v3626_v41  ;;  %v3710_v16 = vadd.f32 0.001143296, %v3709_v20 }
 0x376   : > { %v2515_v60 = vmul.f32 %v6713_v38, %v2416_v55  ;;  %v3665_v4 = vadd.f32 0.18741608, %v3664_v59  ;;  %v7033_v6 = vadd.f32 1.0, %v3677_v40  ;;  %v3700_v11 = vmul.f32 %v3699_v0, %v7013_v23  ;;  %v2351_v40 = vpop.f32.mrf.mxu0 }
 0x377   : > { %v3607_v63 = vsel %vm7029_vm8, %v4921_v19, %v3603_v1  ;;  %v3648_v54 = vand.u32 2147483647, %v7018_v50  ;;  %v3711_v30 = vmul.f32 %v3710_v16, %v7013_v23  ;;  %v3611_v21 = vor.u32 1.1754944e-38, %v3610_v37  ;;  %v7419_v37 = vld [vmem:[#allocation25_spill] sm:$0xff] }
 0x378   : > { %v7041_v34 = vadd.f32 %v6728_v10, %v2515_v60  ;;  %v3650_v26 = vand.u32 2147483648, %v7018_v50  ;;  %4924 = vrcp.f32 %v7033_v6  ;;  %v2349_v46 = vadd.f32 %v2348_v43, %v2260_v8 }
 0x379   : > { %v3588_v62 = vmul.f32 %v3587_v47, %v6902_v3  ;;  %vm3609_vm9 = vcmp.eq.f32.partialorder %v3608_v22, 8.507059e+37  ;;  %v3628_v27 = vmul.f32 %v3627_v42, %v6943_v61  ;;  %v3701_v24 = vadd.f32 0.0036580483, %v3700_v11 }
 0x37a   : > { %v4923_v7 = vpop.eup %4922  ;;  %v3612_v51 = vsel %vm3609_vm9, %v3611_v21, %v3607_v63  ;;  %vm3644_vm10 = vweird.f32 %v7018_v50  ;;  %v3712_v44 = vadd.f32 0.014752088, %v3711_v30  ;;  %vm7049_vm11 = vcmp.eq.f32.partialorder %v3648_v54, 8.507059e+37 }
 0x37b   : > { %v3640_v19 = vmul.f32 %v4923_v7, %v7018_v50  ;;  %v3666_v5 = vmul.f32 %v3665_v4, %v6974_v56  ;;  %v3702_v3 = vmul.f32 %v3701_v24, %v7013_v23  ;;  %v7056_v61 = vmul.f32 0.70710677, %v7041_v34 }
 0x37c   : > { %v3651_v33 = vor.u32 1.1754944e-38, %v3650_v26  ;;  %v3713_v14 = vmul.f32 %v3712_v44, %v7013_v23  ;;  %v2417_v15 = vadd.f32 %v2349_v46, %v1835_v49  ;;  %v3613_v36 = vmul.f32 %v3612_v51, %v3588_v62 }
 0x37d   : > { %v3641_v39 = vsub.f32 1.0, %v3640_v19  ;;  %v3736_v47 = vmul.f32 %v7056_v61, %v7056_v61  ;;  %v1770_v12 = vadd.f32 %v1769_v29, %v7418_v2  ;;  %v2263_v52 = vadd.f32 %v2262_v31, %v2173_v18  ;;  %v4955_v18 = vld [vmem:[%s7244_s3] ss:$0 sm:$0xff]  ;;  %v1771_v2 = vpop.f32.mrf.mxu1 }
 0x37e   : > { %v4925_v32 = vpop.eup %4924  ;;  %vm3645_vm12 = vweird.f32 %v4923_v7  ;;  %v3714_v56 = vadd.f32 0.112945676, %v3713_v14  ;;  %v2516_v58 = vmul.f32 %v6713_v38, %v2417_v15  ;;  %vm3684_vm13 = vweird.f32 %v7033_v6 }
 0x37f   : > { %v3642_v41 = vmul.f32 %v4923_v7, %v3641_v39  ;;  %v3680_v55 = vmul.f32 %v4925_v32, %v7033_v6  ;;  %v3703_v48 = vadd.f32 0.05243302, %v3702_v3  ;;  %v7065_v59 = vmin.f32 %v3736_v47, 16.0  ;;  %vm3646_vm14 = vmor %vm3644_vm10, %vm3645_vm12  ;;  %v4956_v47 = vld [vmem:[%s7244_s3 + $0x1] ss:$0 sm:$0xff] }
 0x380   : > { %v3715_v13 = vmul.f32 %v3714_v56, %v7013_v23  ;;  %v7069_v20 = vadd.f32 %v6728_v10, %v2516_v58  ;;  %v1836_v1 = vadd.f32 %v1770_v12, %v7419_v37  ;;  %v4560_v0 = vclamps-f32 %v3613_v36, 1.0 }
 0x381   : > { %v3643_v49 = vadd.f32 %v4923_v7, %v3642_v41  ;;  %v3681_v38 = vsub.f32 1.0, %v3680_v55  ;;  %v3688_v8 = vand.u32 2147483647, %v7033_v6  ;;  %v2352_v22 = vadd.f32 %v2351_v40, %v2263_v52  ;;  %v2264_v41 = vpop.f32.mrf.mxu3  ;;  %v7422_v40 = vld [vmem:[#allocation61_spill] sm:$0xff] }
 0x382   : > { %vm3685_vm15 = vweird.f32 %v4925_v32  ;;  %v3716_v16 = vadd.f32 0.4994258, %v3715_v13  ;;  %v3749_v60 = vmul.f32 3.8918573e-05, %v7065_v59  ;;  %v3704_v4 = vmul.f32 %v3703_v48, %v7013_v23 }
 0x383   : > { %v3647_v42 = vsel %vm3646_vm14, %v4923_v7, %v3643_v49  ;;  %v3682_v45 = vmul.f32 %v4925_v32, %v3681_v38  ;;  %v3738_v11 = vmul.f32 2.1237322e-06, %v7065_v59  ;;  %v7082_v54 = vmul.f32 0.70710677, %v7069_v20  ;;  %vm7094_vm2 = vmor %vm3684_vm13, %vm3685_vm15 }
 0x384   : > { %v3652_v10 = vsel %vm7049_vm11, %v3651_v33, %v3647_v42  ;;  %v3717_v50 = vmul.f32 %v3716_v16, %v7013_v23  ;;  %v3750_v63 = vadd.f32 0.001143296, %v3749_v60  ;;  %v3920_v30 = vadd.f32 1.0, %v4560_v0 }
 0x385   : > { %v3653_v43 = vmul.f32 %v3652_v10, %v3628_v27  ;;  %v3683_v21 = vadd.f32 %v4925_v32, %v3682_v45  ;;  %v3690_v26 = vand.u32 2147483648, %v7033_v6  ;;  %v2418_v46 = vadd.f32 %v2352_v22, %v1836_v1 }
 0x386   : > { %v7085_v62 = vadd.f32 1.0, %v3717_v50  ;;  %v3751_v24 = vmul.f32 %v3750_v63, %v7065_v59  ;;  %v3776_v29 = vmul.f32 %v7082_v54, %v7082_v54  ;;  %v2576_v27 = vmul.f32 0.5, %v6885_v25  ;;  %v7423_v50 = vld [vmem:[#allocation26_spill] sm:$0xff] }
 0x387   : > { %v4561_v7 = vclamps-f32 %v3653_v43, 1.0  ;;  %v3705_v19 = vadd.f32 0.18741608, %v3704_v4  ;;  %v3739_v44 = vadd.f32 0.00028619796, %v3738_v11  ;;  %v2517_v31 = vmul.f32 %v4955_v18, %v2418_v46  ;;  %v2353_v4 = vpop.f32.mrf.mxu0 }
 0x388   : > { %v2577_v28 = vmul.f32 0.5, %v6930_v35  ;;  %v3687_v25 = vsel %vm7094_vm2, %v4925_v32, %v3683_v21  ;;  %4926 = vrcp.f32 %v7085_v62  ;;  %v3952_v6 = vmul.f32 %v3920_v30, %v2576_v27 }
 0x389   : > { %v3921_v3 = vadd.f32 1.0, %v4561_v7  ;;  %v3667_v39 = vadd.f32 1.1283791, %v3666_v5  ;;  %vm3689_vm3 = vcmp.eq.f32.partialorder %v3688_v8, 8.507059e+37  ;;  %v3691_v33 = vor.u32 1.1754944e-38, %v3690_v26  ;;  %v2175_v5 = vpop.f32.mrf.mxu2 }
 0x38a   : > { %v3752_v15 = vadd.f32 0.014752088, %v3751_v24  ;;  %v7105_v36 = vmin.f32 %v3776_v29, 16.0  ;;  %v7110_v35 = vadd.f32 %v4956_v47, %v2517_v31  ;;  %v3706_v52 = vmul.f32 %v3705_v19, %v7013_v23 }
 0x38b   : > { %v3953_v14 = vmul.f32 %v3921_v3, %v2577_v28  ;;  %v3692_v12 = vsel %vm3689_vm3, %v3691_v33, %v3687_v25  ;;  %v3740_v32 = vmul.f32 %v3739_v44, %v7065_v59  ;;  %v3668_v49 = vmul.f32 %v3667_v39, %v6961_v53 }
 0x38c   : > { %v3753_v58 = vmul.f32 %v3752_v15, %v7065_v59  ;;  %v3778_v55 = vmul.f32 2.1237322e-06, %v7105_v36  ;;  %v3789_v48 = vmul.f32 3.8918573e-05, %v7105_v36  ;;  %v7119_v13 = vmul.f32 0.70710677, %v7110_v35 }
 0x38d   : > { %v4727_v56 = vpack.c.bf16 %v3953_v14, %v3952_v6  ;;  %v1772_v0 = vadd.f32 %v1771_v2, %v7422_v40  ;;  %v2265_v38 = vadd.f32 %v2264_v41, %v2175_v5  ;;  %v3693_v8 = vmul.f32 %v3692_v12, %v3668_v49 }
 0x38e   : > { %v4927_v37 = vpop.eup %4926  ;;  %v3754_v1 = vadd.f32 0.112945676, %v3753_v58  ;;  %v3779_v23 = vadd.f32 0.00028619796, %v3778_v55  ;;  %v3707_v22 = vadd.f32 1.1283791, %v3706_v52  ;;  %v3816_v45 = vmul.f32 %v7119_v13, %v7119_v13 }
 0x38f   : > { %4755 = vst [vmem:[%s6087_s26 + $0x60] sm:$0xff] %v4727_v56   ;;  %v3720_v42 = vmul.f32 %v4927_v37, %v7085_v62  ;;  %v3741_v16 = vadd.f32 0.0036580483, %v3740_v32  ;;  %v3790_v53 = vadd.f32 0.001143296, %v3789_v48  ;;  %v1837_v63 = vadd.f32 %v1772_v0, %v7423_v50 }
 0x390   : > { %v3755_v60 = vmul.f32 %v3754_v1, %v7065_v59  ;;  %v3780_v10 = vmul.f32 %v3779_v23, %v7105_v36  ;;  %v3728_v43 = vand.u32 2147483647, %v7085_v62  ;;  %v2354_v30 = vadd.f32 %v2353_v4, %v2265_v38 }
 0x391   : > { %v3721_v11 = vsub.f32 1.0, %v3720_v42  ;;  %v3730_v21 = vand.u32 2147483648, %v7085_v62  ;;  %v3791_v46 = vmul.f32 %v3790_v53, %v7105_v36  ;;  %v7132_v7 = vmin.f32 %v3816_v45, 16.0 }
 0x392   : > { %v3756_v26 = vadd.f32 0.4994258, %v3755_v60  ;;  %vm3725_vm0 = vweird.f32 %v4927_v37  ;;  %v3742_v29 = vmul.f32 %v3741_v16, %v7065_v59  ;;  %v2419_v27 = vadd.f32 %v2354_v30, %v1837_v63 }
 0x393   : > { %v3722_v24 = vmul.f32 %v4927_v37, %v3721_v11  ;;  %v3708_v51 = vmul.f32 %v3707_v22, %v7001_v9  ;;  %v3781_v44 = vadd.f32 0.0036580483, %v3780_v10  ;;  %v3792_v31 = vadd.f32 0.014752088, %v3791_v46 }
 0x394   : > { %v3757_v19 = vmul.f32 %v3756_v26, %v7065_v59  ;;  %vm3724_vm1 = vweird.f32 %v7085_v62  ;;  %v3829_v3 = vmul.f32 3.8918573e-05, %v7132_v7  ;;  %v2518_v25 = vmul.f32 %v4955_v18, %v2419_v27 }
 0x395   : > { %v3723_v28 = vadd.f32 %v4927_v37, %v3722_v24  ;;  %v4562_v6 = vclamps-f32 %v3693_v8, 1.0  ;;  %vm3726_vm4 = vmor %vm3724_vm1, %vm3725_vm0  ;;  %v3731_v39 = vor.u32 1.1754944e-38, %v3730_v21  ;;  %v3793_v14 = vmul.f32 %v3792_v31, %v7105_v36 }
 0x396   : > { %v7139_v33 = vadd.f32 1.0, %v3757_v19  ;;  %vm3729_vm5 = vcmp.eq.f32.partialorder %v3728_v43, 8.507059e+37  ;;  %v3743_v9 = vadd.f32 0.05243302, %v3742_v29  ;;  %v3830_v2 = vadd.f32 0.001143296, %v3829_v3 }
 0x397   : > { %v3727_v15 = vsel %vm3726_vm4, %v4927_v37, %v3723_v28  ;;  %v3782_v52 = vmul.f32 %v3781_v44, %v7105_v36  ;;  %v7144_v62 = vadd.f32 %v4956_v47, %v2518_v25  ;;  %v3794_v18 = vadd.f32 0.112945676, %v3793_v14 }
 0x398   : > { %v3732_v12 = vsel %vm3729_vm5, %v3731_v39, %v3727_v15  ;;  %4928 = vrcp.f32 %v7139_v33  ;;  %v3818_v5 = vmul.f32 2.1237322e-06, %v7132_v7  ;;  %v3831_v41 = vmul.f32 %v3830_v2, %v7132_v7 }
 0x399   : > { %v3733_v32 = vmul.f32 %v3732_v12, %v3708_v51  ;;  %v3922_v56 = vadd.f32 1.0, %v4562_v6  ;;  %v3744_v55 = vmul.f32 %v3743_v9, %v7065_v59  ;;  %v3795_v48 = vmul.f32 %v3794_v18, %v7105_v36 }
 0x39a   : > { %v3783_v49 = vadd.f32 0.05243302, %v3782_v52  ;;  %v3832_v37 = vadd.f32 0.014752088, %v3831_v41  ;;  %v7151_v1 = vmul.f32 0.70710677, %v7144_v62  ;;  %vm3764_vm7 = vweird.f32 %v7139_v33 }
 0x39b   : > { %v4563_v58 = vclamps-f32 %v3733_v32, 1.0  ;;  %v2578_v47 = vmul.f32 0.5, %v6952_v57  ;;  %v2579_v23 = vmul.f32 0.5, %v6992_v17  ;;  %v3796_v0 = vadd.f32 0.4994258, %v3795_v48 }
 0x39c   : > { %v3819_v8 = vadd.f32 0.00028619796, %v3818_v5  ;;  %v3833_v22 = vmul.f32 %v3832_v37, %v7132_v7  ;;  %v3856_v42 = vmul.f32 %v7151_v1, %v7151_v1  ;;  %v3745_v10 = vadd.f32 0.18741608, %v3744_v55 }
 0x39d   : > { %v3923_v40 = vadd.f32 1.0, %v4563_v58  ;;  %v3954_v16 = vmul.f32 %v3922_v56, %v2578_v47  ;;  %v3784_v45 = vmul.f32 %v3783_v49, %v7105_v36  ;;  %v3797_v57 = vmul.f32 %v3796_v0, %v7105_v36 }
 0x39e   : > { %v4929_v38 = vpop.eup %4928  ;;  %v3834_v17 = vadd.f32 0.112945676, %v3833_v22  ;;  %v7161_v4 = vmin.f32 %v3856_v42, 16.0  ;;  %v3820_v63 = vmul.f32 %v3819_v8, %v7132_v7  ;;  %v3746_v24 = vmul.f32 %v3745_v10, %v7065_v59 }
 0x39f   : > { %v3955_v60 = vmul.f32 %v3923_v40, %v2579_v23  ;;  %v3760_v53 = vmul.f32 %v4929_v38, %v7139_v33  ;;  %v3798_v50 = vadd.f32 1.0, %v3797_v57  ;;  %v3785_v29 = vadd.f32 0.18741608, %v3784_v45 }
 0x3a0   : > { %v3835_v30 = vmul.f32 %v3834_v17, %v7132_v7  ;;  %v3858_v21 = vmul.f32 2.1237322e-06, %v7161_v4  ;;  %v3869_v46 = vmul.f32 3.8918573e-05, %v7161_v4  ;;  %vm3765_vm6 = vweird.f32 %v4929_v38 }
 0x3a1   : > { %v4732_v11 = vpack.c.bf16 %v3955_v60, %v3954_v16  ;;  %v3761_v43 = vsub.f32 1.0, %v3760_v53  ;;  %4930 = vrcp.f32 %v3798_v50  ;;  %v3770_v44 = vand.u32 2147483648, %v7139_v33  ;;  %vm3766_vm8 = vmor %vm3764_vm7, %vm3765_vm6 }
 0x3a2   : > { %v3836_v51 = vadd.f32 0.4994258, %v3835_v30  ;;  %v3859_v19 = vadd.f32 0.00028619796, %v3858_v21  ;;  %v3821_v31 = vadd.f32 0.0036580483, %v3820_v63  ;;  %v3786_v15 = vmul.f32 %v3785_v29, %v7105_v36 }
 0x3a3   : > { %4756 = vst [vmem:[%s6087_s26 + $0x68] sm:$0xff] %v4732_v11   ;;  %v3762_v26 = vmul.f32 %v4929_v38, %v3761_v43  ;;  %v3870_v28 = vadd.f32 0.001143296, %v3869_v46  ;;  %v3768_v3 = vand.u32 2147483647, %v7139_v33  ;;  %v3771_v12 = vor.u32 1.1754944e-38, %v3770_v44 }
 0x3a4   : > { %v3837_v25 = vmul.f32 %v3836_v51, %v7132_v7  ;;  %v3860_v6 = vmul.f32 %v3859_v19, %v7161_v4  ;;  %v3747_v39 = vadd.f32 1.1283791, %v3746_v24  ;;  %v3822_v52 = vmul.f32 %v3821_v31, %v7132_v7 }
 0x3a5   : > { %v3763_v27 = vadd.f32 %v4929_v38, %v3762_v26  ;;  %v3871_v59 = vmul.f32 %v3870_v28, %v7161_v4  ;;  %vm3769_vm9 = vcmp.eq.f32.partialorder %v3768_v3, 8.507059e+37  ;;  %v3787_v56 = vadd.f32 1.1283791, %v3786_v15 }
 0x3a6   : > { %v7176_v9 = vadd.f32 1.0, %v3837_v25  ;;  %v3861_v5 = vadd.f32 0.0036580483, %v3860_v6  ;;  %v3748_v41 = vmul.f32 %v3747_v39, %v7056_v61  ;;  %v3808_v36 = vand.u32 2147483647, %v3798_v50 }
 0x3a7   : > { %v3767_v14 = vsel %vm3766_vm8, %v4929_v38, %v3763_v27  ;;  %v4931_v2 = vpop.eup %4930  ;;  %v3872_v32 = vadd.f32 0.014752088, %v3871_v59  ;;  %v3810_v48 = vand.u32 2147483648, %v3798_v50  ;;  %v3823_v49 = vadd.f32 0.05243302, %v3822_v52 }
 0x3a8   : > { %v3800_v33 = vmul.f32 %v4931_v2, %v3798_v50  ;;  %v3772_v18 = vsel %vm3769_vm9, %v3771_v12, %v3767_v14  ;;  %4932 = vrcp.f32 %v7176_v9  ;;  %vm3805_vm10 = vweird.f32 %v4931_v2 }
 0x3a9   : > { %v3873_v55 = vmul.f32 %v3872_v32, %v7161_v4  ;;  %v3773_v37 = vmul.f32 %v3772_v18, %v3748_v41  ;;  %v3862_v40 = vmul.f32 %v3861_v5, %v7161_v4  ;;  %vm3804_vm11 = vweird.f32 %v3798_v50 }
 0x3aa   : > { %v3801_v58 = vsub.f32 1.0, %v3800_v33  ;;  %v3788_v61 = vmul.f32 %v3787_v56, %v7082_v54  ;;  %vm3806_vm12 = vmor %vm3804_vm11, %vm3805_vm10  ;;  %v3811_v22 = vor.u32 1.1754944e-38, %v3810_v48  ;;  %v3824_v42 = vmul.f32 %v3823_v49, %v7132_v7 }
 0x3ab   : > { %v3874_v23 = vadd.f32 0.112945676, %v3873_v55  ;;  %v4564_v16 = vclamps-f32 %v3773_v37, 1.0  ;;  %vm3809_vm13 = vcmp.eq.f32.partialorder %v3808_v36, 8.507059e+37  ;;  %v3863_v45 = vadd.f32 0.05243302, %v3862_v40 }
 0x3ac   : > { %v3802_v47 = vmul.f32 %v4931_v2, %v3801_v58  ;;  %v3825_v43 = vadd.f32 0.18741608, %v3824_v42  ;;  %v2580_v46 = vmul.f32 0.5, %v7041_v34  ;;  %v2581_v24 = vmul.f32 0.5, %v7069_v20 }
 0x3ad   : > { %v3875_v38 = vmul.f32 %v3874_v23, %v7161_v4  ;;  %v3924_v63 = vadd.f32 1.0, %v4564_v16  ;;  %v3864_v21 = vmul.f32 %v3863_v45, %v7161_v4  ;;  %v3850_v31 = vand.u32 2147483648, %v7176_v9 }
 0x3ae   : > { %v3803_v0 = vadd.f32 %v4931_v2, %v3802_v47  ;;  %v4933_v8 = vpop.eup %4932  ;;  %v3826_v27 = vmul.f32 %v3825_v43, %v7132_v7  ;;  %vm3844_vm15 = vweird.f32 %v7176_v9  ;;  %v3848_v25 = vand.u32 2147483647, %v7176_v9 }
 0x3af   : > { %v3840_v10 = vmul.f32 %v4933_v8, %v7176_v9  ;;  %v3876_v57 = vadd.f32 0.4994258, %v3875_v38  ;;  %v3956_v51 = vmul.f32 %v3924_v63, %v2580_v46  ;;  %vm3845_vm14 = vweird.f32 %v4933_v8 }
 0x3b0   : > { %v3807_v60 = vsel %vm3806_vm12, %v4931_v2, %v3803_v0  ;;  %v3865_v28 = vadd.f32 0.18741608, %v3864_v21  ;;  %vm3846_vm2 = vmor %vm3844_vm15, %vm3845_vm14  ;;  %v3827_v34 = vadd.f32 1.1283791, %v3826_v27  ;;  %v3851_v59 = vor.u32 1.1754944e-38, %v3850_v31 }
 0x3b1   : > { %v3812_v53 = vsel %vm3809_vm13, %v3811_v22, %v3807_v60  ;;  %v3841_v11 = vsub.f32 1.0, %v3840_v10  ;;  %v3877_v50 = vmul.f32 %v3876_v57, %v7161_v4  ;;  %vm3849_vm3 = vcmp.eq.f32.partialorder %v3848_v25, 8.507059e+37 }
 0x3b2   : > { %v3813_v17 = vmul.f32 %v3812_v53, %v3788_v61  ;;  %v3866_v7 = vmul.f32 %v3865_v28, %v7161_v4  ;;  %v3828_v15 = vmul.f32 %v3827_v34, %v7119_v13  ;;  %v2582_v48 = vmul.f32 0.5, %v7110_v35 }
 0x3b3   : > { %v3842_v54 = vmul.f32 %v4933_v8, %v3841_v11  ;;  %v3878_v26 = vadd.f32 1.0, %v3877_v50  ;;  %v2583_v49 = vmul.f32 0.5, %v7144_v62 }
 0x3b4   : > { %v4565_v30 = vclamps-f32 %v3813_v17, 1.0  ;;  %v3867_v12 = vadd.f32 1.1283791, %v3866_v7 }
 0x3b5   : > { %4934 = vrcp.f32 %v3878_v26  ;;  %v3843_v44 = vadd.f32 %v4933_v8, %v3842_v54  ;;  %v3890_v52 = vand.u32 2147483648, %v3878_v26  ;;  %v3888_v9 = vand.u32 2147483647, %v3878_v26 }
 0x3b6   : > { %v3925_v29 = vadd.f32 1.0, %v4565_v30  ;;  %vm3884_vm1 = vweird.f32 %v3878_v26  ;;  %v3868_v4 = vmul.f32 %v3867_v12, %v7151_v1 }
 0x3b7   : > { %v3847_v20 = vsel %vm3846_vm2, %v4933_v8, %v3843_v44  ;;  %v3891_v5 = vor.u32 1.1754944e-38, %v3890_v52  ;;  %vm3889_vm5 = vcmp.eq.f32.partialorder %v3888_v9, 8.507059e+37 }
 0x3b8   : > { %v3957_v19 = vmul.f32 %v3925_v29, %v2581_v24  ;;  %v3852_v14 = vsel %vm3849_vm3, %v3851_v59, %v3847_v20 }
 0x3b9   : > { %v3853_v32 = vmul.f32 %v3852_v14, %v3828_v15 }
 0x3ba   : > { %v4737_v3 = vpack.c.bf16 %v3957_v19, %v3956_v51 }
 0x3bb   : > { %v4935_v6 = vpop.eup %4934  ;;  %v4566_v41 = vclamps-f32 %v3853_v32, 1.0 }
 0x3bc   : > { %4757 = vst [vmem:[%s6087_s26 + $0x70] sm:$0xff] %v4737_v3   ;;  %v3880_v39 = vmul.f32 %v4935_v6, %v3878_v26  ;;  %vm3885_vm0 = vweird.f32 %v4935_v6 }
 0x3bd   : > { %vm3886_vm4 = vmor %vm3884_vm1, %vm3885_vm0  ;;  %v3926_v55 = vadd.f32 1.0, %v4566_v41 }
 0x3be   : > { %v3881_v2 = vsub.f32 1.0, %v3880_v39 }
 0x3bf   : > { %v3958_v1 = vmul.f32 %v3926_v55, %v2582_v48 }
 0x3c0   : > { %v3882_v33 = vmul.f32 %v4935_v6, %v3881_v2 }
 0x3c2   : > { %v3883_v18 = vadd.f32 %v4935_v6, %v3882_v33 }
 0x3c4   : > { %v3887_v56 = vsel %vm3886_vm4, %v4935_v6, %v3883_v18 }
 0x3c5   : > { %v3892_v13 = vsel %vm3889_vm5, %v3891_v5, %v3887_v56 }
 0x3c6   : > { %v3893_v58 = vmul.f32 %v3892_v13, %v3868_v4 }
 0x3c8   : > { %v4567_v36 = vclamps-f32 %v3893_v58, 1.0 }
 0x3ca   : > { %v3927_v37 = vadd.f32 1.0, %v4567_v36 }
 0x3cc   : > { %v3959_v47 = vmul.f32 %v3927_v37, %v2583_v49 }
 0x3ce   : > { %v4742_v23 = vpack.c.bf16 %v3959_v47, %v3958_v1 }
 0x3d0   : > { %4758 = vst [vmem:[%s6087_s26 + $0x78] sm:$0xff] %v4742_v23  }
 0x3d1   : > { %5074 = shalt.err (!%p5071_p0)
}
 0x3d2   : > { %s5142_s5 = smov 64   ;;  %s5143_s26 = smov 4  }
 0x3d3   : > { %4796 = dma.vmem_to_hbm [thread:$0]  (%p5243_p5), %s4041_s13, 2048, %s4043_s14, %s4025_s18, %s5142_s5, %s5142_s5, %s5143_s26  }
 0x3d4 PF: > { %s4057_s30 = sand.u32 1, %s5117_s15   ;;  %p4810_p3 = pnand %p4170_p11, %p5214_p6 }
 0x3d5   : > { %s4058_s19 = scalar_lea.sflag [#allocation5], %s4057_s30 }
 0x3d6   : > { %p4811_p7 = pneg %p4810_p3 }
 0x3d8   : > { %5112 = dma.done.wait (%p4811_p7), %s4058_s19, 2048  }
 0x3d9   : > { %5114 = vsyncadd (%p4811_p7), %s4058_s19, 4294965248  ;;  %s23_s20 = sadd.s32 1, %s5137_s20   ;;  %s7424_s6 = sld [smem:[#allocation16_spill]] }
 0x3da   : > { %p20_p9 = scmp.ge.s32.totalorder %s23_s20, 4   ;;  %s7425_s18 = sld [smem:[#allocation14_spill]] }
 0x3db   : > { %s7426_s19 = sld [smem:[#allocation15_spill]]  ;;  %s7427_s15 = smov %s5121_s16 }
 0x3dc   : > { %s7428_s16 = smov %s5125_s17  ;;  %22 = sbr.rel (!%p20_p9) target bundleno = 11 (0xb), region = 100 }
 0x3df   : > { %s7429_s17 = smov %s7424_s6 }
 0x3e1   :  { %4064 = vsyncpa [#allocation4], 1 }
 0x3e2   :  { %4066 = vsyncpa [#allocation4 + $0x1], 1 }
 0x3e3   :  { %4067 = vsyncpa [#allocation7], 1 }
 0x3e4   :  { %4069 = vsyncpa [#allocation7 + $0x1], 1 }
 0x3e5   :  { %4070 = vsyncpa [#allocation5], 1 }
 0x3e6   :  { %4072 = vsyncpa [#allocation5 + $0x1], 1 }

</bundles_post_ra>
